<compile_context>
chip_gen: v5e
topology: v5e:2x2
jax: 0.10.0
libtpu: 0.0.40
codegen_flags: <defaults>
</compile_context>

<pallas_src>
import functools

import jax
import jax.numpy as jnp
from jax import lax
from jax.experimental import pallas as pl
from jax.experimental.pallas import tpu as pltpu


# ---------------------------------------------------------------------------
# Fused kernel: grid = (batch,).  All L Res_blocks run inside one grid step.
# ---------------------------------------------------------------------------
def _r_subblock_kernel(x_ref, w1nc_ref, w1c_ref, b1_ref,
                       w2nc_ref, w2c_ref, b2_ref,
                       w3_ref, b3_ref, w4_ref, b4_ref, mask_ref,
                       o_ref, patch_ref, *, W):
    L = w1nc_ref.shape[0]
    C = o_ref.shape[1]
    HW = o_ref.shape[2]
    mdt = patch_ref.dtype

    # Non-center 3x3 taps, dy-major order (matches wrapper mask/weight layout).
    offs = tuple(dy * W + dx for dy in (-1, 0, 1) for dx in (-1, 0, 1)
                 if not (dy == 0 and dx == 0))

    # Output block is VMEM-resident for the whole grid step: use it as the
    # cross-Res_block activation carry (no separate act scratch, single HBM
    # writeback when the block is flushed at the end of the grid step).
    o_ref[0] = x_ref[0]

    def conv3x3(inp, wnc, wc, b):
        # inp: (C, HW) float32.  im2col of the 8 shifted taps via lane rolls +
        # precomputed boundary masks into the (8C, HW) patch (matmul dtype);
        # the centre tap is matmul'ed directly from the input.
        inp_m = inp.astype(mdt)
        for j, off in enumerate(offs):
            rolled = pltpu.roll(inp, shift=(-off) % HW, axis=1)
            patch_ref[j * C:(j + 1) * C, :] = rolled.astype(mdt) * mask_ref[j]
        acc = jnp.dot(wnc, patch_ref[...], preferred_element_type=jnp.float32)
        acc = acc + jnp.dot(wc, inp_m, preferred_element_type=jnp.float32)
        return acc + b                                            # bias (C, 1)

    def block(l, carry):
        x = o_ref[0]                                              # (C, HW) f32
        # y = conv2(relu(conv1(x)))
        y1 = jnp.maximum(conv3x3(x, w1nc_ref[l], w1c_ref[l], b1_ref[l]), 0.0)
        y2 = conv3x3(y1, w2nc_ref[l], w2c_ref[l], b2_ref[l])
        # Channel attention: global average pool + tiny 1x1 MLP.
        # Kept off the MXU: VPU multiply + cross-sublane / lane reduce.
        pool = jnp.mean(y2, axis=1, keepdims=True)                # (C, 1)
        z = jnp.maximum(
            jnp.sum(w3_ref[l] * pool, axis=0, keepdims=True) + b3_ref[l],
            0.0)                                                  # (1, Cr)
        ca = jax.nn.sigmoid(
            jnp.sum(w4_ref[l] * z, axis=1, keepdims=True) + b4_ref[l])  # (C, 1)
        o_ref[0] = y2 * ca + x                                    # residual; next carry
        return carry

    # All Res_blocks inside one grid step (weights fully VMEM-resident).
    lax.fori_loop(0, L, block, 0, unroll=True)


# ---------------------------------------------------------------------------
# Wrapper: whole R_subblock in one pallas_call.
# ---------------------------------------------------------------------------
def r_subblock_pallas(x_nchw, block_params, *, matmul_dtype=jnp.bfloat16):
    """x_nchw: (N, C, H, W) float32.  block_params: list of per-block dicts."""
    N, C, H, W = x_nchw.shape
    HW = H * W
    L = len(block_params)
    Cr = block_params[0]["w3"].shape[1]

    x_flat = x_nchw.reshape(N, C, HW)            # free view: lanes = H*W

    # HWIO (3,3,Cin,Cout) -> tap-major (Cout, 9, Cin); split centre tap (k=4)
    # from the 8 non-centre taps.
    def split_conv(w_hwio):
        w = jnp.transpose(w_hwio, (3, 0, 1, 2)).reshape(C, 9, C)
        w_nc = jnp.concatenate([w[:, :4, :], w[:, 5:, :]], axis=1).reshape(C, 8 * C)
        w_c = w[:, 4, :]
        return w_nc, w_c

    w1 = [split_conv(p["w1"]) for p in block_params]
    w2 = [split_conv(p["w2"]) for p in block_params]
    w1nc = jnp.stack([a for a, _ in w1]).astype(matmul_dtype)       # (L, C, 8C)
    w1c = jnp.stack([b for _, b in w1]).astype(matmul_dtype)        # (L, C, C)
    w2nc = jnp.stack([a for a, _ in w2]).astype(matmul_dtype)
    w2c = jnp.stack([b for _, b in w2]).astype(matmul_dtype)
    b1s = jnp.stack([p["b1"].reshape(C, 1) for p in block_params])  # (L, C, 1) f32
    b2s = jnp.stack([p["b2"].reshape(C, 1) for p in block_params])
    w3s = jnp.stack([p["w3"] for p in block_params])                # (L, C, Cr) f32
    b3s = jnp.stack([p["b3"].reshape(1, Cr) for p in block_params]) # (L, 1, Cr)
    w4s = jnp.stack([p["w4"].T for p in block_params])              # (L, C, Cr)
    b4s = jnp.stack([p["b4"].reshape(C, 1) for p in block_params])  # (L, C, 1)

    # Precomputed "SAME" boundary masks for the 8 non-centre taps (matmul dtype).
    hh = jnp.arange(H).reshape(H, 1)
    ww = jnp.arange(W).reshape(1, W)
    masks = []
    for dy in (-1, 0, 1):
        for dx in (-1, 0, 1):
            if dy == 0 and dx == 0:
                continue
            m = ((hh + dy >= 0) & (hh + dy < H) & (ww + dx >= 0) & (ww + dx < W))
            masks.append(m.reshape(1, HW).astype(matmul_dtype))
    mask = jnp.stack(masks, axis=0)                                 # (8, 1, HW)

    # Explicit VMEM budget: resident weights + patch + double-buffered I/O.
    itemsize = jnp.dtype(matmul_dtype).itemsize
    resident = sum(int(a.size) * a.dtype.itemsize
                   for a in (w1nc, w1c, b1s, w2nc, w2c, b2s,
                             w3s, b3s, w4s, b4s, mask))
    io_bytes = 2 * 2 * C * HW * 4
    patch_bytes = 8 * C * HW * itemsize
    vmem_limit = int(min(max(4 * (resident + io_bytes + patch_bytes), 16 << 20),
                         64 << 20))

    def const(shape):
        return pl.BlockSpec(shape, lambda n: (0,) * len(shape))

    out = pl.pallas_call(
        functools.partial(_r_subblock_kernel, W=W),
        out_shape=jax.ShapeDtypeStruct((N, C, HW), jnp.float32),
        grid_spec=pltpu.PrefetchScalarGridSpec(
            num_scalar_prefetch=0,
            grid=(N,),
            in_specs=[
                pl.BlockSpec((1, C, HW), lambda n: (n, 0, 0)),      # x
                const((L, C, 8 * C)),                               # w1 non-centre
                const((L, C, C)),                                   # w1 centre
                const((L, C, 1)),                                   # b1
                const((L, C, 8 * C)),                               # w2 non-centre
                const((L, C, C)),                                   # w2 centre
                const((L, C, 1)),                                   # b2
                const((L, C, Cr)),                                  # w3
                const((L, 1, Cr)),                                  # b3
                const((L, C, Cr)),                                  # w4
                const((L, C, 1)),                                   # b4
                const((8, 1, HW)),                                  # masks
            ],
            out_specs=pl.BlockSpec((1, C, HW), lambda n: (n, 0, 0)),
            scratch_shapes=[
                pltpu.VMEM((8 * C, HW), matmul_dtype),              # im2col patch
            ],
        ),
        compiler_params=pltpu.CompilerParams(
            dimension_semantics=("parallel",),
            vmem_limit_bytes=vmem_limit),
    )(x_flat, w1nc, w1c, b1s, w2nc, w2c, b2s, w3s, b3s, w4s, b4s, mask)

    return out.reshape(N, C, H, W)


# ---------------------------------------------------------------------------
# Pure-JAX reference (for correctness checking).  matmul_dtype emulates the
# kernel's operand quantization (accumulation stays f32 in both).
# ---------------------------------------------------------------------------
def res_block_ref(x_nhwc, p, matmul_dtype=jnp.float32):
    def conv(z, w, b):
        return lax.conv_general_dilated(
            z.astype(matmul_dtype), w.astype(matmul_dtype), (1, 1), "SAME",
            dimension_numbers=("NHWC", "HWIO", "NHWC"),
            preferred_element_type=jnp.float32) + b
    y = conv(jnp.maximum(conv(x_nhwc, p["w1"], p["b1"]), 0.0), p["w2"], p["b2"])
    pool = jnp.mean(y, axis=(1, 2), keepdims=True)                  # (N,1,1,C)
    z = jnp.maximum(jnp.einsum("nijc,cd->nijd", pool, p["w3"]) + p["b3"], 0.0)
    ca = jax.nn.sigmoid(jnp.einsum("nijd,dc->nijc", z, p["w4"]) + p["b4"])
    return y * ca + x_nhwc


def r_subblock_ref(x_nchw, block_params, matmul_dtype=jnp.float32):
    x = jnp.transpose(x_nchw, (0, 2, 3, 1))
    for p in block_params:
        x = res_block_ref(x, p, matmul_dtype)
    return jnp.transpose(x, (0, 3, 1, 2))


# ---------------------------------------------------------------------------
# Deterministic parameter init (synthetic, matching nn.Module shapes; HWIO).
# ---------------------------------------------------------------------------
def init_res_block_params(key, nFeat, reduction=16):
    Cr = nFeat // reduction
    ks = jax.random.split(key, 8)
    s_conv = 0.1
    return {
        "w1": jax.random.normal(ks[0], (3, 3, nFeat, nFeat), jnp.float32) * s_conv,
        "b1": jax.random.normal(ks[1], (nFeat,), jnp.float32) * 0.01,
        "w2": jax.random.normal(ks[2], (3, 3, nFeat, nFeat), jnp.float32) * s_conv,
        "b2": jax.random.normal(ks[3], (nFeat,), jnp.float32) * 0.01,
        "w3": jax.random.normal(ks[4], (nFeat, Cr), jnp.float32) * s_conv,
        "b3": jax.random.normal(ks[5], (Cr,), jnp.float32) * 0.01,
        "w4": jax.random.normal(ks[6], (Cr, nFeat), jnp.float32) * s_conv,
        "b4": jax.random.normal(ks[7], (nFeat,), jnp.float32) * 0.01,
    }


if __name__ == "__main__":
    nFeat = 32          # must be >= reduction (16) so nFeat // 16 >= 1
    nDenselayer = 2
    N, H, W = 2, 16, 16

    key = jax.random.PRNGKey(0)
    kx, kp = jax.random.split(key)
    x_nchw = jax.random.normal(kx, (N, nFeat, H, W), jnp.float32)

    pkeys = jax.random.split(kp, nDenselayer)
    block_params = [init_res_block_params(pkeys[i], nFeat)
                    for i in range(nDenselayer)]

    # f32-operand path: matches the PyTorch module numerics tightly.
    out_f32 = jax.block_until_ready(
        r_subblock_pallas(x_nchw, block_params, matmul_dtype=jnp.float32))
    ref_f32 = jax.block_until_ready(r_subblock_ref(x_nchw, block_params))
    assert out_f32.shape == (N, nFeat, H, W)
    assert jnp.allclose(out_f32, ref_f32, atol=1e-3, rtol=1e-3), \
        "f32 path mismatch vs JAX reference"

    # Default bf16-operand path (f32 accumulation): compare against a
    # reference with identically-quantized conv operands.
    out_bf16 = jax.block_until_ready(r_subblock_pallas(x_nchw, block_params))
    ref_bf16 = jax.block_until_ready(
        r_subblock_ref(x_nchw, block_params, matmul_dtype=jnp.bfloat16))
    assert out_bf16.shape == (N, nFeat, H, W)
    assert jnp.allclose(out_bf16, ref_bf16, atol=5e-3, rtol=5e-3), \
        "bf16 path mismatch vs bf16-operand JAX reference"

    print("KERNEL_OK")
</pallas_src>

<mosaic_0001>
module attributes {stable_mosaic.version = 11 : i64} {
  func.func @_r_subblock_kernel(%arg0: i32, %arg1: memref<1x32x256xf32, #tpu.memory_space<vmem>>, %arg2: memref<2x32x256xf32, #tpu.memory_space<vmem>>, %arg3: memref<2x32x32xf32, #tpu.memory_space<vmem>>, %arg4: memref<2x32x1xf32, #tpu.memory_space<vmem>>, %arg5: memref<2x32x256xf32, #tpu.memory_space<vmem>>, %arg6: memref<2x32x32xf32, #tpu.memory_space<vmem>>, %arg7: memref<2x32x1xf32, #tpu.memory_space<vmem>>, %arg8: memref<2x32x2xf32, #tpu.memory_space<vmem>>, %arg9: memref<2x1x2xf32, #tpu.memory_space<vmem>>, %arg10: memref<2x32x2xf32, #tpu.memory_space<vmem>>, %arg11: memref<2x32x1xf32, #tpu.memory_space<vmem>>, %arg12: memref<8x1x256xf32, #tpu.memory_space<vmem>>, %arg13: memref<1x32x256xf32, #tpu.memory_space<vmem>>, %arg14: memref<256x256xf32, #tpu.memory_space<vmem>>) attributes {dimension_semantics = [#tpu.dimension_semantics<parallel>], iteration_bounds = array<i64: 2>, scalar_prefetch = 0 : i64, scratch_operands = 1 : i64, tpu.core_type = #tpu.core_type<tc>, window_params = [{transform_indices = @transform_0, window_bounds = array<i64: 1, 32, 256>}, {pipeline_mode = #tpu.pipeline_mode<synchronous>, transform_indices = @transform_1, window_bounds = array<i64: 2, 32, 256>}, {pipeline_mode = #tpu.pipeline_mode<synchronous>, transform_indices = @transform_2, window_bounds = array<i64: 2, 32, 32>}, {pipeline_mode = #tpu.pipeline_mode<synchronous>, transform_indices = @transform_3, window_bounds = array<i64: 2, 32, 1>}, {pipeline_mode = #tpu.pipeline_mode<synchronous>, transform_indices = @transform_4, window_bounds = array<i64: 2, 32, 256>}, {pipeline_mode = #tpu.pipeline_mode<synchronous>, transform_indices = @transform_5, window_bounds = array<i64: 2, 32, 32>}, {pipeline_mode = #tpu.pipeline_mode<synchronous>, transform_indices = @transform_6, window_bounds = array<i64: 2, 32, 1>}, {pipeline_mode = #tpu.pipeline_mode<synchronous>, transform_indices = @transform_7, window_bounds = array<i64: 2, 32, 2>}, {pipeline_mode = #tpu.pipeline_mode<synchronous>, transform_indices = @transform_8, window_bounds = array<i64: 2, 1, 2>}, {pipeline_mode = #tpu.pipeline_mode<synchronous>, transform_indices = @transform_9, window_bounds = array<i64: 2, 32, 2>}, {pipeline_mode = #tpu.pipeline_mode<synchronous>, transform_indices = @transform_10, window_bounds = array<i64: 2, 32, 1>}, {pipeline_mode = #tpu.pipeline_mode<synchronous>, transform_indices = @transform_11, window_bounds = array<i64: 8, 1, 256>}, {transform_indices = @transform_12, window_bounds = array<i64: 1, 32, 256>}]} {
    %c0 = arith.constant 0 : index
    %c0_0 = arith.constant 0 : index
    %c0_1 = arith.constant 0 : index
    %0 = vector.load %arg1[%c0, %c0_0, %c0_1] : memref<1x32x256xf32, #tpu.memory_space<vmem>>, vector<1x32x256xf32>
    %1 = vector.shape_cast %0 : vector<1x32x256xf32> to vector<32x256xf32>
    %c0_2 = arith.constant 0 : index
    %c0_3 = arith.constant 0 : index
    %c0_4 = arith.constant 0 : index
    %2 = vector.load %arg13[%c0_2, %c0_3, %c0_4] : memref<1x32x256xf32, #tpu.memory_space<vmem>>, vector<1x32x256xf32>
    %3 = vector.shape_cast %2 : vector<1x32x256xf32> to vector<32x256xf32>
    %4 = vector.shape_cast %1 : vector<32x256xf32> to vector<1x32x256xf32>
    tpu.vector_store %arg13[%c0_2, %c0_3, %c0_4], %4 {strides = array<i32>} : memref<1x32x256xf32, #tpu.memory_space<vmem>>, vector<1x32x256xf32>,
    %c0_i32 = arith.constant 0 : i32
    %c0_5 = arith.constant 0 : index
    %c0_6 = arith.constant 0 : index
    %c0_7 = arith.constant 0 : index
    %5 = vector.load %arg13[%c0_5, %c0_6, %c0_7] : memref<1x32x256xf32, #tpu.memory_space<vmem>>, vector<1x32x256xf32>
    %6 = vector.shape_cast %5 : vector<1x32x256xf32> to vector<32x256xf32>
    %7 = arith.index_cast %c0_i32 : i32 to index
    %c0_8 = arith.constant 0 : index
    %c0_9 = arith.constant 0 : index
    %8 = vector.load %arg2[%7, %c0_8, %c0_9] : memref<2x32x256xf32, #tpu.memory_space<vmem>>, vector<1x32x256xf32>
    %9 = vector.shape_cast %8 : vector<1x32x256xf32> to vector<32x256xf32>
    %10 = arith.index_cast %c0_i32 : i32 to index
    %c0_10 = arith.constant 0 : index
    %c0_11 = arith.constant 0 : index
    %11 = vector.load %arg3[%10, %c0_10, %c0_11] : memref<2x32x32xf32, #tpu.memory_space<vmem>>, vector<1x32x32xf32>
    %12 = vector.shape_cast %11 : vector<1x32x32xf32> to vector<32x32xf32>
    %13 = arith.index_cast %c0_i32 : i32 to index
    %c0_12 = arith.constant 0 : index
    %c0_13 = arith.constant 0 : index
    %14 = vector.load %arg4[%13, %c0_12, %c0_13] : memref<2x32x1xf32, #tpu.memory_space<vmem>>, vector<1x32x1xf32>
    %15 = vector.shape_cast %14 : vector<1x32x1xf32> to vector<32x1xf32>
    %c17_i32 = arith.constant 17 : i32
    %16 = tpu.dynamic_rotate %6 by %c17_i32 dim 1 : vector<32x256xf32>, i32 -> vector<32x256xf32>
    %c0_14 = arith.constant 0 : index
    %c0_15 = arith.constant 0 : index
    %c0_16 = arith.constant 0 : index
    %17 = vector.load %arg12[%c0_14, %c0_15, %c0_16] : memref<8x1x256xf32, #tpu.memory_space<vmem>>, vector<1x1x256xf32>
    %18 = vector.shape_cast %17 : vector<1x1x256xf32> to vector<1x256xf32>
    %19 = vector.broadcast %18 : vector<1x256xf32> to vector<32x256xf32>
    %20 = arith.mulf %16, %19 : vector<32x256xf32>
    %c0_17 = arith.constant 0 : index
    %c0_18 = arith.constant 0 : index
    %21 = vector.load %arg14[%c0_17, %c0_18] : memref<256x256xf32, #tpu.memory_space<vmem>>, vector<32x256xf32>
    tpu.vector_store %arg14[%c0_17, %c0_18], %20 {strides = array<i32>} : memref<256x256xf32, #tpu.memory_space<vmem>>, vector<32x256xf32>,
    %c16_i32 = arith.constant 16 : i32
    %22 = tpu.dynamic_rotate %6 by %c16_i32 dim 1 : vector<32x256xf32>, i32 -> vector<32x256xf32>
    %c1 = arith.constant 1 : index
    %c0_19 = arith.constant 0 : index
    %c0_20 = arith.constant 0 : index
    %23 = vector.load %arg12[%c1, %c0_19, %c0_20] : memref<8x1x256xf32, #tpu.memory_space<vmem>>, vector<1x1x256xf32>
    %24 = vector.shape_cast %23 : vector<1x1x256xf32> to vector<1x256xf32>
    %25 = vector.broadcast %24 : vector<1x256xf32> to vector<32x256xf32>
    %26 = arith.mulf %22, %25 : vector<32x256xf32>
    %c32 = arith.constant 32 : index
    %c0_21 = arith.constant 0 : index
    %27 = vector.load %arg14[%c32, %c0_21] : memref<256x256xf32, #tpu.memory_space<vmem>>, vector<32x256xf32>
    tpu.vector_store %arg14[%c32, %c0_21], %26 {strides = array<i32>} : memref<256x256xf32, #tpu.memory_space<vmem>>, vector<32x256xf32>,
    %c15_i32 = arith.constant 15 : i32
    %28 = tpu.dynamic_rotate %6 by %c15_i32 dim 1 : vector<32x256xf32>, i32 -> vector<32x256xf32>
    %c2 = arith.constant 2 : index
    %c0_22 = arith.constant 0 : index
    %c0_23 = arith.constant 0 : index
    %29 = vector.load %arg12[%c2, %c0_22, %c0_23] : memref<8x1x256xf32, #tpu.memory_space<vmem>>, vector<1x1x256xf32>
    %30 = vector.shape_cast %29 : vector<1x1x256xf32> to vector<1x256xf32>
    %31 = vector.broadcast %30 : vector<1x256xf32> to vector<32x256xf32>
    %32 = arith.mulf %28, %31 : vector<32x256xf32>
    %c64 = arith.constant 64 : index
    %c0_24 = arith.constant 0 : index
    %33 = vector.load %arg14[%c64, %c0_24] : memref<256x256xf32, #tpu.memory_space<vmem>>, vector<32x256xf32>
    tpu.vector_store %arg14[%c64, %c0_24], %32 {strides = array<i32>} : memref<256x256xf32, #tpu.memory_space<vmem>>, vector<32x256xf32>,
    %c1_i32 = arith.constant 1 : i32
    %34 = tpu.dynamic_rotate %6 by %c1_i32 dim 1 : vector<32x256xf32>, i32 -> vector<32x256xf32>
    %c3 = arith.constant 3 : index
    %c0_25 = arith.constant 0 : index
    %c0_26 = arith.constant 0 : index
    %35 = vector.load %arg12[%c3, %c0_25, %c0_26] : memref<8x1x256xf32, #tpu.memory_space<vmem>>, vector<1x1x256xf32>
    %36 = vector.shape_cast %35 : vector<1x1x256xf32> to vector<1x256xf32>
    %37 = vector.broadcast %36 : vector<1x256xf32> to vector<32x256xf32>
    %38 = arith.mulf %34, %37 : vector<32x256xf32>
    %c96 = arith.constant 96 : index
    %c0_27 = arith.constant 0 : index
    %39 = vector.load %arg14[%c96, %c0_27] : memref<256x256xf32, #tpu.memory_space<vmem>>, vector<32x256xf32>
    tpu.vector_store %arg14[%c96, %c0_27], %38 {strides = array<i32>} : memref<256x256xf32, #tpu.memory_space<vmem>>, vector<32x256xf32>,
    %c255_i32 = arith.constant 255 : i32
    %40 = tpu.dynamic_rotate %6 by %c255_i32 dim 1 : vector<32x256xf32>, i32 -> vector<32x256xf32>
    %c4 = arith.constant 4 : index
    %c0_28 = arith.constant 0 : index
    %c0_29 = arith.constant 0 : index
    %41 = vector.load %arg12[%c4, %c0_28, %c0_29] : memref<8x1x256xf32, #tpu.memory_space<vmem>>, vector<1x1x256xf32>
    %42 = vector.shape_cast %41 : vector<1x1x256xf32> to vector<1x256xf32>
    %43 = vector.broadcast %42 : vector<1x256xf32> to vector<32x256xf32>
    %44 = arith.mulf %40, %43 : vector<32x256xf32>
    %c128 = arith.constant 128 : index
    %c0_30 = arith.constant 0 : index
    %45 = vector.load %arg14[%c128, %c0_30] : memref<256x256xf32, #tpu.memory_space<vmem>>, vector<32x256xf32>
    tpu.vector_store %arg14[%c128, %c0_30], %44 {strides = array<i32>} : memref<256x256xf32, #tpu.memory_space<vmem>>, vector<32x256xf32>,
    %c241_i32 = arith.constant 241 : i32
    %46 = tpu.dynamic_rotate %6 by %c241_i32 dim 1 : vector<32x256xf32>, i32 -> vector<32x256xf32>
    %c5 = arith.constant 5 : index
    %c0_31 = arith.constant 0 : index
    %c0_32 = arith.constant 0 : index
    %47 = vector.load %arg12[%c5, %c0_31, %c0_32] : memref<8x1x256xf32, #tpu.memory_space<vmem>>, vector<1x1x256xf32>
    %48 = vector.shape_cast %47 : vector<1x1x256xf32> to vector<1x256xf32>
    %49 = vector.broadcast %48 : vector<1x256xf32> to vector<32x256xf32>
    %50 = arith.mulf %46, %49 : vector<32x256xf32>
    %c160 = arith.constant 160 : index
    %c0_33 = arith.constant 0 : index
    %51 = vector.load %arg14[%c160, %c0_33] : memref<256x256xf32, #tpu.memory_space<vmem>>, vector<32x256xf32>
    tpu.vector_store %arg14[%c160, %c0_33], %50 {strides = array<i32>} : memref<256x256xf32, #tpu.memory_space<vmem>>, vector<32x256xf32>,
    %c240_i32 = arith.constant 240 : i32
    %52 = tpu.dynamic_rotate %6 by %c240_i32 dim 1 : vector<32x256xf32>, i32 -> vector<32x256xf32>
    %c6 = arith.constant 6 : index
    %c0_34 = arith.constant 0 : index
    %c0_35 = arith.constant 0 : index
    %53 = vector.load %arg12[%c6, %c0_34, %c0_35] : memref<8x1x256xf32, #tpu.memory_space<vmem>>, vector<1x1x256xf32>
    %54 = vector.shape_cast %53 : vector<1x1x256xf32> to vector<1x256xf32>
    %55 = vector.broadcast %54 : vector<1x256xf32> to vector<32x256xf32>
    %56 = arith.mulf %52, %55 : vector<32x256xf32>
    %c192 = arith.constant 192 : index
    %c0_36 = arith.constant 0 : index
    %57 = vector.load %arg14[%c192, %c0_36] : memref<256x256xf32, #tpu.memory_space<vmem>>, vector<32x256xf32>
    tpu.vector_store %arg14[%c192, %c0_36], %56 {strides = array<i32>} : memref<256x256xf32, #tpu.memory_space<vmem>>, vector<32x256xf32>,
    %c239_i32 = arith.constant 239 : i32
    %58 = tpu.dynamic_rotate %6 by %c239_i32 dim 1 : vector<32x256xf32>, i32 -> vector<32x256xf32>
    %c7 = arith.constant 7 : index
    %c0_37 = arith.constant 0 : index
    %c0_38 = arith.constant 0 : index
    %59 = vector.load %arg12[%c7, %c0_37, %c0_38] : memref<8x1x256xf32, #tpu.memory_space<vmem>>, vector<1x1x256xf32>
    %60 = vector.shape_cast %59 : vector<1x1x256xf32> to vector<1x256xf32>
    %61 = vector.broadcast %60 : vector<1x256xf32> to vector<32x256xf32>
    %62 = arith.mulf %58, %61 : vector<32x256xf32>
    %c224 = arith.constant 224 : index
    %c0_39 = arith.constant 0 : index
    %63 = vector.load %arg14[%c224, %c0_39] : memref<256x256xf32, #tpu.memory_space<vmem>>, vector<32x256xf32>
    tpu.vector_store %arg14[%c224, %c0_39], %62 {strides = array<i32>} : memref<256x256xf32, #tpu.memory_space<vmem>>, vector<32x256xf32>,
    %c0_40 = arith.constant 0 : index
    %c0_41 = arith.constant 0 : index
    %64 = vector.load %arg14[%c0_40, %c0_41] : memref<256x256xf32, #tpu.memory_space<vmem>>, vector<256x256xf32>
    %cst = arith.constant dense<0.000000e+00> : vector<32x256xf32>
    %65 = tpu.matmul %9, %64, %cst {dimension_numbers = #tpu.dot_dimension_numbers<[1], [0], [0], [1], [0, 0, 1, 1], [], []>} : vector<32x256xf32>, vector<256x256xf32>, vector<32x256xf32> -> vector<32x256xf32>
    %cst_42 = arith.constant dense<0.000000e+00> : vector<32x256xf32>
    %66 = tpu.matmul %12, %6, %cst_42 {dimension_numbers = #tpu.dot_dimension_numbers<[1], [0], [0], [1], [0, 0, 1, 1], [], []>} : vector<32x32xf32>, vector<32x256xf32>, vector<32x256xf32> -> vector<32x256xf32>
    %67 = arith.addf %65, %66 : vector<32x256xf32>
    %68 = vector.broadcast %15 : vector<32x1xf32> to vector<32x256xf32>
    %69 = arith.addf %67, %68 : vector<32x256xf32>
    %cst_43 = arith.constant 0.000000e+00 : f32
    %70 = vector.broadcast %cst_43 : f32 to vector<32x256xf32>
    %71 = arith.maximumf %69, %70 : vector<32x256xf32>
    %72 = arith.index_cast %c0_i32 : i32 to index
    %c0_44 = arith.constant 0 : index
    %c0_45 = arith.constant 0 : index
    %73 = vector.load %arg5[%72, %c0_44, %c0_45] : memref<2x32x256xf32, #tpu.memory_space<vmem>>, vector<1x32x256xf32>
    %74 = vector.shape_cast %73 : vector<1x32x256xf32> to vector<32x256xf32>
    %75 = arith.index_cast %c0_i32 : i32 to index
    %c0_46 = arith.constant 0 : index
    %c0_47 = arith.constant 0 : index
    %76 = vector.load %arg6[%75, %c0_46, %c0_47] : memref<2x32x32xf32, #tpu.memory_space<vmem>>, vector<1x32x32xf32>
    %77 = vector.shape_cast %76 : vector<1x32x32xf32> to vector<32x32xf32>
    %78 = arith.index_cast %c0_i32 : i32 to index
    %c0_48 = arith.constant 0 : index
    %c0_49 = arith.constant 0 : index
    %79 = vector.load %arg7[%78, %c0_48, %c0_49] : memref<2x32x1xf32, #tpu.memory_space<vmem>>, vector<1x32x1xf32>
    %80 = vector.shape_cast %79 : vector<1x32x1xf32> to vector<32x1xf32>
    %c17_i32_50 = arith.constant 17 : i32
    %81 = tpu.dynamic_rotate %71 by %c17_i32_50 dim 1 : vector<32x256xf32>, i32 -> vector<32x256xf32>
    %c0_51 = arith.constant 0 : index
    %c0_52 = arith.constant 0 : index
    %c0_53 = arith.constant 0 : index
    %82 = vector.load %arg12[%c0_51, %c0_52, %c0_53] : memref<8x1x256xf32, #tpu.memory_space<vmem>>, vector<1x1x256xf32>
    %83 = vector.shape_cast %82 : vector<1x1x256xf32> to vector<1x256xf32>
    %84 = vector.broadcast %83 : vector<1x256xf32> to vector<32x256xf32>
    %85 = arith.mulf %81, %84 : vector<32x256xf32>
    %c0_54 = arith.constant 0 : index
    %c0_55 = arith.constant 0 : index
    %86 = vector.load %arg14[%c0_54, %c0_55] : memref<256x256xf32, #tpu.memory_space<vmem>>, vector<32x256xf32>
    tpu.vector_store %arg14[%c0_54, %c0_55], %85 {strides = array<i32>} : memref<256x256xf32, #tpu.memory_space<vmem>>, vector<32x256xf32>,
    %c16_i32_56 = arith.constant 16 : i32
    %87 = tpu.dynamic_rotate %71 by %c16_i32_56 dim 1 : vector<32x256xf32>, i32 -> vector<32x256xf32>
    %c1_57 = arith.constant 1 : index
    %c0_58 = arith.constant 0 : index
    %c0_59 = arith.constant 0 : index
    %88 = vector.load %arg12[%c1_57, %c0_58, %c0_59] : memref<8x1x256xf32, #tpu.memory_space<vmem>>, vector<1x1x256xf32>
    %89 = vector.shape_cast %88 : vector<1x1x256xf32> to vector<1x256xf32>
    %90 = vector.broadcast %89 : vector<1x256xf32> to vector<32x256xf32>
    %91 = arith.mulf %87, %90 : vector<32x256xf32>
    %c32_60 = arith.constant 32 : index
    %c0_61 = arith.constant 0 : index
    %92 = vector.load %arg14[%c32_60, %c0_61] : memref<256x256xf32, #tpu.memory_space<vmem>>, vector<32x256xf32>
    tpu.vector_store %arg14[%c32_60, %c0_61], %91 {strides = array<i32>} : memref<256x256xf32, #tpu.memory_space<vmem>>, vector<32x256xf32>,
    %c15_i32_62 = arith.constant 15 : i32
    %93 = tpu.dynamic_rotate %71 by %c15_i32_62 dim 1 : vector<32x256xf32>, i32 -> vector<32x256xf32>
    %c2_63 = arith.constant 2 : index
    %c0_64 = arith.constant 0 : index
    %c0_65 = arith.constant 0 : index
    %94 = vector.load %arg12[%c2_63, %c0_64, %c0_65] : memref<8x1x256xf32, #tpu.memory_space<vmem>>, vector<1x1x256xf32>
    %95 = vector.shape_cast %94 : vector<1x1x256xf32> to vector<1x256xf32>
    %96 = vector.broadcast %95 : vector<1x256xf32> to vector<32x256xf32>
    %97 = arith.mulf %93, %96 : vector<32x256xf32>
    %c64_66 = arith.constant 64 : index
    %c0_67 = arith.constant 0 : index
    %98 = vector.load %arg14[%c64_66, %c0_67] : memref<256x256xf32, #tpu.memory_space<vmem>>, vector<32x256xf32>
    tpu.vector_store %arg14[%c64_66, %c0_67], %97 {strides = array<i32>} : memref<256x256xf32, #tpu.memory_space<vmem>>, vector<32x256xf32>,
    %c1_i32_68 = arith.constant 1 : i32
    %99 = tpu.dynamic_rotate %71 by %c1_i32_68 dim 1 : vector<32x256xf32>, i32 -> vector<32x256xf32>
    %c3_69 = arith.constant 3 : index
    %c0_70 = arith.constant 0 : index
    %c0_71 = arith.constant 0 : index
    %100 = vector.load %arg12[%c3_69, %c0_70, %c0_71] : memref<8x1x256xf32, #tpu.memory_space<vmem>>, vector<1x1x256xf32>
    %101 = vector.shape_cast %100 : vector<1x1x256xf32> to vector<1x256xf32>
    %102 = vector.broadcast %101 : vector<1x256xf32> to vector<32x256xf32>
    %103 = arith.mulf %99, %102 : vector<32x256xf32>
    %c96_72 = arith.constant 96 : index
    %c0_73 = arith.constant 0 : index
    %104 = vector.load %arg14[%c96_72, %c0_73] : memref<256x256xf32, #tpu.memory_space<vmem>>, vector<32x256xf32>
    tpu.vector_store %arg14[%c96_72, %c0_73], %103 {strides = array<i32>} : memref<256x256xf32, #tpu.memory_space<vmem>>, vector<32x256xf32>,
    %c255_i32_74 = arith.constant 255 : i32
    %105 = tpu.dynamic_rotate %71 by %c255_i32_74 dim 1 : vector<32x256xf32>, i32 -> vector<32x256xf32>
    %c4_75 = arith.constant 4 : index
    %c0_76 = arith.constant 0 : index
    %c0_77 = arith.constant 0 : index
    %106 = vector.load %arg12[%c4_75, %c0_76, %c0_77] : memref<8x1x256xf32, #tpu.memory_space<vmem>>, vector<1x1x256xf32>
    %107 = vector.shape_cast %106 : vector<1x1x256xf32> to vector<1x256xf32>
    %108 = vector.broadcast %107 : vector<1x256xf32> to vector<32x256xf32>
    %109 = arith.mulf %105, %108 : vector<32x256xf32>
    %c128_78 = arith.constant 128 : index
    %c0_79 = arith.constant 0 : index
    %110 = vector.load %arg14[%c128_78, %c0_79] : memref<256x256xf32, #tpu.memory_space<vmem>>, vector<32x256xf32>
    tpu.vector_store %arg14[%c128_78, %c0_79], %109 {strides = array<i32>} : memref<256x256xf32, #tpu.memory_space<vmem>>, vector<32x256xf32>,
    %c241_i32_80 = arith.constant 241 : i32
    %111 = tpu.dynamic_rotate %71 by %c241_i32_80 dim 1 : vector<32x256xf32>, i32 -> vector<32x256xf32>
    %c5_81 = arith.constant 5 : index
    %c0_82 = arith.constant 0 : index
    %c0_83 = arith.constant 0 : index
    %112 = vector.load %arg12[%c5_81, %c0_82, %c0_83] : memref<8x1x256xf32, #tpu.memory_space<vmem>>, vector<1x1x256xf32>
    %113 = vector.shape_cast %112 : vector<1x1x256xf32> to vector<1x256xf32>
    %114 = vector.broadcast %113 : vector<1x256xf32> to vector<32x256xf32>
    %115 = arith.mulf %111, %114 : vector<32x256xf32>
    %c160_84 = arith.constant 160 : index
    %c0_85 = arith.constant 0 : index
    %116 = vector.load %arg14[%c160_84, %c0_85] : memref<256x256xf32, #tpu.memory_space<vmem>>, vector<32x256xf32>
    tpu.vector_store %arg14[%c160_84, %c0_85], %115 {strides = array<i32>} : memref<256x256xf32, #tpu.memory_space<vmem>>, vector<32x256xf32>,
    %c240_i32_86 = arith.constant 240 : i32
    %117 = tpu.dynamic_rotate %71 by %c240_i32_86 dim 1 : vector<32x256xf32>, i32 -> vector<32x256xf32>
    %c6_87 = arith.constant 6 : index
    %c0_88 = arith.constant 0 : index
    %c0_89 = arith.constant 0 : index
    %118 = vector.load %arg12[%c6_87, %c0_88, %c0_89] : memref<8x1x256xf32, #tpu.memory_space<vmem>>, vector<1x1x256xf32>
    %119 = vector.shape_cast %118 : vector<1x1x256xf32> to vector<1x256xf32>
    %120 = vector.broadcast %119 : vector<1x256xf32> to vector<32x256xf32>
    %121 = arith.mulf %117, %120 : vector<32x256xf32>
    %c192_90 = arith.constant 192 : index
    %c0_91 = arith.constant 0 : index
    %122 = vector.load %arg14[%c192_90, %c0_91] : memref<256x256xf32, #tpu.memory_space<vmem>>, vector<32x256xf32>
    tpu.vector_store %arg14[%c192_90, %c0_91], %121 {strides = array<i32>} : memref<256x256xf32, #tpu.memory_space<vmem>>, vector<32x256xf32>,
    %c239_i32_92 = arith.constant 239 : i32
    %123 = tpu.dynamic_rotate %71 by %c239_i32_92 dim 1 : vector<32x256xf32>, i32 -> vector<32x256xf32>
    %c7_93 = arith.constant 7 : index
    %c0_94 = arith.constant 0 : index
    %c0_95 = arith.constant 0 : index
    %124 = vector.load %arg12[%c7_93, %c0_94, %c0_95] : memref<8x1x256xf32, #tpu.memory_space<vmem>>, vector<1x1x256xf32>
    %125 = vector.shape_cast %124 : vector<1x1x256xf32> to vector<1x256xf32>
    %126 = vector.broadcast %125 : vector<1x256xf32> to vector<32x256xf32>
    %127 = arith.mulf %123, %126 : vector<32x256xf32>
    %c224_96 = arith.constant 224 : index
    %c0_97 = arith.constant 0 : index
    %128 = vector.load %arg14[%c224_96, %c0_97] : memref<256x256xf32, #tpu.memory_space<vmem>>, vector<32x256xf32>
    tpu.vector_store %arg14[%c224_96, %c0_97], %127 {strides = array<i32>} : memref<256x256xf32, #tpu.memory_space<vmem>>, vector<32x256xf32>,
    %c0_98 = arith.constant 0 : index
    %c0_99 = arith.constant 0 : index
    %129 = vector.load %arg14[%c0_98, %c0_99] : memref<256x256xf32, #tpu.memory_space<vmem>>, vector<256x256xf32>
    %cst_100 = arith.constant dense<0.000000e+00> : vector<32x256xf32>
    %130 = tpu.matmul %74, %129, %cst_100 {dimension_numbers = #tpu.dot_dimension_numbers<[1], [0], [0], [1], [0, 0, 1, 1], [], []>} : vector<32x256xf32>, vector<256x256xf32>, vector<32x256xf32> -> vector<32x256xf32>
    %cst_101 = arith.constant dense<0.000000e+00> : vector<32x256xf32>
    %131 = tpu.matmul %77, %71, %cst_101 {dimension_numbers = #tpu.dot_dimension_numbers<[1], [0], [0], [1], [0, 0, 1, 1], [], []>} : vector<32x32xf32>, vector<32x256xf32>, vector<32x256xf32> -> vector<32x256xf32>
    %132 = arith.addf %130, %131 : vector<32x256xf32>
    %133 = vector.broadcast %80 : vector<32x1xf32> to vector<32x256xf32>
    %134 = arith.addf %132, %133 : vector<32x256xf32>
    %cst_102 = arith.constant dense<0.000000e+00> : vector<32xf32>
    %135 = vector.multi_reduction <add>, %134, %cst_102 [1] : vector<32x256xf32> to vector<32xf32>
    %136 = vector.shape_cast %135 : vector<32xf32> to vector<32x1xf32>
    %cst_103 = arith.constant 2.560000e+02 : f32
    %137 = vector.broadcast %cst_103 : f32 to vector<32x1xf32>
    %138 = arith.divf %136, %137 : vector<32x1xf32>
    %139 = arith.index_cast %c0_i32 : i32 to index
    %c0_104 = arith.constant 0 : index
    %c0_105 = arith.constant 0 : index
    %140 = vector.load %arg8[%139, %c0_104, %c0_105] : memref<2x32x2xf32, #tpu.memory_space<vmem>>, vector<1x32x2xf32>
    %141 = vector.shape_cast %140 : vector<1x32x2xf32> to vector<32x2xf32>
    %142 = vector.broadcast %138 : vector<32x1xf32> to vector<32x2xf32>
    %143 = arith.mulf %141, %142 : vector<32x2xf32>
    %cst_106 = arith.constant dense<0.000000e+00> : vector<2xf32>
    %144 = vector.multi_reduction <add>, %143, %cst_106 [0] : vector<32x2xf32> to vector<2xf32>
    %145 = vector.shape_cast %144 : vector<2xf32> to vector<1x2xf32>
    %146 = arith.index_cast %c0_i32 : i32 to index
    %c0_107 = arith.constant 0 : index
    %c0_108 = arith.constant 0 : index
    %147 = vector.load %arg9[%146, %c0_107, %c0_108] : memref<2x1x2xf32, #tpu.memory_space<vmem>>, vector<1x1x2xf32>
    %148 = vector.shape_cast %147 : vector<1x1x2xf32> to vector<1x2xf32>
    %149 = arith.addf %145, %148 : vector<1x2xf32>
    %cst_109 = arith.constant 0.000000e+00 : f32
    %150 = vector.broadcast %cst_109 : f32 to vector<1x2xf32>
    %151 = arith.maximumf %149, %150 : vector<1x2xf32>
    %152 = arith.index_cast %c0_i32 : i32 to index
    %c0_110 = arith.constant 0 : index
    %c0_111 = arith.constant 0 : index
    %153 = vector.load %arg10[%152, %c0_110, %c0_111] : memref<2x32x2xf32, #tpu.memory_space<vmem>>, vector<1x32x2xf32>
    %154 = vector.shape_cast %153 : vector<1x32x2xf32> to vector<32x2xf32>
    %155 = vector.broadcast %151 : vector<1x2xf32> to vector<32x2xf32>
    %156 = arith.mulf %154, %155 : vector<32x2xf32>
    %cst_112 = arith.constant dense<0.000000e+00> : vector<32xf32>
    %157 = vector.multi_reduction <add>, %156, %cst_112 [1] : vector<32x2xf32> to vector<32xf32>
    %158 = vector.shape_cast %157 : vector<32xf32> to vector<32x1xf32>
    %159 = arith.index_cast %c0_i32 : i32 to index
    %c0_113 = arith.constant 0 : index
    %c0_114 = arith.constant 0 : index
    %160 = vector.load %arg11[%159, %c0_113, %c0_114] : memref<2x32x1xf32, #tpu.memory_space<vmem>>, vector<1x32x1xf32>
    %161 = vector.shape_cast %160 : vector<1x32x1xf32> to vector<32x1xf32>
    %162 = arith.addf %158, %161 : vector<32x1xf32>
    %163 = arith.negf %162 : vector<32x1xf32>
    %164 = math.exp %163 : vector<32x1xf32>
    %cst_115 = arith.constant 1.000000e+00 : f32
    %165 = vector.broadcast %cst_115 : f32 to vector<32x1xf32>
    %166 = arith.addf %165, %164 : vector<32x1xf32>
    %167 = arith.divf %165, %166 : vector<32x1xf32>
    %168 = vector.broadcast %167 : vector<32x1xf32> to vector<32x256xf32>
    %169 = arith.mulf %134, %168 : vector<32x256xf32>
    %170 = arith.addf %169, %6 : vector<32x256xf32>
    %c0_116 = arith.constant 0 : index
    %c0_117 = arith.constant 0 : index
    %c0_118 = arith.constant 0 : index
    %171 = vector.load %arg13[%c0_116, %c0_117, %c0_118] : memref<1x32x256xf32, #tpu.memory_space<vmem>>, vector<1x32x256xf32>
    %172 = vector.shape_cast %171 : vector<1x32x256xf32> to vector<32x256xf32>
    %173 = vector.shape_cast %170 : vector<32x256xf32> to vector<1x32x256xf32>
    tpu.vector_store %arg13[%c0_116, %c0_117, %c0_118], %173 {strides = array<i32>} : memref<1x32x256xf32, #tpu.memory_space<vmem>>, vector<1x32x256xf32>,
    %c1_i32_119 = arith.constant 1 : i32
    %c0_120 = arith.constant 0 : index
    %c0_121 = arith.constant 0 : index
    %c0_122 = arith.constant 0 : index
    %174 = vector.load %arg13[%c0_120, %c0_121, %c0_122] : memref<1x32x256xf32, #tpu.memory_space<vmem>>, vector<1x32x256xf32>
    %175 = vector.shape_cast %174 : vector<1x32x256xf32> to vector<32x256xf32>
    %176 = arith.index_cast %c1_i32_119 : i32 to index
    %c0_123 = arith.constant 0 : index
    %c0_124 = arith.constant 0 : index
    %177 = vector.load %arg2[%176, %c0_123, %c0_124] : memref<2x32x256xf32, #tpu.memory_space<vmem>>, vector<1x32x256xf32>
    %178 = vector.shape_cast %177 : vector<1x32x256xf32> to vector<32x256xf32>
    %179 = arith.index_cast %c1_i32_119 : i32 to index
    %c0_125 = arith.constant 0 : index
    %c0_126 = arith.constant 0 : index
    %180 = vector.load %arg3[%179, %c0_125, %c0_126] : memref<2x32x32xf32, #tpu.memory_space<vmem>>, vector<1x32x32xf32>
    %181 = vector.shape_cast %180 : vector<1x32x32xf32> to vector<32x32xf32>
    %182 = arith.index_cast %c1_i32_119 : i32 to index
    %c0_127 = arith.constant 0 : index
    %c0_128 = arith.constant 0 : index
    %183 = vector.load %arg4[%182, %c0_127, %c0_128] : memref<2x32x1xf32, #tpu.memory_space<vmem>>, vector<1x32x1xf32>
    %184 = vector.shape_cast %183 : vector<1x32x1xf32> to vector<32x1xf32>
    %c17_i32_129 = arith.constant 17 : i32
    %185 = tpu.dynamic_rotate %175 by %c17_i32_129 dim 1 : vector<32x256xf32>, i32 -> vector<32x256xf32>
    %c0_130 = arith.constant 0 : index
    %c0_131 = arith.constant 0 : index
    %c0_132 = arith.constant 0 : index
    %186 = vector.load %arg12[%c0_130, %c0_131, %c0_132] : memref<8x1x256xf32, #tpu.memory_space<vmem>>, vector<1x1x256xf32>
    %187 = vector.shape_cast %186 : vector<1x1x256xf32> to vector<1x256xf32>
    %188 = vector.broadcast %187 : vector<1x256xf32> to vector<32x256xf32>
    %189 = arith.mulf %185, %188 : vector<32x256xf32>
    %c0_133 = arith.constant 0 : index
    %c0_134 = arith.constant 0 : index
    %190 = vector.load %arg14[%c0_133, %c0_134] : memref<256x256xf32, #tpu.memory_space<vmem>>, vector<32x256xf32>
    tpu.vector_store %arg14[%c0_133, %c0_134], %189 {strides = array<i32>} : memref<256x256xf32, #tpu.memory_space<vmem>>, vector<32x256xf32>,
    %c16_i32_135 = arith.constant 16 : i32
    %191 = tpu.dynamic_rotate %175 by %c16_i32_135 dim 1 : vector<32x256xf32>, i32 -> vector<32x256xf32>
    %c1_136 = arith.constant 1 : index
    %c0_137 = arith.constant 0 : index
    %c0_138 = arith.constant 0 : index
    %192 = vector.load %arg12[%c1_136, %c0_137, %c0_138] : memref<8x1x256xf32, #tpu.memory_space<vmem>>, vector<1x1x256xf32>
    %193 = vector.shape_cast %192 : vector<1x1x256xf32> to vector<1x256xf32>
    %194 = vector.broadcast %193 : vector<1x256xf32> to vector<32x256xf32>
    %195 = arith.mulf %191, %194 : vector<32x256xf32>
    %c32_139 = arith.constant 32 : index
    %c0_140 = arith.constant 0 : index
    %196 = vector.load %arg14[%c32_139, %c0_140] : memref<256x256xf32, #tpu.memory_space<vmem>>, vector<32x256xf32>
    tpu.vector_store %arg14[%c32_139, %c0_140], %195 {strides = array<i32>} : memref<256x256xf32, #tpu.memory_space<vmem>>, vector<32x256xf32>,
    %c15_i32_141 = arith.constant 15 : i32
    %197 = tpu.dynamic_rotate %175 by %c15_i32_141 dim 1 : vector<32x256xf32>, i32 -> vector<32x256xf32>
    %c2_142 = arith.constant 2 : index
    %c0_143 = arith.constant 0 : index
    %c0_144 = arith.constant 0 : index
    %198 = vector.load %arg12[%c2_142, %c0_143, %c0_144] : memref<8x1x256xf32, #tpu.memory_space<vmem>>, vector<1x1x256xf32>
    %199 = vector.shape_cast %198 : vector<1x1x256xf32> to vector<1x256xf32>
    %200 = vector.broadcast %199 : vector<1x256xf32> to vector<32x256xf32>
    %201 = arith.mulf %197, %200 : vector<32x256xf32>
    %c64_145 = arith.constant 64 : index
    %c0_146 = arith.constant 0 : index
    %202 = vector.load %arg14[%c64_145, %c0_146] : memref<256x256xf32, #tpu.memory_space<vmem>>, vector<32x256xf32>
    tpu.vector_store %arg14[%c64_145, %c0_146], %201 {strides = array<i32>} : memref<256x256xf32, #tpu.memory_space<vmem>>, vector<32x256xf32>,
    %c1_i32_147 = arith.constant 1 : i32
    %203 = tpu.dynamic_rotate %175 by %c1_i32_147 dim 1 : vector<32x256xf32>, i32 -> vector<32x256xf32>
    %c3_148 = arith.constant 3 : index
    %c0_149 = arith.constant 0 : index
    %c0_150 = arith.constant 0 : index
    %204 = vector.load %arg12[%c3_148, %c0_149, %c0_150] : memref<8x1x256xf32, #tpu.memory_space<vmem>>, vector<1x1x256xf32>
    %205 = vector.shape_cast %204 : vector<1x1x256xf32> to vector<1x256xf32>
    %206 = vector.broadcast %205 : vector<1x256xf32> to vector<32x256xf32>
    %207 = arith.mulf %203, %206 : vector<32x256xf32>
    %c96_151 = arith.constant 96 : index
    %c0_152 = arith.constant 0 : index
    %208 = vector.load %arg14[%c96_151, %c0_152] : memref<256x256xf32, #tpu.memory_space<vmem>>, vector<32x256xf32>
    tpu.vector_store %arg14[%c96_151, %c0_152], %207 {strides = array<i32>} : memref<256x256xf32, #tpu.memory_space<vmem>>, vector<32x256xf32>,
    %c255_i32_153 = arith.constant 255 : i32
    %209 = tpu.dynamic_rotate %175 by %c255_i32_153 dim 1 : vector<32x256xf32>, i32 -> vector<32x256xf32>
    %c4_154 = arith.constant 4 : index
    %c0_155 = arith.constant 0 : index
    %c0_156 = arith.constant 0 : index
    %210 = vector.load %arg12[%c4_154, %c0_155, %c0_156] : memref<8x1x256xf32, #tpu.memory_space<vmem>>, vector<1x1x256xf32>
    %211 = vector.shape_cast %210 : vector<1x1x256xf32> to vector<1x256xf32>
    %212 = vector.broadcast %211 : vector<1x256xf32> to vector<32x256xf32>
    %213 = arith.mulf %209, %212 : vector<32x256xf32>
    %c128_157 = arith.constant 128 : index
    %c0_158 = arith.constant 0 : index
    %214 = vector.load %arg14[%c128_157, %c0_158] : memref<256x256xf32, #tpu.memory_space<vmem>>, vector<32x256xf32>
    tpu.vector_store %arg14[%c128_157, %c0_158], %213 {strides = array<i32>} : memref<256x256xf32, #tpu.memory_space<vmem>>, vector<32x256xf32>,
    %c241_i32_159 = arith.constant 241 : i32
    %215 = tpu.dynamic_rotate %175 by %c241_i32_159 dim 1 : vector<32x256xf32>, i32 -> vector<32x256xf32>
    %c5_160 = arith.constant 5 : index
    %c0_161 = arith.constant 0 : index
    %c0_162 = arith.constant 0 : index
    %216 = vector.load %arg12[%c5_160, %c0_161, %c0_162] : memref<8x1x256xf32, #tpu.memory_space<vmem>>, vector<1x1x256xf32>
    %217 = vector.shape_cast %216 : vector<1x1x256xf32> to vector<1x256xf32>
    %218 = vector.broadcast %217 : vector<1x256xf32> to vector<32x256xf32>
    %219 = arith.mulf %215, %218 : vector<32x256xf32>
    %c160_163 = arith.constant 160 : index
    %c0_164 = arith.constant 0 : index
    %220 = vector.load %arg14[%c160_163, %c0_164] : memref<256x256xf32, #tpu.memory_space<vmem>>, vector<32x256xf32>
    tpu.vector_store %arg14[%c160_163, %c0_164], %219 {strides = array<i32>} : memref<256x256xf32, #tpu.memory_space<vmem>>, vector<32x256xf32>,
    %c240_i32_165 = arith.constant 240 : i32
    %221 = tpu.dynamic_rotate %175 by %c240_i32_165 dim 1 : vector<32x256xf32>, i32 -> vector<32x256xf32>
    %c6_166 = arith.constant 6 : index
    %c0_167 = arith.constant 0 : index
    %c0_168 = arith.constant 0 : index
    %222 = vector.load %arg12[%c6_166, %c0_167, %c0_168] : memref<8x1x256xf32, #tpu.memory_space<vmem>>, vector<1x1x256xf32>
    %223 = vector.shape_cast %222 : vector<1x1x256xf32> to vector<1x256xf32>
    %224 = vector.broadcast %223 : vector<1x256xf32> to vector<32x256xf32>
    %225 = arith.mulf %221, %224 : vector<32x256xf32>
    %c192_169 = arith.constant 192 : index
    %c0_170 = arith.constant 0 : index
    %226 = vector.load %arg14[%c192_169, %c0_170] : memref<256x256xf32, #tpu.memory_space<vmem>>, vector<32x256xf32>
    tpu.vector_store %arg14[%c192_169, %c0_170], %225 {strides = array<i32>} : memref<256x256xf32, #tpu.memory_space<vmem>>, vector<32x256xf32>,
    %c239_i32_171 = arith.constant 239 : i32
    %227 = tpu.dynamic_rotate %175 by %c239_i32_171 dim 1 : vector<32x256xf32>, i32 -> vector<32x256xf32>
    %c7_172 = arith.constant 7 : index
    %c0_173 = arith.constant 0 : index
    %c0_174 = arith.constant 0 : index
    %228 = vector.load %arg12[%c7_172, %c0_173, %c0_174] : memref<8x1x256xf32, #tpu.memory_space<vmem>>, vector<1x1x256xf32>
    %229 = vector.shape_cast %228 : vector<1x1x256xf32> to vector<1x256xf32>
    %230 = vector.broadcast %229 : vector<1x256xf32> to vector<32x256xf32>
    %231 = arith.mulf %227, %230 : vector<32x256xf32>
    %c224_175 = arith.constant 224 : index
    %c0_176 = arith.constant 0 : index
    %232 = vector.load %arg14[%c224_175, %c0_176] : memref<256x256xf32, #tpu.memory_space<vmem>>, vector<32x256xf32>
    tpu.vector_store %arg14[%c224_175, %c0_176], %231 {strides = array<i32>} : memref<256x256xf32, #tpu.memory_space<vmem>>, vector<32x256xf32>,
    %c0_177 = arith.constant 0 : index
    %c0_178 = arith.constant 0 : index
    %233 = vector.load %arg14[%c0_177, %c0_178] : memref<256x256xf32, #tpu.memory_space<vmem>>, vector<256x256xf32>
    %cst_179 = arith.constant dense<0.000000e+00> : vector<32x256xf32>
    %234 = tpu.matmul %178, %233, %cst_179 {dimension_numbers = #tpu.dot_dimension_numbers<[1], [0], [0], [1], [0, 0, 1, 1], [], []>} : vector<32x256xf32>, vector<256x256xf32>, vector<32x256xf32> -> vector<32x256xf32>
    %cst_180 = arith.constant dense<0.000000e+00> : vector<32x256xf32>
    %235 = tpu.matmul %181, %175, %cst_180 {dimension_numbers = #tpu.dot_dimension_numbers<[1], [0], [0], [1], [0, 0, 1, 1], [], []>} : vector<32x32xf32>, vector<32x256xf32>, vector<32x256xf32> -> vector<32x256xf32>
    %236 = arith.addf %234, %235 : vector<32x256xf32>
    %237 = vector.broadcast %184 : vector<32x1xf32> to vector<32x256xf32>
    %238 = arith.addf %236, %237 : vector<32x256xf32>
    %cst_181 = arith.constant 0.000000e+00 : f32
    %239 = vector.broadcast %cst_181 : f32 to vector<32x256xf32>
    %240 = arith.maximumf %238, %239 : vector<32x256xf32>
    %241 = arith.index_cast %c1_i32_119 : i32 to index
    %c0_182 = arith.constant 0 : index
    %c0_183 = arith.constant 0 : index
    %242 = vector.load %arg5[%241, %c0_182, %c0_183] : memref<2x32x256xf32, #tpu.memory_space<vmem>>, vector<1x32x256xf32>
    %243 = vector.shape_cast %242 : vector<1x32x256xf32> to vector<32x256xf32>
    %244 = arith.index_cast %c1_i32_119 : i32 to index
    %c0_184 = arith.constant 0 : index
    %c0_185 = arith.constant 0 : index
    %245 = vector.load %arg6[%244, %c0_184, %c0_185] : memref<2x32x32xf32, #tpu.memory_space<vmem>>, vector<1x32x32xf32>
    %246 = vector.shape_cast %245 : vector<1x32x32xf32> to vector<32x32xf32>
    %247 = arith.index_cast %c1_i32_119 : i32 to index
    %c0_186 = arith.constant 0 : index
    %c0_187 = arith.constant 0 : index
    %248 = vector.load %arg7[%247, %c0_186, %c0_187] : memref<2x32x1xf32, #tpu.memory_space<vmem>>, vector<1x32x1xf32>
    %249 = vector.shape_cast %248 : vector<1x32x1xf32> to vector<32x1xf32>
    %c17_i32_188 = arith.constant 17 : i32
    %250 = tpu.dynamic_rotate %240 by %c17_i32_188 dim 1 : vector<32x256xf32>, i32 -> vector<32x256xf32>
    %c0_189 = arith.constant 0 : index
    %c0_190 = arith.constant 0 : index
    %c0_191 = arith.constant 0 : index
    %251 = vector.load %arg12[%c0_189, %c0_190, %c0_191] : memref<8x1x256xf32, #tpu.memory_space<vmem>>, vector<1x1x256xf32>
    %252 = vector.shape_cast %251 : vector<1x1x256xf32> to vector<1x256xf32>
    %253 = vector.broadcast %252 : vector<1x256xf32> to vector<32x256xf32>
    %254 = arith.mulf %250, %253 : vector<32x256xf32>
    %c0_192 = arith.constant 0 : index
    %c0_193 = arith.constant 0 : index
    %255 = vector.load %arg14[%c0_192, %c0_193] : memref<256x256xf32, #tpu.memory_space<vmem>>, vector<32x256xf32>
    tpu.vector_store %arg14[%c0_192, %c0_193], %254 {strides = array<i32>} : memref<256x256xf32, #tpu.memory_space<vmem>>, vector<32x256xf32>,
    %c16_i32_194 = arith.constant 16 : i32
    %256 = tpu.dynamic_rotate %240 by %c16_i32_194 dim 1 : vector<32x256xf32>, i32 -> vector<32x256xf32>
    %c1_195 = arith.constant 1 : index
    %c0_196 = arith.constant 0 : index
    %c0_197 = arith.constant 0 : index
    %257 = vector.load %arg12[%c1_195, %c0_196, %c0_197] : memref<8x1x256xf32, #tpu.memory_space<vmem>>, vector<1x1x256xf32>
    %258 = vector.shape_cast %257 : vector<1x1x256xf32> to vector<1x256xf32>
    %259 = vector.broadcast %258 : vector<1x256xf32> to vector<32x256xf32>
    %260 = arith.mulf %256, %259 : vector<32x256xf32>
    %c32_198 = arith.constant 32 : index
    %c0_199 = arith.constant 0 : index
    %261 = vector.load %arg14[%c32_198, %c0_199] : memref<256x256xf32, #tpu.memory_space<vmem>>, vector<32x256xf32>
    tpu.vector_store %arg14[%c32_198, %c0_199], %260 {strides = array<i32>} : memref<256x256xf32, #tpu.memory_space<vmem>>, vector<32x256xf32>,
    %c15_i32_200 = arith.constant 15 : i32
    %262 = tpu.dynamic_rotate %240 by %c15_i32_200 dim 1 : vector<32x256xf32>, i32 -> vector<32x256xf32>
    %c2_201 = arith.constant 2 : index
    %c0_202 = arith.constant 0 : index
    %c0_203 = arith.constant 0 : index
    %263 = vector.load %arg12[%c2_201, %c0_202, %c0_203] : memref<8x1x256xf32, #tpu.memory_space<vmem>>, vector<1x1x256xf32>
    %264 = vector.shape_cast %263 : vector<1x1x256xf32> to vector<1x256xf32>
    %265 = vector.broadcast %264 : vector<1x256xf32> to vector<32x256xf32>
    %266 = arith.mulf %262, %265 : vector<32x256xf32>
    %c64_204 = arith.constant 64 : index
    %c0_205 = arith.constant 0 : index
    %267 = vector.load %arg14[%c64_204, %c0_205] : memref<256x256xf32, #tpu.memory_space<vmem>>, vector<32x256xf32>
    tpu.vector_store %arg14[%c64_204, %c0_205], %266 {strides = array<i32>} : memref<256x256xf32, #tpu.memory_space<vmem>>, vector<32x256xf32>,
    %c1_i32_206 = arith.constant 1 : i32
    %268 = tpu.dynamic_rotate %240 by %c1_i32_206 dim 1 : vector<32x256xf32>, i32 -> vector<32x256xf32>
    %c3_207 = arith.constant 3 : index
    %c0_208 = arith.constant 0 : index
    %c0_209 = arith.constant 0 : index
    %269 = vector.load %arg12[%c3_207, %c0_208, %c0_209] : memref<8x1x256xf32, #tpu.memory_space<vmem>>, vector<1x1x256xf32>
    %270 = vector.shape_cast %269 : vector<1x1x256xf32> to vector<1x256xf32>
    %271 = vector.broadcast %270 : vector<1x256xf32> to vector<32x256xf32>
    %272 = arith.mulf %268, %271 : vector<32x256xf32>
    %c96_210 = arith.constant 96 : index
    %c0_211 = arith.constant 0 : index
    %273 = vector.load %arg14[%c96_210, %c0_211] : memref<256x256xf32, #tpu.memory_space<vmem>>, vector<32x256xf32>
    tpu.vector_store %arg14[%c96_210, %c0_211], %272 {strides = array<i32>} : memref<256x256xf32, #tpu.memory_space<vmem>>, vector<32x256xf32>,
    %c255_i32_212 = arith.constant 255 : i32
    %274 = tpu.dynamic_rotate %240 by %c255_i32_212 dim 1 : vector<32x256xf32>, i32 -> vector<32x256xf32>
    %c4_213 = arith.constant 4 : index
    %c0_214 = arith.constant 0 : index
    %c0_215 = arith.constant 0 : index
    %275 = vector.load %arg12[%c4_213, %c0_214, %c0_215] : memref<8x1x256xf32, #tpu.memory_space<vmem>>, vector<1x1x256xf32>
    %276 = vector.shape_cast %275 : vector<1x1x256xf32> to vector<1x256xf32>
    %277 = vector.broadcast %276 : vector<1x256xf32> to vector<32x256xf32>
    %278 = arith.mulf %274, %277 : vector<32x256xf32>
    %c128_216 = arith.constant 128 : index
    %c0_217 = arith.constant 0 : index
    %279 = vector.load %arg14[%c128_216, %c0_217] : memref<256x256xf32, #tpu.memory_space<vmem>>, vector<32x256xf32>
    tpu.vector_store %arg14[%c128_216, %c0_217], %278 {strides = array<i32>} : memref<256x256xf32, #tpu.memory_space<vmem>>, vector<32x256xf32>,
    %c241_i32_218 = arith.constant 241 : i32
    %280 = tpu.dynamic_rotate %240 by %c241_i32_218 dim 1 : vector<32x256xf32>, i32 -> vector<32x256xf32>
    %c5_219 = arith.constant 5 : index
    %c0_220 = arith.constant 0 : index
    %c0_221 = arith.constant 0 : index
    %281 = vector.load %arg12[%c5_219, %c0_220, %c0_221] : memref<8x1x256xf32, #tpu.memory_space<vmem>>, vector<1x1x256xf32>
    %282 = vector.shape_cast %281 : vector<1x1x256xf32> to vector<1x256xf32>
    %283 = vector.broadcast %282 : vector<1x256xf32> to vector<32x256xf32>
    %284 = arith.mulf %280, %283 : vector<32x256xf32>
    %c160_222 = arith.constant 160 : index
    %c0_223 = arith.constant 0 : index
    %285 = vector.load %arg14[%c160_222, %c0_223] : memref<256x256xf32, #tpu.memory_space<vmem>>, vector<32x256xf32>
    tpu.vector_store %arg14[%c160_222, %c0_223], %284 {strides = array<i32>} : memref<256x256xf32, #tpu.memory_space<vmem>>, vector<32x256xf32>,
    %c240_i32_224 = arith.constant 240 : i32
    %286 = tpu.dynamic_rotate %240 by %c240_i32_224 dim 1 : vector<32x256xf32>, i32 -> vector<32x256xf32>
    %c6_225 = arith.constant 6 : index
    %c0_226 = arith.constant 0 : index
    %c0_227 = arith.constant 0 : index
    %287 = vector.load %arg12[%c6_225, %c0_226, %c0_227] : memref<8x1x256xf32, #tpu.memory_space<vmem>>, vector<1x1x256xf32>
    %288 = vector.shape_cast %287 : vector<1x1x256xf32> to vector<1x256xf32>
    %289 = vector.broadcast %288 : vector<1x256xf32> to vector<32x256xf32>
    %290 = arith.mulf %286, %289 : vector<32x256xf32>
    %c192_228 = arith.constant 192 : index
    %c0_229 = arith.constant 0 : index
    %291 = vector.load %arg14[%c192_228, %c0_229] : memref<256x256xf32, #tpu.memory_space<vmem>>, vector<32x256xf32>
    tpu.vector_store %arg14[%c192_228, %c0_229], %290 {strides = array<i32>} : memref<256x256xf32, #tpu.memory_space<vmem>>, vector<32x256xf32>,
    %c239_i32_230 = arith.constant 239 : i32
    %292 = tpu.dynamic_rotate %240 by %c239_i32_230 dim 1 : vector<32x256xf32>, i32 -> vector<32x256xf32>
    %c7_231 = arith.constant 7 : index
    %c0_232 = arith.constant 0 : index
    %c0_233 = arith.constant 0 : index
    %293 = vector.load %arg12[%c7_231, %c0_232, %c0_233] : memref<8x1x256xf32, #tpu.memory_space<vmem>>, vector<1x1x256xf32>
    %294 = vector.shape_cast %293 : vector<1x1x256xf32> to vector<1x256xf32>
    %295 = vector.broadcast %294 : vector<1x256xf32> to vector<32x256xf32>
    %296 = arith.mulf %292, %295 : vector<32x256xf32>
    %c224_234 = arith.constant 224 : index
    %c0_235 = arith.constant 0 : index
    %297 = vector.load %arg14[%c224_234, %c0_235] : memref<256x256xf32, #tpu.memory_space<vmem>>, vector<32x256xf32>
    tpu.vector_store %arg14[%c224_234, %c0_235], %296 {strides = array<i32>} : memref<256x256xf32, #tpu.memory_space<vmem>>, vector<32x256xf32>,
    %c0_236 = arith.constant 0 : index
    %c0_237 = arith.constant 0 : index
    %298 = vector.load %arg14[%c0_236, %c0_237] : memref<256x256xf32, #tpu.memory_space<vmem>>, vector<256x256xf32>
    %cst_238 = arith.constant dense<0.000000e+00> : vector<32x256xf32>
    %299 = tpu.matmul %243, %298, %cst_238 {dimension_numbers = #tpu.dot_dimension_numbers<[1], [0], [0], [1], [0, 0, 1, 1], [], []>} : vector<32x256xf32>, vector<256x256xf32>, vector<32x256xf32> -> vector<32x256xf32>
    %cst_239 = arith.constant dense<0.000000e+00> : vector<32x256xf32>
    %300 = tpu.matmul %246, %240, %cst_239 {dimension_numbers = #tpu.dot_dimension_numbers<[1], [0], [0], [1], [0, 0, 1, 1], [], []>} : vector<32x32xf32>, vector<32x256xf32>, vector<32x256xf32> -> vector<32x256xf32>
    %301 = arith.addf %299, %300 : vector<32x256xf32>
    %302 = vector.broadcast %249 : vector<32x1xf32> to vector<32x256xf32>
    %303 = arith.addf %301, %302 : vector<32x256xf32>
    %cst_240 = arith.constant dense<0.000000e+00> : vector<32xf32>
    %304 = vector.multi_reduction <add>, %303, %cst_240 [1] : vector<32x256xf32> to vector<32xf32>
    %305 = vector.shape_cast %304 : vector<32xf32> to vector<32x1xf32>
    %cst_241 = arith.constant 2.560000e+02 : f32
    %306 = vector.broadcast %cst_241 : f32 to vector<32x1xf32>
    %307 = arith.divf %305, %306 : vector<32x1xf32>
    %308 = arith.index_cast %c1_i32_119 : i32 to index
    %c0_242 = arith.constant 0 : index
    %c0_243 = arith.constant 0 : index
    %309 = vector.load %arg8[%308, %c0_242, %c0_243] : memref<2x32x2xf32, #tpu.memory_space<vmem>>, vector<1x32x2xf32>
    %310 = vector.shape_cast %309 : vector<1x32x2xf32> to vector<32x2xf32>
    %311 = vector.broadcast %307 : vector<32x1xf32> to vector<32x2xf32>
    %312 = arith.mulf %310, %311 : vector<32x2xf32>
    %cst_244 = arith.constant dense<0.000000e+00> : vector<2xf32>
    %313 = vector.multi_reduction <add>, %312, %cst_244 [0] : vector<32x2xf32> to vector<2xf32>
    %314 = vector.shape_cast %313 : vector<2xf32> to vector<1x2xf32>
    %315 = arith.index_cast %c1_i32_119 : i32 to index
    %c0_245 = arith.constant 0 : index
    %c0_246 = arith.constant 0 : index
    %316 = vector.load %arg9[%315, %c0_245, %c0_246] : memref<2x1x2xf32, #tpu.memory_space<vmem>>, vector<1x1x2xf32>
    %317 = vector.shape_cast %316 : vector<1x1x2xf32> to vector<1x2xf32>
    %318 = arith.addf %314, %317 : vector<1x2xf32>
    %cst_247 = arith.constant 0.000000e+00 : f32
    %319 = vector.broadcast %cst_247 : f32 to vector<1x2xf32>
    %320 = arith.maximumf %318, %319 : vector<1x2xf32>
    %321 = arith.index_cast %c1_i32_119 : i32 to index
    %c0_248 = arith.constant 0 : index
    %c0_249 = arith.constant 0 : index
    %322 = vector.load %arg10[%321, %c0_248, %c0_249] : memref<2x32x2xf32, #tpu.memory_space<vmem>>, vector<1x32x2xf32>
    %323 = vector.shape_cast %322 : vector<1x32x2xf32> to vector<32x2xf32>
    %324 = vector.broadcast %320 : vector<1x2xf32> to vector<32x2xf32>
    %325 = arith.mulf %323, %324 : vector<32x2xf32>
    %cst_250 = arith.constant dense<0.000000e+00> : vector<32xf32>
    %326 = vector.multi_reduction <add>, %325, %cst_250 [1] : vector<32x2xf32> to vector<32xf32>
    %327 = vector.shape_cast %326 : vector<32xf32> to vector<32x1xf32>
    %328 = arith.index_cast %c1_i32_119 : i32 to index
    %c0_251 = arith.constant 0 : index
    %c0_252 = arith.constant 0 : index
    %329 = vector.load %arg11[%328, %c0_251, %c0_252] : memref<2x32x1xf32, #tpu.memory_space<vmem>>, vector<1x32x1xf32>
    %330 = vector.shape_cast %329 : vector<1x32x1xf32> to vector<32x1xf32>
    %331 = arith.addf %327, %330 : vector<32x1xf32>
    %332 = arith.negf %331 : vector<32x1xf32>
    %333 = math.exp %332 : vector<32x1xf32>
    %cst_253 = arith.constant 1.000000e+00 : f32
    %334 = vector.broadcast %cst_253 : f32 to vector<32x1xf32>
    %335 = arith.addf %334, %333 : vector<32x1xf32>
    %336 = arith.divf %334, %335 : vector<32x1xf32>
    %337 = vector.broadcast %336 : vector<32x1xf32> to vector<32x256xf32>
    %338 = arith.mulf %303, %337 : vector<32x256xf32>
    %339 = arith.addf %338, %175 : vector<32x256xf32>
    %c0_254 = arith.constant 0 : index
    %c0_255 = arith.constant 0 : index
    %c0_256 = arith.constant 0 : index
    %340 = vector.load %arg13[%c0_254, %c0_255, %c0_256] : memref<1x32x256xf32, #tpu.memory_space<vmem>>, vector<1x32x256xf32>
    %341 = vector.shape_cast %340 : vector<1x32x256xf32> to vector<32x256xf32>
    %342 = vector.shape_cast %339 : vector<32x256xf32> to vector<1x32x256xf32>
    tpu.vector_store %arg13[%c0_254, %c0_255, %c0_256], %342 {strides = array<i32>} : memref<1x32x256xf32, #tpu.memory_space<vmem>>, vector<1x32x256xf32>,
    %c2_i32 = arith.constant 2 : i32
    return
  }
  func.func @transform_0(%arg0: i32) -> (i32, i32, i32) {
    %c0_i32 = arith.constant 0 : i32
    %c0_i32_0 = arith.constant 0 : i32
    %c0_i32_1 = arith.constant 0 : i32
    return %arg0, %c0_i32, %c0_i32_0 : i32, i32, i32
  }
  func.func @transform_1(%arg0: i32) -> (i32, i32, i32) {
    %c0_i32 = arith.constant 0 : i32
    %c0_i32_0 = arith.constant 0 : i32
    %c0_i32_1 = arith.constant 0 : i32
    %c0_i32_2 = arith.constant 0 : i32
    return %c0_i32, %c0_i32_0, %c0_i32_1 : i32, i32, i32
  }
  func.func @transform_2(%arg0: i32) -> (i32, i32, i32) {
    %c0_i32 = arith.constant 0 : i32
    %c0_i32_0 = arith.constant 0 : i32
    %c0_i32_1 = arith.constant 0 : i32
    %c0_i32_2 = arith.constant 0 : i32
    return %c0_i32, %c0_i32_0, %c0_i32_1 : i32, i32, i32
  }
  func.func @transform_3(%arg0: i32) -> (i32, i32, i32) {
    %c0_i32 = arith.constant 0 : i32
    %c0_i32_0 = arith.constant 0 : i32
    %c0_i32_1 = arith.constant 0 : i32
    %c0_i32_2 = arith.constant 0 : i32
    return %c0_i32, %c0_i32_0, %c0_i32_1 : i32, i32, i32
  }
  func.func @transform_4(%arg0: i32) -> (i32, i32, i32) {
    %c0_i32 = arith.constant 0 : i32
    %c0_i32_0 = arith.constant 0 : i32
    %c0_i32_1 = arith.constant 0 : i32
    %c0_i32_2 = arith.constant 0 : i32
    return %c0_i32, %c0_i32_0, %c0_i32_1 : i32, i32, i32
  }
  func.func @transform_5(%arg0: i32) -> (i32, i32, i32) {
    %c0_i32 = arith.constant 0 : i32
    %c0_i32_0 = arith.constant 0 : i32
    %c0_i32_1 = arith.constant 0 : i32
    %c0_i32_2 = arith.constant 0 : i32
    return %c0_i32, %c0_i32_0, %c0_i32_1 : i32, i32, i32
  }
  func.func @transform_6(%arg0: i32) -> (i32, i32, i32) {
    %c0_i32 = arith.constant 0 : i32
    %c0_i32_0 = arith.constant 0 : i32
    %c0_i32_1 = arith.constant 0 : i32
    %c0_i32_2 = arith.constant 0 : i32
    return %c0_i32, %c0_i32_0, %c0_i32_1 : i32, i32, i32
  }
  func.func @transform_7(%arg0: i32) -> (i32, i32, i32) {
    %c0_i32 = arith.constant 0 : i32
    %c0_i32_0 = arith.constant 0 : i32
    %c0_i32_1 = arith.constant 0 : i32
    %c0_i32_2 = arith.constant 0 : i32
    return %c0_i32, %c0_i32_0, %c0_i32_1 : i32, i32, i32
  }
  func.func @transform_8(%arg0: i32) -> (i32, i32, i32) {
    %c0_i32 = arith.constant 0 : i32
    %c0_i32_0 = arith.constant 0 : i32
    %c0_i32_1 = arith.constant 0 : i32
    %c0_i32_2 = arith.constant 0 : i32
    return %c0_i32, %c0_i32_0, %c0_i32_1 : i32, i32, i32
  }
  func.func @transform_9(%arg0: i32) -> (i32, i32, i32) {
    %c0_i32 = arith.constant 0 : i32
    %c0_i32_0 = arith.constant 0 : i32
    %c0_i32_1 = arith.constant 0 : i32
    %c0_i32_2 = arith.constant 0 : i32
    return %c0_i32, %c0_i32_0, %c0_i32_1 : i32, i32, i32
  }
  func.func @transform_10(%arg0: i32) -> (i32, i32, i32) {
    %c0_i32 = arith.constant 0 : i32
    %c0_i32_0 = arith.constant 0 : i32
    %c0_i32_1 = arith.constant 0 : i32
    %c0_i32_2 = arith.constant 0 : i32
    return %c0_i32, %c0_i32_0, %c0_i32_1 : i32, i32, i32
  }
  func.func @transform_11(%arg0: i32) -> (i32, i32, i32) {
    %c0_i32 = arith.constant 0 : i32
    %c0_i32_0 = arith.constant 0 : i32
    %c0_i32_1 = arith.constant 0 : i32
    %c0_i32_2 = arith.constant 0 : i32
    return %c0_i32, %c0_i32_0, %c0_i32_1 : i32, i32, i32
  }
  func.func @transform_12(%arg0: i32) -> (i32, i32, i32) {
    %c0_i32 = arith.constant 0 : i32
    %c0_i32_0 = arith.constant 0 : i32
    %c0_i32_1 = arith.constant 0 : i32
    return %arg0, %c0_i32, %c0_i32_0 : i32, i32, i32
  }
}

</mosaic_0001>

<bundles_post_ra>
// kernel: tpu_custom_call.1
= control target key start
LH: loop header
LB: loop body
LE: loop exit
PB: predicated region body
PF: predicated region fallthrough
CT: control target
= control target key end

     0   :  { %17 = vsyncpa [#allocation4], 0  ;;  %s6412_s0 = inlined_call_operand.vmem [shape: f32[2,32,256], index: 0, kind: input, shape index: {}]   ;;  %s6413_s1 = inlined_call_operand.hbm [shape: f32[2,32,256], index: 1, kind: input, shape index: {}]   ;;  %s6414_s2 = inlined_call_operand.vmem [shape: f32[2,32,32], index: 2, kind: input, shape index: {}]   ;;  %s6415_s3 = inlined_call_operand.vmem [shape: f32[2,32,1], index: 3, kind: input, shape index: {}]   ;;  %s6416_s4 = inlined_call_operand.hbm [shape: f32[2,32,256], index: 4, kind: input, shape index: {}]   ;;  %s6417_s5 = inlined_call_operand.vmem [shape: f32[2,32,32], index: 5, kind: input, shape index: {}]   ;;  %s6418_s6 = inlined_call_operand.vmem [shape: f32[2,32,1], index: 6, kind: input, shape index: {}]   ;;  %s6419_s7 = inlined_call_operand.vmem [shape: f32[2,32,2], index: 7, kind: input, shape index: {}]   ;;  %s6420_s8 = inlined_call_operand.vmem [shape: f32[2,1,2], index: 8, kind: input, shape index: {}]   ;;  %s6421_s9 = inlined_call_operand.vmem [shape: f32[2,32,2], index: 9, kind: input, shape index: {}]   ;;  %s6422_s10 = inlined_call_operand.vmem [shape: f32[2,32,1], index: 10, kind: input, shape index: {}]   ;;  %s6423_s11 = inlined_call_operand.vmem [shape: f32[8,1,256], index: 11, kind: input, shape index: {}]   ;;  %s6424_s12 = inlined_call_operand.hbm [shape: f32[2,32,256], index: 12, kind: output, shape index: {}]  }
   0x1   :  { %18 = vsyncpa [#allocation7], 0 }
   0x2   :  { %19 = vsyncpa [#allocation5], 0 }
   0x3   :  { %21 = vsyncpa [#allocation5 + $0x1], 0  ;;  %s4133_s21 = smov 0   ;;  %s4135_s22 = smov 0  }
   0x4   :  { %s4137_s23 = smov 0   ;;  %s4139_s24 = smov 0  }
   0x5 LB: > { %6459 = sst [smem:[#allocation12_spill]] %s4047_s23  ;;  %s4154_s25 = sadd.s32 4294967295, %s4051_s24   ;;  %s4051_s24 = sphi %s4139_s24, %s6560_s24   ;;  %s4047_s23 = sphi %s4137_s23, %s6562_s23   ;;  %s4043_s22 = sphi %s4135_s22, %s6564_s22   ;;  %s4039_s21 = sphi %s4133_s21, %s6563_s21  }
   0x6   : > { %s3656_s26 = sadd.s32 4294967294, %s4051_s24   ;;  %s4158_s27 = sadd.s32 1, %s4051_s24  }
   0x7   : > { %6460 = sst [smem:[#allocation13_spill]] %s4158_s27  ;;  %s291_s28 = sadd.s32 1, %s4047_s23 }
   0x8   : > { %s288_s29 = ssub.s32 %s4051_s24, %s4158_s27  ;;  %p301_p0 = scmp.ne.s32.totalorder %s4047_s23, %s4043_s22 }
   0x9   : > { %p289_p1 = scmp.eq.s32.totalorder %s288_s29, 0  ;;  %p302_p2 = scmp.eq.s32.totalorder %s4154_s25, 1 }
   0xa   : > { %p307_p3 = scmp.ne.s32.totalorder %s4043_s22, %s4039_s21  ;;  %p308_p4 = scmp.eq.s32.totalorder %s3656_s26, 1 }
   0xb   : > { %s4169_s30 = scalar_select %p289_p1, %s4047_s23, %s291_s28  }
   0xc   : > { %p4171_p5 = por %p302_p2, %p301_p0  ;;  %p4175_p6 = por %p308_p4, %p307_p3 }
   0xd   : > { %6461 = sst [smem:[#allocation14_spill]] %s4169_s30  ;;  %p3657_p7 = scmp.ge.s32.totalorder %s4051_s24, 1 }
   0xe   : > { %p315_p8 = scmp.lt.s32.totalorder %s4051_s24, 3  ;;  %p3824_p9 = scmp.eq.s32.totalorder %s4154_s25, 0 }
   0xf   : > { %s326_s18 = sshll.u32 %s6413_s1, 4  ;;  %s4053_s19 = smov [#allocation3]   ;;  %s327_s18 = int_to_ptr.hbm [resolvable:$true] %s326_s18 }
  0x10   : > { %p4182_p10 = pnand %p3657_p7, %p315_p8  ;;  %s328_s20 = sshll.u32 %s4053_s19, 4  ;;  %s329_s20 = int_to_ptr.vmem [resolvable:$true] %s328_s20 }
  0x11   : > { %s346_s29 = sshll.u32 %s6416_s4, 4  ;;  %s4054_s30 = smov 256   ;;  %s347_s29 = int_to_ptr.hbm [resolvable:$true] %s346_s29 }
  0x12   : > { %p3813_p11 = pneg %p4182_p10  ;;  %s4055_s23 = smov 16  }
  0x13   : > { %s4056_s27 = smov [#allocation6]   ;;  %393 = sbr.rel (%p4182_p10) target bundleno = 2607 (0xa2f), region = 68 }
  0x14   : > { %p3814_p12 = pnand %p3824_p9, %p3813_p11  ;;  %s348_s16 = sshll.u32 %s4056_s27, 4  ;;  %s349_s16 = int_to_ptr.vmem [resolvable:$true] %s348_s16 }
  0x16   : > { %3816 = dma.hbm_to_vmem [thread:$0]  (!%p3814_p12), %s327_s18, 2048, %s329_s20, [#allocation4], %s4054_s30, %s4054_s30, %s4055_s23  }
  0x17   : > { %3819 = dma.hbm_to_vmem [thread:$0]  (!%p3814_p12), %s347_s29, 2048, %s349_s16, [#allocation7], %s4054_s30, %s4054_s30, %s4055_s23  }
  0x18   : > { %4026 = dma.done.wait (%p3824_p9), [#allocation4], 2048  }
  0x19   : > { %4028 = vsyncadd (%p3824_p9), [#allocation4], 4294965248 }
  0x1a   : > { %4030 = dma.done.wait (%p3824_p9), [#allocation7], 2048  }
  0x1b   : > { %4032 = vsyncadd (%p3824_p9), [#allocation7], 4294965248  ;;  %p441_p13 = scmp.lt.s32.totalorder %s4154_s25, 1  ;;  %s6447_s18 = smov 1   ;;  %v502_v8 = vlaneseq  ;;  %v3673_v11 = vld [vmem:[%s6423_s11 + $0xe] sm:$0x3] }
  0x1c   : > { %s6445_s19 = smov 111   ;;  %s6438_s20 = smov 15   ;;  %v4329_v12 = vperm.slane %v3673_v11, 0  ;;  %v4331_v13 = vperm.slane %v3673_v11, 1  ;;  %v3669_v23 = vld [vmem:[%s6423_s11 + $0x6] sm:$0x3] }
  0x1d   : > { %s442_s27 = scalar_select %p441_p13, %s4154_s25, 1  ;;  %v4317_v10 = vand.u32 127, %v502_v8  ;;  %v659_v24 = vperm.slane %v3669_v23, 0  ;;  %v660_v25 = vperm.slane %v3669_v23, 1  ;;  %v3668_v62 = vld [vmem:[%s6423_s11 + $0x4] sm:$0x3] }
  0x1e   : > { %s6436_s26 = smov 112   ;;  %s6434_s28 = smov 16   ;;  %v4417_v63 = vperm.slane %v3668_v62, 0  ;;  %vm6444_vm5 = vcmask 261120   ;;  %vm6440_vm10 = vcmask 15360  }
  0x1f   : > { %s3769_s23 = sshll.u32 %s442_s27, 6  ;;  %s6430_s27 = smov 113   ;;  %vm839_vm0 = vcmp.lt.s32.totalorder %v4317_v10, 111  ;;  %vm647_vm1 = vcmp.lt.s32.totalorder %v4317_v10, 1  ;;  %vm599_vm2 = vcmp.lt.s32.totalorder %v4317_v10, 15  ;;  %vm791_vm3 = vcmp.lt.s32.totalorder %v4317_v10, 112 }
  0x20   : > { %s4211_s17 = scalar_lea.vmem %s6412_s0, %s3769_s23  ;;  %s6432_s15 = smov 17   ;;  %vm551_vm4 = vcmp.lt.s32.totalorder %v4317_v10, 16  ;;  %vm6443_vm6 = vcmp.lt.s32.totalorder %v4317_v10, 113  ;;  %vm6442_vm7 = vcmp.lt.s32.totalorder %v4317_v10, 17  ;;  %vm6441_vm8 = vcmp.lt.s32.totalorder %v4317_v10, 127 }
  0x21   : > { %v4214_v0 = vld [vmem:[%s4211_s17 + $0x30] sm:$0xff]  ;;  %v4217_v1 = vld [vmem:[%s4211_s17 + $0x20] sm:$0xff]  ;;  %v4224_v2 = vld [vmem:[%s4211_s17 + $0x38] sm:$0xff]  ;;  %s6428_s29 = smov 127   ;;  %s6465_s23 = smov 127  }
  0x22   : > { %637 = vrot.lane.b32.xlu0 %v4214_v0, %s6447_s18  ;;  %635 = vrot.lane.b32.xlu1 %v4217_v1, %s6447_s18  ;;  %v4231_v3 = vld [vmem:[%s4211_s17 + $0x28] sm:$0xff]  ;;  %v4235_v4 = vld [vmem:[%s4211_s17 + $0x10] sm:$0xff]  ;;  %s6478_s30 = smov 113   ;;  %s6479_s16 = smov 17  }
  0x23   : > { %829 = vrot.lane.b32.xlu2 %v4214_v0, %s6445_s19  ;;  %960 = vmatpush.msra.mxu0 %v4214_v0  ;;  %v4239_v5 = vld [vmem:[%s4211_s17 + $0x18] sm:$0xff]  ;;  %v4243_v6 = vld [vmem:[%s4211_s17] sm:$0xff]  ;;  %v4258_v7 = vld [vmem:[%s4211_s17 + $0x8] sm:$0xff] }
  0x24   : > { %989 = vmatpush.msra.mxu1 %v4224_v2 }
  0x25   : > { %961 = vmatpush.msra.mxu0 %v4217_v1 }
  0x26   : > { %990 = vmatpush.msra.mxu1 %v4231_v3 }
  0x27   : > { %962 = vmatpush.msra.mxu0 %v4235_v4 }
  0x28   : > { %991 = vmatpush.msra.mxu1 %v4239_v5 }
  0x29   : > { %963 = vmatpush.msra.mxu0 %v4243_v6 }
  0x2a   : > { %645 = vrot.lane.b32.xlu0 %v4224_v2, %s6447_s18  ;;  %643 = vrot.lane.b32.xlu1 %v4231_v3, %s6447_s18 }
  0x2b   : > { %837 = vrot.lane.b32.xlu2 %v4224_v2, %s6445_s19  ;;  %992 = vmatpush.msra.mxu1 %v4258_v7 }
  0x32   : > { %641 = vrot.lane.b32.xlu1 %v4239_v5, %s6447_s18  ;;  %633 = vrot.lane.b32.xlu0 %v4235_v4, %s6447_s18 }
  0x33   : > { %827 = vrot.lane.b32.xlu2 %v4217_v1, %s6445_s19 }
  0x3a   : > { %835 = vrot.lane.b32.xlu0 %v4231_v3, %s6445_s19  ;;  %631 = vrot.lane.b32.xlu1 %v4243_v6, %s6447_s18 }
  0x3b   : > { %639 = vrot.lane.b32.xlu2 %v4258_v7, %s6447_s18 }
  0x42   : > { %825 = vrot.lane.b32.xlu0 %v4235_v4, %s6445_s19  ;;  %833 = vrot.lane.b32.xlu1 %v4239_v5, %s6445_s19 }
  0x43   : > { %589 = vrot.lane.b32.xlu2 %v4214_v0, %s6438_s20 }
  0x4a   : > { %597 = vrot.lane.b32.xlu0 %v4224_v2, %s6438_s20  ;;  %823 = vrot.lane.b32.xlu1 %v4243_v6, %s6445_s19 }
  0x4b   : > { %831 = vrot.lane.b32.xlu2 %v4258_v7, %s6445_s19 }
  0x52   : > { %587 = vrot.lane.b32.xlu0 %v4217_v1, %s6438_s20  ;;  %595 = vrot.lane.b32.xlu1 %v4231_v3, %s6438_s20 }
  0x53   : > { %781 = vrot.lane.b32.xlu2 %v4214_v0, %s6436_s26 }
  0x5a   : > { %789 = vrot.lane.b32.xlu0 %v4224_v2, %s6436_s26  ;;  %585 = vrot.lane.b32.xlu1 %v4235_v4, %s6438_s20 }
  0x5b   : > { %593 = vrot.lane.b32.xlu2 %v4239_v5, %s6438_s20 }
  0x62   : > { %779 = vrot.lane.b32.xlu0 %v4217_v1, %s6436_s26  ;;  %787 = vrot.lane.b32.xlu1 %v4231_v3, %s6436_s26 }
  0x63   : > { %583 = vrot.lane.b32.xlu2 %v4243_v6, %s6438_s20 }
  0x6a   : > { %591 = vrot.lane.b32.xlu0 %v4258_v7, %s6438_s20  ;;  %777 = vrot.lane.b32.xlu1 %v4235_v4, %s6436_s26 }
  0x6b   : > { %785 = vrot.lane.b32.xlu2 %v4239_v5, %s6436_s26 }
  0x72   : > { %541 = vrot.lane.b32.xlu0 %v4214_v0, %s6434_s28  ;;  %549 = vrot.lane.b32.xlu1 %v4224_v2, %s6434_s28 }
  0x73   : > { %775 = vrot.lane.b32.xlu2 %v4243_v6, %s6436_s26 }
  0x7a   : > { %783 = vrot.lane.b32.xlu0 %v4258_v7, %s6436_s26  ;;  %539 = vrot.lane.b32.xlu1 %v4217_v1, %s6434_s28 }
  0x7b   : > { %547 = vrot.lane.b32.xlu2 %v4231_v3, %s6434_s28 }
  0x7d   : > { %v830_v9 = vpop.permute.xlu2 %829 }
  0x82   : > { %733 = vrot.lane.b32.xlu0 %v4214_v0, %s6430_s27  ;;  %741 = vrot.lane.b32.xlu1 %v4224_v2, %s6430_s27 }
  0x83   : > { %537 = vrot.lane.b32.xlu2 %v4235_v4, %s6434_s28 }
  0x85   : > { %v838_v14 = vpop.permute.xlu2 %837 }
  0x86   : > { %v843_v15 = vsel %vm839_vm0, %v830_v9, %v838_v14  ;;  %v847_v16 = vsel %vm839_vm0, %v838_v14, %v830_v9 }
  0x87   : > { %v861_v17 = vmul.f32 %v4329_v12, %v843_v15  ;;  %v862_v18 = vmul.f32 %v4331_v13, %v847_v16 }
  0x89   : > { %1035 = vmatpush.msra.mxu3 %v861_v17  ;;  %1093 = vmatpush.msrb.mxu1 %v862_v18 }
  0x8a   : > { %545 = vrot.lane.b32.xlu0 %v4239_v5, %s6434_s28  ;;  %731 = vrot.lane.b32.xlu1 %v4217_v1, %s6430_s27 }
  0x8b   : > { %739 = vrot.lane.b32.xlu2 %v4231_v3, %s6430_s27 }
  0x8d   : > { %v828_v19 = vpop.permute.xlu2 %827 }
  0x92   : > { %535 = vrot.lane.b32.xlu0 %v4243_v6, %s6434_s28  ;;  %543 = vrot.lane.b32.xlu1 %v4258_v7, %s6434_s28 }
  0x93   : > { %729 = vrot.lane.b32.xlu2 %v4235_v4, %s6430_s27 }
  0x94   : > { %v638_v20 = vpop.permute.xlu0 %637  ;;  %v636_v21 = vpop.permute.xlu1 %635 }
  0x95   : > { %v640_v22 = vpop.permute.xlu2 %639 }
  0x9a   : > { %737 = vrot.lane.b32.xlu0 %v4239_v5, %s6430_s27  ;;  %492 = vrot.lane.b32.xlu1 %v4214_v0, %s6432_s15 }
  0x9b   : > { %500 = vrot.lane.b32.xlu2 %v4224_v2, %s6432_s15 }
  0x9c   : > { %v646_v26 = vpop.permute.xlu0 %645  ;;  %v644_v27 = vpop.permute.xlu1 %643 }
  0x9d   : > { %v655_v28 = vsel %vm647_vm1, %v646_v26, %v638_v20  ;;  %v651_v29 = vsel %vm647_vm1, %v638_v20, %v646_v26  ;;  %v654_v30 = vsel %vm647_vm1, %v644_v27, %v636_v21  ;;  %v4367_v31 = vpop.permute.xlu2 %589  ;;  %v650_v34 = vsel %vm647_vm1, %v636_v21, %v644_v27 }
  0x9e   : > { %v669_v32 = vmul.f32 %v659_v24, %v655_v28  ;;  %v670_v33 = vmul.f32 %v660_v25, %v651_v29  ;;  %v667_v35 = vmul.f32 %v659_v24, %v654_v30  ;;  %v668_v36 = vmul.f32 %v660_v25, %v650_v34 }
  0xa0   : > { %1006 = vmatpush.msra.mxu2 %v669_v32  ;;  %1064 = vmatpush.msrb.mxu0 %v670_v33 }
  0xa2   : > { %1007 = vmatpush.msra.mxu2 %v667_v35  ;;  %727 = vrot.lane.b32.xlu0 %v4243_v6, %s6430_s27 }
  0xa3   : > { %735 = vrot.lane.b32.xlu1 %v4258_v7, %s6430_s27  ;;  %1065 = vmatpush.msrb.mxu0 %v668_v36 }
  0xa4   : > { %v642_v37 = vpop.permute.xlu1 %641  ;;  %v634_v38 = vpop.permute.xlu0 %633  ;;  %490 = vrot.lane.b32.xlu2 %v4217_v1, %s6432_s15 }
  0xa5   : > { %v653_v39 = vsel %vm647_vm1, %v642_v37, %v634_v38  ;;  %v649_v40 = vsel %vm647_vm1, %v634_v38, %v642_v37  ;;  %v832_v41 = vpop.permute.xlu2 %831 }
  0xa6   : > { %v665_v42 = vmul.f32 %v659_v24, %v653_v39  ;;  %v666_v43 = vmul.f32 %v660_v25, %v649_v40 }
  0xa8   : > { %1008 = vmatpush.msra.mxu2 %v665_v42  ;;  %1066 = vmatpush.msrb.mxu0 %v666_v43 }
  0xaa   : > { %498 = vrot.lane.b32.xlu0 %v4231_v3, %s6432_s15 }
  0xab   : > { %685 = vrot.lane.b32.xlu1 %v4214_v0, %s6428_s29  ;;  %v4419_v0 = vperm.slane %v3668_v62, 1 }
  0xac   : > { %v836_v44 = vpop.permute.xlu0 %835  ;;  %v632_v45 = vpop.permute.xlu1 %631  ;;  %693 = vrot.lane.b32.xlu2 %v4224_v2, %s6428_s29 }
  0xad   : > { %v842_v46 = vsel %vm839_vm0, %v828_v19, %v836_v44  ;;  %v846_v47 = vsel %vm839_vm0, %v836_v44, %v828_v19  ;;  %v652_v48 = vsel %vm647_vm1, %v640_v22, %v632_v45  ;;  %v648_v49 = vsel %vm647_vm1, %v632_v45, %v640_v22  ;;  %v4395_v50 = vpop.permute.xlu2 %781 }
  0xae   : > { %v859_v51 = vmul.f32 %v4329_v12, %v842_v46  ;;  %v860_v52 = vmul.f32 %v4331_v13, %v846_v47  ;;  %v663_v53 = vmul.f32 %v659_v24, %v652_v48  ;;  %v664_v54 = vmul.f32 %v660_v25, %v648_v49 }
  0xb0   : > { %1036 = vmatpush.msra.mxu3 %v859_v51  ;;  %1094 = vmatpush.msrb.mxu1 %v860_v52  ;;  %v3667_v51 = vld [vmem:[%s6423_s11 + $0x2] sm:$0x3] }
  0xb1   : > { %1009 = vmatpush.msra.mxu2 %v663_v53  ;;  %1067 = vmatpush.msrb.mxu0 %v664_v54  ;;  %v4487_v52 = vperm.slane %v3667_v51, 0  ;;  %v4489_v53 = vperm.slane %v3667_v51, 1 }
  0xb2   : > { %488 = vrot.lane.b32.xlu0 %v4235_v4, %s6432_s15 }
  0xb3   : > { %496 = vrot.lane.b32.xlu1 %v4239_v5, %s6432_s15 }
  0xb4   : > { %v826_v55 = vpop.permute.xlu0 %825  ;;  %v834_v56 = vpop.permute.xlu1 %833  ;;  %683 = vrot.lane.b32.xlu2 %v4217_v1, %s6428_s29 }
  0xb5   : > { %v841_v57 = vsel %vm839_vm0, %v826_v55, %v834_v56  ;;  %v845_v58 = vsel %vm839_vm0, %v834_v56, %v826_v55  ;;  %v594_v59 = vpop.permute.xlu2 %593 }
  0xb6   : > { %v857_v60 = vmul.f32 %v4329_v12, %v841_v57  ;;  %v858_v61 = vmul.f32 %v4331_v13, %v845_v58 }
  0xb8   : > { %1037 = vmatpush.msra.mxu3 %v857_v60  ;;  %1095 = vmatpush.msrb.mxu1 %v858_v61 }
  0xba   : > { %691 = vrot.lane.b32.xlu0 %v4231_v3, %s6428_s29 }
  0xbb   : > { %486 = vrot.lane.b32.xlu1 %v4243_v6, %s6432_s15 }
  0xbc   : > { %v598_v1 = vpop.permute.xlu0 %597  ;;  %v824_v2 = vpop.permute.xlu1 %823  ;;  %494 = vrot.lane.b32.xlu2 %v4258_v7, %s6432_s15 }
  0xbd   : > { %v607_v8 = vsel %vm599_vm2, %v598_v1, %v4367_v31  ;;  %v603_v3 = vsel %vm599_vm2, %v4367_v31, %v598_v1  ;;  %v840_v9 = vsel %vm839_vm0, %v824_v2, %v832_v41  ;;  %v844_v11 = vsel %vm839_vm0, %v832_v41, %v824_v2  ;;  %v584_v14 = vpop.permute.xlu2 %583 }
  0xbe   : > { %v621_v15 = vmul.f32 %v4417_v63, %v607_v8  ;;  %v622_v16 = vmul.f32 %v4419_v0, %v603_v3  ;;  %v855_v17 = vmul.f32 %v4329_v12, %v840_v9  ;;  %v856_v18 = vmul.f32 %v4331_v13, %v844_v11 }
  0xc0   : > { %1010 = vmatpush.msra.mxu2 %v621_v15  ;;  %1068 = vmatpush.msrb.mxu0 %v622_v16  ;;  %v478_v16 = vld [vmem:[%s6414_s2] sm:$0xff] }
  0xc1   : > { %1038 = vmatpush.msra.mxu3 %v855_v17  ;;  %1096 = vmatpush.msrb.mxu1 %v856_v18 }
  0xc2   : > { %681 = vrot.lane.b32.xlu0 %v4235_v4, %s6428_s29  ;;  %v3672_v4 = vld [vmem:[%s6423_s11 + $0xc] sm:$0x3]  ;;  %3674 = vmatmul.msk.f32.vlgmr.msra.gmra.mxu0 %vm6444_vm5, %v478_v16 }
  0xc3   : > { %689 = vrot.lane.b32.xlu1 %v4239_v5, %s6428_s29  ;;  %v804_v23 = vperm.slane %v3672_v4, 1  ;;  %3678 = vmatmul.msk.f32.vlgmr.msra.gmra.mxu1 %vm6444_vm5, %v478_v16 }
  0xc4   : > { %v588_v19 = vpop.permute.xlu0 %587  ;;  %v596_v20 = vpop.permute.xlu1 %595  ;;  %679 = vrot.lane.b32.xlu2 %v4243_v6, %s6428_s29  ;;  %v803_v6 = vperm.slane %v3672_v4, 0 }
  0xc5   : > { %v606_v12 = vsel %vm599_vm2, %v596_v20, %v588_v19  ;;  %v602_v13 = vsel %vm599_vm2, %v588_v19, %v596_v20  ;;  %v786_v5 = vpop.permute.xlu2 %785 }
  0xc6   : > { %v619_v21 = vmul.f32 %v4417_v63, %v606_v12  ;;  %v620_v22 = vmul.f32 %v4419_v0, %v602_v13 }
  0xc8   : > { %1011 = vmatpush.msra.mxu2 %v619_v21  ;;  %1069 = vmatpush.msrb.mxu0 %v620_v22 }
  0xca   : > { %687 = vrot.lane.b32.xlu0 %v4258_v7, %s6428_s29 }
  0xcc   : > { %v790_v24 = vpop.permute.xlu0 %789  ;;  %v586_v25 = vpop.permute.xlu1 %585 }
  0xcd   : > { %v795_v26 = vsel %vm791_vm3, %v4395_v50, %v790_v24  ;;  %v799_v27 = vsel %vm791_vm3, %v790_v24, %v4395_v50  ;;  %v605_v28 = vsel %vm599_vm2, %v594_v59, %v586_v25  ;;  %v601_v7 = vsel %vm599_vm2, %v586_v25, %v594_v59  ;;  %v776_v33 = vpop.permute.xlu2 %775 }
  0xce   : > { %v813_v29 = vmul.f32 %v803_v6, %v795_v26  ;;  %v814_v30 = vmul.f32 %v804_v23, %v799_v27  ;;  %v617_v31 = vmul.f32 %v4417_v63, %v605_v28  ;;  %v618_v32 = vmul.f32 %v4419_v0, %v601_v7 }
  0xd0   : > { %1039 = vmatpush.msra.mxu3 %v813_v29  ;;  %1097 = vmatpush.msrb.mxu1 %v814_v30 }
  0xd1   : > { %1012 = vmatpush.msra.mxu2 %v617_v31  ;;  %1070 = vmatpush.msrb.mxu0 %v618_v32  ;;  %v480_v31 = vld [vmem:[%s6414_s2 + $0x10] sm:$0xff] }
  0xd4   : > { %v780_v34 = vpop.permute.xlu0 %779  ;;  %v788_v35 = vpop.permute.xlu1 %787 }
  0xd5   : > { %v794_v36 = vsel %vm791_vm3, %v780_v34, %v788_v35  ;;  %v798_v37 = vsel %vm791_vm3, %v788_v35, %v780_v34  ;;  %v548_v40 = vpop.permute.xlu2 %547 }
  0xd6   : > { %v811_v38 = vmul.f32 %v803_v6, %v794_v36  ;;  %v812_v39 = vmul.f32 %v804_v23, %v798_v37 }
  0xd8   : > { %1040 = vmatpush.msra.mxu3 %v811_v38  ;;  %1098 = vmatpush.msrb.mxu1 %v812_v39  ;;  %v513_v39 = vld [vmem:[%s6423_s11] sm:$0x3] }
  0xdc   : > { %v592_v41 = vpop.permute.xlu0 %591  ;;  %v778_v42 = vpop.permute.xlu1 %777 }
  0xdd   : > { %v604_v43 = vsel %vm599_vm2, %v592_v41, %v584_v14  ;;  %v600_v44 = vsel %vm599_vm2, %v584_v14, %v592_v41  ;;  %v793_v45 = vsel %vm791_vm3, %v778_v42, %v786_v5  ;;  %v797_v46 = vsel %vm791_vm3, %v786_v5, %v778_v42  ;;  %v538_v58 = vpop.permute.xlu2 %537  ;;  %v3671_v14 = vld [vmem:[%s6423_s11 + $0xa] sm:$0x3] }
  0xde   : > { %v615_v47 = vmul.f32 %v4417_v63, %v604_v43  ;;  %v616_v48 = vmul.f32 %v4419_v0, %v600_v44  ;;  %v809_v49 = vmul.f32 %v803_v6, %v793_v45  ;;  %v810_v50 = vmul.f32 %v804_v23, %v797_v46  ;;  %v479_v5 = vld [vmem:[%s6414_s2 + $0x8] sm:$0xff] }
  0xdf   : > { %v4514_v17 = vperm.slane %v3671_v14, 0  ;;  %v4516_v18 = vperm.slane %v3671_v14, 1  ;;  %3675 = vmatmul.msk.f32.gmra.mxu0 %vm6444_vm5, %v479_v5  ;;  %3679 = vmatmul.msk.f32.gmra.mxu1 %vm6444_vm5, %v479_v5  ;;  %v4561_v41 = vperm.slane %v513_v39, 0  ;;  %v4563_v42 = vperm.slane %v513_v39, 1 }
  0xe0   : > { %1013 = vmatpush.msra.mxu2 %v615_v47  ;;  %1071 = vmatpush.msrb.mxu0 %v616_v48 }
  0xe1   : > { %1041 = vmatpush.msra.mxu3 %v809_v49  ;;  %1099 = vmatpush.msrb.mxu1 %v810_v50 }
  0xe4   : > { %v542_v54 = vpop.permute.xlu0 %541  ;;  %v550_v55 = vpop.permute.xlu1 %549 }
  0xe5   : > { %v559_v56 = vsel %vm551_vm4, %v550_v55, %v542_v54  ;;  %v555_v57 = vsel %vm551_vm4, %v542_v54, %v550_v55  ;;  %v740_v15 = vpop.permute.xlu2 %739 }
  0xe6   : > { %v573_v59 = vmul.f32 %v4487_v52, %v559_v56  ;;  %v574_v60 = vmul.f32 %v4489_v53, %v555_v57 }
  0xe7   : > { %3676 = vmatmul.msk.f32.gmra.mxu0 %vm6444_vm5, %v480_v31  ;;  %3680 = vmatmul.msk.f32.gmra.mxu1 %vm6444_vm5, %v480_v31 }
  0xe8   : > { %1014 = vmatpush.msra.mxu2 %v573_v59  ;;  %1072 = vmatpush.msrb.mxu0 %v574_v60 }
  0xec   : > { %v784_v61 = vpop.permute.xlu0 %783  ;;  %v540_v62 = vpop.permute.xlu1 %539 }
  0xed   : > { %v792_v63 = vsel %vm791_vm3, %v776_v33, %v784_v61  ;;  %v796_v0 = vsel %vm791_vm3, %v784_v61, %v776_v33  ;;  %v558_v1 = vsel %vm551_vm4, %v548_v40, %v540_v62  ;;  %v554_v2 = vsel %vm551_vm4, %v540_v62, %v548_v40  ;;  %v730_v4 = vpop.permute.xlu2 %729  ;;  %v481_v40 = vld [vmem:[%s6414_s2 + $0x18] sm:$0xff]  ;;  %v3670_v61 = vld [vmem:[%s6423_s11 + $0x8] sm:$0x3] }
  0xee   : > { %v807_v8 = vmul.f32 %v803_v6, %v792_v63  ;;  %v808_v3 = vmul.f32 %v804_v23, %v796_v0  ;;  %v571_v9 = vmul.f32 %v4487_v52, %v558_v1  ;;  %v572_v11 = vmul.f32 %v4489_v53, %v554_v2  ;;  %v485_v1 = vld [vmem:[%s6415_s3 + $0x18] sm:$0xff] }
  0xef   : > { %3677 = vmatmul.msk.f32.gmra.mxu0 %vm6444_vm5, %v481_v40  ;;  %3681 = vmatmul.msk.f32.gmra.mxu1 %vm6444_vm5, %v481_v40  ;;  %v4589_v62 = vperm.slane %v3670_v61, 0  ;;  %v4591_v63 = vperm.slane %v3670_v61, 1  ;;  %v472_v40 = vld [vmem:[#allocation3 + $0x10] sm:$0xff] }
  0xf0   : > { %1042 = vmatpush.msra.mxu3 %v807_v8  ;;  %1100 = vmatpush.msrb.mxu1 %v808_v3 }
  0xf1   : > { %1015 = vmatpush.msra.mxu2 %v571_v9  ;;  %1073 = vmatpush.msrb.mxu0 %v572_v11  ;;  %v4065_v9 = vmov 0  }
  0xf2   : > { %3876 = vset.pattern.permute.xlu1 %v4065_v9  ;;  %3878 = vset.pattern.permute.xlu0 %v4065_v9 }
  0xf3   : > { %1139 = vperm.xlu1 %3876, %v485_v1   ;;  %3877 = vset.pattern.permute.xlu2 %v4065_v9 }
  0xf4   : > { %v734_v19 = vpop.permute.xlu0 %733  ;;  %v742_v20 = vpop.permute.xlu1 %741 }
  0xf5   : > { %v747_v12 = vsel %vm6443_vm6, %v734_v19, %v742_v20  ;;  %v751_v13 = vsel %vm6443_vm6, %v742_v20, %v734_v19  ;;  %v501_v32 = vpop.permute.xlu2 %500  ;;  %v482_v20 = vld [vmem:[%s6415_s3] sm:$0xff] }
  0xf6   : > { %v765_v21 = vmul.f32 %v4514_v17, %v747_v12  ;;  %v766_v22 = vmul.f32 %v4516_v18, %v751_v13 }
  0xf8   : > { %1043 = vmatpush.msra.mxu3 %v765_v21  ;;  %1101 = vmatpush.msrb.mxu1 %v766_v22 }
  0xfb   : > { %1124 = vperm.xlu1 %3876, %v482_v20  }
  0xfc   : > { %v546_v6 = vpop.permute.xlu0 %545  ;;  %v732_v23 = vpop.permute.xlu1 %731 }
  0xfd   : > { %v557_v24 = vsel %vm551_vm4, %v546_v6, %v538_v58  ;;  %v553_v25 = vsel %vm551_vm4, %v538_v58, %v546_v6  ;;  %v746_v26 = vsel %vm6443_vm6, %v732_v23, %v740_v15  ;;  %v750_v27 = vsel %vm6443_vm6, %v740_v15, %v732_v23 }
  0xfe   : > { %v569_v28 = vmul.f32 %v4487_v52, %v557_v24  ;;  %v570_v7 = vmul.f32 %v4489_v53, %v553_v25  ;;  %v763_v29 = vmul.f32 %v4514_v17, %v746_v26  ;;  %v764_v30 = vmul.f32 %v4516_v18, %v750_v27  ;;  %v491_v47 = vpop.permute.xlu2 %490 }
 0x100   : > { %1016 = vmatpush.msra.mxu2 %v569_v28  ;;  %1074 = vmatpush.msrb.mxu0 %v570_v7 }
 0x101   : > { %1044 = vmatpush.msra.mxu3 %v763_v29  ;;  %1102 = vmatpush.msrb.mxu1 %v764_v30 }
 0x104   : > { %v536_v33 = vpop.permute.xlu0 %535  ;;  %v544_v34 = vpop.permute.xlu1 %543 }
 0x105   : > { %v556_v35 = vsel %vm551_vm4, %v544_v34, %v536_v33  ;;  %v552_v36 = vsel %vm551_vm4, %v536_v33, %v544_v34  ;;  %v483_v33 = vld [vmem:[%s6415_s3 + $0x8] sm:$0xff] }
 0x106   : > { %v567_v37 = vmul.f32 %v4487_v52, %v556_v35  ;;  %v568_v38 = vmul.f32 %v4489_v53, %v552_v36  ;;  %v694_v60 = vpop.permute.xlu2 %693  ;;  %1129 = vperm.xlu0 %3878, %v483_v33  }
 0x108   : > { %1017 = vmatpush.msra.mxu2 %v567_v37  ;;  %1075 = vmatpush.msrb.mxu0 %v568_v38 }
 0x10c   : > { %v738_v43 = vpop.permute.xlu0 %737  ;;  %v493_v44 = vpop.permute.xlu1 %492 }
 0x10d   : > { %v745_v45 = vsel %vm6443_vm6, %v730_v4, %v738_v43  ;;  %v749_v46 = vsel %vm6443_vm6, %v738_v43, %v730_v4  ;;  %v512_v48 = vsel %vm6442_vm7, %v501_v32, %v493_v44  ;;  %v508_v49 = vsel %vm6442_vm7, %v493_v44, %v501_v32  ;;  %v470_v32 = vld [vmem:[#allocation3] sm:$0xff] }
 0x10e   : > { %v761_v50 = vmul.f32 %v4514_v17, %v745_v45  ;;  %v762_v51 = vmul.f32 %v4516_v18, %v749_v46  ;;  %v525_v52 = vmul.f32 %v4561_v41, %v512_v48  ;;  %v526_v53 = vmul.f32 %v4563_v42, %v508_v49  ;;  %v684_v19 = vpop.permute.xlu2 %683  ;;  %v471_v48 = vld [vmem:[#allocation3 + $0x8] sm:$0xff]  ;;  %v474_v49 = vld [vmem:[#allocation3 + $0x20] sm:$0xff] }
 0x110   : > { %1045 = vmatpush.msra.mxu3 %v761_v50  ;;  %1103 = vmatpush.msrb.mxu1 %v762_v51  ;;  %v473_v50 = vld [vmem:[#allocation3 + $0x18] sm:$0xff]  ;;  %v476_v51 = vld [vmem:[#allocation3 + $0x30] sm:$0xff] }
 0x111   : > { %1018 = vmatpush.msra.mxu2 %v525_v52  ;;  %1076 = vmatpush.msrb.mxu0 %v526_v53  ;;  %v475_v52 = vld [vmem:[#allocation3 + $0x28] sm:$0xff]  ;;  %v477_v53 = vld [vmem:[#allocation3 + $0x38] sm:$0xff] }
 0x114   : > { %v728_v54 = vpop.permute.xlu0 %727 }
 0x115   : > { %v736_v55 = vpop.permute.xlu1 %735 }
 0x116   : > { %v744_v56 = vsel %vm6443_vm6, %v728_v54, %v736_v55  ;;  %v748_v57 = vsel %vm6443_vm6, %v736_v55, %v728_v54  ;;  %v495_v6 = vpop.permute.xlu2 %494 }
 0x117   : > { %v759_v58 = vmul.f32 %v4514_v17, %v744_v56  ;;  %v760_v59 = vmul.f32 %v4516_v18, %v748_v57 }
 0x119   : > { %1046 = vmatpush.msra.mxu3 %v759_v58  ;;  %1104 = vmatpush.msrb.mxu1 %v760_v59 }
 0x11c   : > { %v499_v0 = vpop.permute.xlu0 %498 }
 0x11d   : > { %v686_v2 = vpop.permute.xlu1 %685  ;;  %v511_v8 = vsel %vm6442_vm7, %v499_v0, %v491_v47  ;;  %v507_v3 = vsel %vm6442_vm7, %v491_v47, %v499_v0 }
 0x11e   : > { %v523_v11 = vmul.f32 %v4561_v41, %v511_v8  ;;  %v524_v14 = vmul.f32 %v4563_v42, %v507_v3  ;;  %v699_v15 = vsel %vm6441_vm8, %v686_v2, %v694_v60  ;;  %v703_v16 = vsel %vm6441_vm8, %v694_v60, %v686_v2 }
 0x11f   : > { %v717_v17 = vmul.f32 %v4589_v62, %v699_v15  ;;  %v718_v18 = vmul.f32 %v4591_v63, %v703_v16 }
 0x120   : > { %1019 = vmatpush.msra.mxu2 %v523_v11  ;;  %1077 = vmatpush.msrb.mxu0 %v524_v14 }
 0x121   : > { %1047 = vmatpush.msra.mxu3 %v717_v17  ;;  %1105 = vmatpush.msrb.mxu1 %v718_v18 }
 0x124   : > { %v489_v12 = vpop.permute.xlu0 %488 }
 0x125   : > { %v497_v13 = vpop.permute.xlu1 %496 }
 0x126   : > { %v510_v21 = vsel %vm6442_vm7, %v497_v13, %v489_v12  ;;  %v506_v22 = vsel %vm6442_vm7, %v489_v12, %v497_v13 }
 0x127   : > { %v521_v4 = vmul.f32 %v4561_v41, %v510_v21  ;;  %v522_v5 = vmul.f32 %v4563_v42, %v506_v22 }
 0x129   : > { %1020 = vmatpush.msra.mxu2 %v521_v4  ;;  %1078 = vmatpush.msrb.mxu0 %v522_v5 }
 0x12c   : > { %v692_v23 = vpop.permute.xlu0 %691 }
 0x12d   : > { %v487_v24 = vpop.permute.xlu1 %486  ;;  %v698_v25 = vsel %vm6441_vm8, %v684_v19, %v692_v23  ;;  %v702_v26 = vsel %vm6441_vm8, %v692_v23, %v684_v19 }
 0x12e   : > { %v509_v27 = vsel %vm6442_vm7, %v495_v6, %v487_v24  ;;  %v715_v28 = vmul.f32 %v4589_v62, %v698_v25  ;;  %v505_v7 = vsel %vm6442_vm7, %v487_v24, %v495_v6  ;;  %v716_v29 = vmul.f32 %v4591_v63, %v702_v26 }
 0x12f   : > { %v519_v30 = vmul.f32 %v4561_v41, %v509_v27  ;;  %v520_v31 = vmul.f32 %v4563_v42, %v505_v7  ;;  %v484_v41 = vld [vmem:[%s6415_s3 + $0x10] sm:$0xff]  ;;  %v680_v42 = vpop.permute.xlu2 %679 }
 0x130   : > { %1048 = vmatpush.msra.mxu3 %v715_v28  ;;  %1106 = vmatpush.msrb.mxu1 %v716_v29 }
 0x131   : > { %1021 = vmatpush.msra.mxu2 %v519_v30  ;;  %1079 = vmatpush.msrb.mxu0 %v520_v31 }
 0x132   : > { %1022 = vmatmul.f32.vlgmr.msra.gmra.mxu2 %v470_v32  ;;  %1080 = vmatmul.f32.vlgmr.msrb.gmra.mxu0 %v470_v32 }
 0x133   : > { %1134 = vperm.xlu2 %3877, %v484_v41  }
 0x134   : > { %v682_v34 = vpop.permute.xlu0 %681 }
 0x135   : > { %v690_v35 = vpop.permute.xlu1 %689 }
 0x136   : > { %v697_v36 = vsel %vm6441_vm8, %v682_v34, %v690_v35  ;;  %v701_v37 = vsel %vm6441_vm8, %v690_v35, %v682_v34 }
 0x137   : > { %v713_v38 = vmul.f32 %v4589_v62, %v697_v36  ;;  %v714_v39 = vmul.f32 %v4591_v63, %v701_v37 }
 0x139   : > { %1049 = vmatpush.msra.mxu3 %v713_v38  ;;  %1107 = vmatpush.msrb.mxu1 %v714_v39 }
 0x13a   : > { %1025 = vmatmul.f32.gmra.mxu2 %v472_v40  ;;  %1083 = vmatmul.f32.gmra.mxu0 %v472_v40 }
 0x13c   : > { %v688_v43 = vpop.permute.xlu0 %687 }
 0x13d   : > { %v696_v44 = vsel %vm6441_vm8, %v680_v42, %v688_v43  ;;  %v700_v45 = vsel %vm6441_vm8, %v688_v43, %v680_v42 }
 0x13e   : > { %v711_v46 = vmul.f32 %v4589_v62, %v696_v44  ;;  %v712_v47 = vmul.f32 %v4591_v63, %v700_v45 }
 0x13f   : > { %v965_v54 = vpop.f32.mrf.mxu0 }
 0x140   : > { %1050 = vmatpush.msra.mxu3 %v711_v46  ;;  %1108 = vmatpush.msrb.mxu1 %v712_v47  ;;  %v994_v56 = vpop.f32.mrf.mxu1 }
 0x141   : > { %1051 = vmatmul.f32.vlgmr.msra.gmra.mxu3 %v471_v48  ;;  %1109 = vmatmul.f32.vlgmr.msrb.gmra.mxu1 %v471_v48 }
 0x142   : > { %1028 = vmatmul.f32.gmra.mxu2 %v474_v49  ;;  %1086 = vmatmul.f32.gmra.mxu0 %v474_v49 }
 0x149   : > { %1054 = vmatmul.f32.gmra.mxu3 %v473_v50  ;;  %1112 = vmatmul.f32.gmra.mxu1 %v473_v50 }
 0x14a   : > { %1031 = vmatmul.f32.gmra.mxu2 %v476_v51  ;;  %1089 = vmatmul.f32.gmra.mxu0 %v476_v51 }
 0x151   : > { %1057 = vmatmul.f32.gmra.mxu3 %v475_v52  ;;  %1115 = vmatmul.f32.gmra.mxu1 %v475_v52 }
 0x159   : > { %1060 = vmatmul.f32.gmra.mxu3 %v477_v53  ;;  %1118 = vmatmul.f32.gmra.mxu1 %v477_v53 }
 0x15c   : > { %v968_v55 = vpop.f32.mrf.mxu0  ;;  %v997_v58 = vpop.f32.mrf.mxu1 }
 0x164   : > { %v971_v57 = vpop.f32.mrf.mxu0  ;;  %v1000_v60 = vpop.f32.mrf.mxu1 }
 0x165   : > { %v1140_v63 = vpop.permute.xlu1 %1139 }
 0x16c   : > { %v974_v59 = vpop.f32.mrf.mxu0  ;;  %v1003_v62 = vpop.f32.mrf.mxu1 }
 0x16d   : > { %v1125_v9 = vpop.permute.xlu1 %1124 }
 0x178   : > { %v1130_v30 = vpop.permute.xlu0 %1129 }
 0x18d   : > { %v1135_v27 = vpop.permute.xlu2 %1134 }
 0x1af   : > { %v1081_v61 = vpop.f32.mrf.mxu0 }
 0x1b0   : > { %v1082_v1 = vadd.f32 %v1081_v61, %v994_v56 }
 0x1b5   : > { %v1023_v0 = vpop.f32.mrf.mxu2 }
 0x1b6   : > { %v1024_v19 = vadd.f32 %v1023_v0, %v965_v54 }
 0x1b7   : > { %v1084_v2 = vpop.f32.mrf.mxu0 }
 0x1b8   : > { %v1085_v24 = vadd.f32 %v1084_v2, %v997_v58 }
 0x1bd   : > { %v1026_v15 = vpop.f32.mrf.mxu2 }
 0x1be   : > { %v1110_v8 = vpop.f32.mrf.mxu1  ;;  %v1027_v35 = vadd.f32 %v1026_v15, %v968_v55 }
 0x1bf   : > { %v1111_v3 = vadd.f32 %v1110_v8, %v1082_v1  ;;  %v1087_v18 = vpop.f32.mrf.mxu0 }
 0x1c0   : > { %v1088_v5 = vadd.f32 %v1087_v18, %v1000_v60 }
 0x1c1   : > { %v1143_v11 = vadd.f32 %v1125_v9, %v1111_v3 }
 0x1c3   : > { %v4647_v14 = vmax.f32 %v1143_v11, 0.0 }
 0x1c4   : > { %v1052_v16 = vpop.f32.mrf.mxu3 }
 0x1c5   : > { %1228 = vrot.lane.b32.xlu1 %v4647_v14, %s6434_s28  ;;  %1274 = vrot.lane.b32.xlu0 %v4647_v14, %s6438_s20  ;;  %v1053_v20 = vadd.f32 %v1052_v16, %v1024_v19  ;;  %v1029_v13 = vpop.f32.mrf.mxu2  ;;  %v1170_v19 = vld [vmem:[%s6418_s6] sm:$0xff] }
 0x1c6   : > { %1320 = vrot.lane.b32.xlu2 %v4647_v14, %s6447_s18  ;;  %v1113_v17 = vpop.f32.mrf.mxu1  ;;  %v1030_v32 = vadd.f32 %v1029_v13, %v971_v57 }
 0x1c7   : > { %v1142_v22 = vadd.f32 %v1125_v9, %v1053_v20  ;;  %v1090_v4 = vpop.f32.mrf.mxu0  ;;  %v1114_v7 = vadd.f32 %v1113_v17, %v1085_v24  ;;  %v1172_v20 = vld [vmem:[%s6418_s6 + $0x10] sm:$0xff] }
 0x1c8   : > { %v1091_v25 = vadd.f32 %v1090_v4, %v1003_v62 }
 0x1c9   : > { %v4661_v6 = vmax.f32 %v1142_v22, 0.0  ;;  %v1145_v36 = vadd.f32 %v1130_v30, %v1114_v7  ;;  %v1171_v22 = vld [vmem:[%s6418_s6 + $0x8] sm:$0xff] }
 0x1cb   : > { %v4680_v44 = vmax.f32 %v1145_v36, 0.0  ;;  %v3684_v36 = vld [vmem:[%s6423_s11 + $0x6] sm:$0x3] }
 0x1cc   : > { %v1055_v12 = vpop.f32.mrf.mxu3 }
 0x1cd   : > { %1412 = vrot.lane.b32.xlu1 %v4647_v14, %s6430_s27  ;;  %1458 = vrot.lane.b32.xlu0 %v4647_v14, %s6436_s26  ;;  %v1032_v31 = vpop.f32.mrf.mxu2  ;;  %v1056_v41 = vadd.f32 %v1055_v12, %v1027_v35  ;;  %v1167_v35 = vld [vmem:[%s6417_s5 + $0x8] sm:$0xff] }
 0x1ce   : > { %1504 = vrot.lane.b32.xlu2 %v4647_v14, %s6445_s19  ;;  %v1116_v21 = vpop.f32.mrf.mxu1  ;;  %v1033_v37 = vadd.f32 %v1032_v31, %v974_v59  ;;  %v1166_v31 = vld [vmem:[%s6417_s5] sm:$0xff] }
 0x1cf   : > { %v1117_v26 = vadd.f32 %v1116_v21, %v1088_v5  ;;  %v1144_v47 = vadd.f32 %v1130_v30, %v1056_v41  ;;  %v1173_v21 = vld [vmem:[%s6418_s6 + $0x18] sm:$0xff] }
 0x1d1   : > { %v1147_v33 = vadd.f32 %v1135_v27, %v1117_v26  ;;  %v4690_v50 = vmax.f32 %v1144_v47, 0.0 }
 0x1d3   : > { %v4671_v42 = vmax.f32 %v1147_v33, 0.0 }
 0x1d4   : > { %v1058_v23 = vpop.f32.mrf.mxu3 }
 0x1d5   : > { %1312 = vrot.lane.b32.xlu1 %v4661_v6, %s6447_s18  ;;  %1220 = vrot.lane.b32.xlu0 %v4661_v6, %s6434_s28  ;;  %v1059_v38 = vadd.f32 %v1058_v23, %v1030_v32 }
 0x1d6   : > { %1266 = vrot.lane.b32.xlu2 %v4661_v6, %s6438_s20  ;;  %v1119_v28 = vpop.f32.mrf.mxu1 }
 0x1d7   : > { %v1120_v29 = vadd.f32 %v1119_v28, %v1091_v25  ;;  %v1146_v45 = vadd.f32 %v1135_v27, %v1059_v38 }
 0x1d9   : > { %v1149_v34 = vadd.f32 %v1140_v63, %v1120_v29  ;;  %v4686_v49 = vmax.f32 %v1146_v45, 0.0 }
 0x1db   : > { %v4669_v39 = vmax.f32 %v1149_v34, 0.0 }
 0x1dc   : > { %v1061_v40 = vpop.f32.mrf.mxu3 }
 0x1dd   : > { %v1062_v43 = vadd.f32 %v1061_v40, %v1033_v37  ;;  %1659 = vmatpush.msrb.mxu3 %v4669_v39  ;;  %1496 = vrot.lane.b32.xlu1 %v4661_v6, %s6445_s19  ;;  %v1339_v40 = vperm.slane %v3684_v36, 1 }
 0x1de   : > { %1404 = vrot.lane.b32.xlu0 %v4661_v6, %s6430_s27  ;;  %1450 = vrot.lane.b32.xlu2 %v4661_v6, %s6436_s26 }
 0x1df   : > { %v1148_v46 = vadd.f32 %v1140_v63, %v1062_v43  ;;  %1660 = vmatpush.msrb.mxu3 %v4671_v42 }
 0x1e1   : > { %v4683_v48 = vmax.f32 %v1148_v46, 0.0  ;;  %1661 = vmatpush.msrb.mxu3 %v4680_v44 }
 0x1e3   : > { %1630 = vmatpush.msrb.mxu2 %v4683_v48  ;;  %1662 = vmatpush.msrb.mxu3 %v4647_v14 }
 0x1e4   : > { %3693 = vmatmul.msk.f32.vlgmr.msrb.gmra.mxu3 %vm6444_vm5, %v1166_v31 }
 0x1e5   : > { %1322 = vrot.lane.b32.xlu1 %v4680_v44, %s6447_s18  ;;  %1631 = vmatpush.msrb.mxu2 %v4686_v49 }
 0x1e6   : > { %1230 = vrot.lane.b32.xlu0 %v4680_v44, %s6434_s28  ;;  %1276 = vrot.lane.b32.xlu2 %v4680_v44, %s6438_s20 }
 0x1e7   : > { %1632 = vmatpush.msrb.mxu2 %v4690_v50 }
 0x1e9   : > { %1633 = vmatpush.msrb.mxu2 %v4661_v6 }
 0x1ea   : > { %3689 = vmatmul.msk.f32.vlgmr.msrb.gmra.mxu2 %vm6444_vm5, %v1166_v31 }
 0x1ec   : > { %3694 = vmatmul.msk.f32.gmra.mxu3 %vm6444_vm5, %v1167_v35 }
 0x1ed   : > { %1506 = vrot.lane.b32.xlu1 %v4680_v44, %s6445_s19 }
 0x1ee   : > { %1414 = vrot.lane.b32.xlu0 %v4680_v44, %s6430_s27  ;;  %1460 = vrot.lane.b32.xlu2 %v4680_v44, %s6436_s26 }
 0x1f2   : > { %3690 = vmatmul.msk.f32.gmra.mxu2 %vm6444_vm5, %v1167_v35 }
 0x1f5   : > { %1184 = vrot.lane.b32.xlu1 %v4680_v44, %s6432_s15 }
 0x1f6   : > { %1314 = vrot.lane.b32.xlu0 %v4690_v50, %s6447_s18  ;;  %1222 = vrot.lane.b32.xlu2 %v4690_v50, %s6434_s28 }
 0x1fd   : > { %1268 = vrot.lane.b32.xlu1 %v4690_v50, %s6438_s20 }
 0x1fe   : > { %1498 = vrot.lane.b32.xlu0 %v4690_v50, %s6445_s19  ;;  %1406 = vrot.lane.b32.xlu2 %v4690_v50, %s6430_s27 }
 0x205   : > { %1452 = vrot.lane.b32.xlu1 %v4690_v50, %s6436_s26 }
 0x206   : > { %1176 = vrot.lane.b32.xlu0 %v4690_v50, %s6432_s15  ;;  %1232 = vrot.lane.b32.xlu2 %v4671_v42, %s6434_s28 }
 0x20d   : > { %1278 = vrot.lane.b32.xlu1 %v4671_v42, %s6438_s20 }
 0x20e   : > { %1324 = vrot.lane.b32.xlu0 %v4671_v42, %s6447_s18  ;;  %1416 = vrot.lane.b32.xlu2 %v4671_v42, %s6430_s27 }
 0x215   : > { %1462 = vrot.lane.b32.xlu1 %v4671_v42, %s6436_s26 }
 0x216   : > { %1508 = vrot.lane.b32.xlu0 %v4671_v42, %s6445_s19  ;;  %1316 = vrot.lane.b32.xlu2 %v4686_v49, %s6447_s18 }
 0x21d   : > { %1224 = vrot.lane.b32.xlu1 %v4686_v49, %s6434_s28 }
 0x21e   : > { %1186 = vrot.lane.b32.xlu0 %v4671_v42, %s6432_s15  ;;  %1500 = vrot.lane.b32.xlu2 %v4686_v49, %s6445_s19 }
 0x220   : > { %v4743_v51 = vpop.permute.xlu2 %1320 }
 0x225   : > { %1408 = vrot.lane.b32.xlu1 %v4686_v49, %s6430_s27 }
 0x226   : > { %1270 = vrot.lane.b32.xlu0 %v4686_v49, %s6438_s20  ;;  %1178 = vrot.lane.b32.xlu2 %v4686_v49, %s6432_s15 }
 0x228   : > { %v4751_v52 = vpop.permute.xlu2 %1504 }
 0x22d   : > { %1326 = vrot.lane.b32.xlu1 %v4669_v39, %s6447_s18 }
 0x22e   : > { %1454 = vrot.lane.b32.xlu0 %v4686_v49, %s6436_s26  ;;  %1510 = vrot.lane.b32.xlu2 %v4669_v39, %s6445_s19 }
 0x230   : > { %v4759_v53 = vpop.permute.xlu2 %1266 }
 0x235   : > { %1234 = vrot.lane.b32.xlu1 %v4669_v39, %s6434_s28 }
 0x236   : > { %1280 = vrot.lane.b32.xlu0 %v4669_v39, %s6438_s20  ;;  %1188 = vrot.lane.b32.xlu2 %v4669_v39, %s6432_s15 }
 0x237   : > { %v4767_v54 = vpop.permute.xlu1 %1228  ;;  %v4769_v55 = vpop.permute.xlu0 %1274 }
 0x238   : > { %v4771_v56 = vpop.permute.xlu2 %1450 }
 0x23d   : > { %1418 = vrot.lane.b32.xlu1 %v4669_v39, %s6430_s27 }
 0x23e   : > { %1464 = vrot.lane.b32.xlu0 %v4669_v39, %s6436_s26  ;;  %1372 = vrot.lane.b32.xlu2 %v4669_v39, %s6465_s23  ;;  %v1338_v39 = vperm.slane %v3684_v36, 0 }
 0x23f   : > { %v4779_v57 = vpop.permute.xlu1 %1412  ;;  %v4781_v58 = vpop.permute.xlu0 %1458 }
 0x240   : > { %v4783_v59 = vpop.permute.xlu2 %1276 }
 0x245   : > { %1502 = vrot.lane.b32.xlu1 %v4683_v48, %s6445_s19 }
 0x246   : > { %1226 = vrot.lane.b32.xlu0 %v4683_v48, %s6434_s28  ;;  %1318 = vrot.lane.b32.xlu2 %v4683_v48, %s6447_s18  ;;  %s3770_s28 = sshll.u32 %s4154_s25, 6 }
 0x247   : > { %v4791_v60 = vpop.permute.xlu1 %1312  ;;  %v4793_v61 = vpop.permute.xlu0 %1220 }
 0x248   : > { %v4795_v62 = vpop.permute.xlu2 %1460 }
 0x24d   : > { %1180 = vrot.lane.b32.xlu1 %v4683_v48, %s6432_s15 }
 0x24e   : > { %1410 = vrot.lane.b32.xlu0 %v4683_v48, %s6430_s27  ;;  %1272 = vrot.lane.b32.xlu2 %v4683_v48, %s6438_s20  ;;  %s6476_s20 = smov 112   ;;  %s6510_s27 = smov 1  }
 0x24f   : > { %v4803_v63 = vpop.permute.xlu1 %1496 }
 0x250   : > { %v4805_v0 = vpop.permute.xlu0 %1404  ;;  %v4807_v1 = vpop.permute.xlu2 %1222 }
 0x255   : > { %1364 = vrot.lane.b32.xlu1 %v4683_v48, %s6465_s23 }
 0x256   : > { %1370 = vrot.lane.b32.xlu0 %v4671_v42, %s6465_s23  ;;  %1456 = vrot.lane.b32.xlu2 %v4683_v48, %s6436_s26  ;;  %s6477_s26 = smov 16  }
 0x257   : > { %v1323_v2 = vpop.permute.xlu1 %1322 }
 0x258   : > { %v4815_v8 = vpop.permute.xlu0 %1230  ;;  %v4817_v3 = vpop.permute.xlu2 %1406 }
 0x25d   : > { %1174 = vrot.lane.b32.xlu1 %v4661_v6, %s6432_s15 }
 0x25e   : > { %1360 = vrot.lane.b32.xlu0 %v4690_v50, %s6465_s23  ;;  %1362 = vrot.lane.b32.xlu2 %v4686_v49, %s6465_s23 }
 0x25f   : > { %v4825_v9 = vpop.permute.xlu1 %1506 }
 0x260   : > { %v4827_v11 = vpop.permute.xlu0 %1414  ;;  %v4829_v15 = vpop.permute.xlu2 %1232 }
 0x265   : > { %1368 = vrot.lane.b32.xlu1 %v4680_v44, %s6465_s23 }
 0x266   : > { %1366 = vrot.lane.b32.xlu0 %v4647_v14, %s6465_s23  ;;  %1182 = vrot.lane.b32.xlu2 %v4647_v14, %s6432_s15  ;;  %s6511_s15 = smov 111  }
 0x267   : > { %v4837_v16 = vpop.permute.xlu1 %1184 }
 0x268   : > { %v1315_v17 = vpop.permute.xlu0 %1314  ;;  %v4839_v18 = vpop.permute.xlu2 %1416 }
 0x269   : > { %v1329_v48 = vsel %vm647_vm1, %v1315_v17, %v1323_v2  ;;  %v1333_v49 = vsel %vm647_vm1, %v1323_v2, %v1315_v17  ;;  %v3683_v2 = vld [vmem:[%s6423_s11 + $0x4] sm:$0x3] }
 0x26a   : > { %v1344_v17 = vmul.f32 %v1338_v39, %v1333_v49  ;;  %v1286_v49 = vsel %vm599_vm2, %v4769_v55, %v4759_v53 }
 0x26d   : > { %1794 = vperm.xlu1 %3876, %v1170_v19  }
 0x26e   : > { %1804 = vperm.xlu0 %3878, %v1172_v20   ;;  %1358 = vrot.lane.b32.xlu2 %v4661_v6, %s6465_s23  ;;  %v1168_v20 = vld [vmem:[%s6417_s5 + $0x10] sm:$0xff] }
 0x26f   : > { %v4849_v12 = vpop.permute.xlu1 %1268  ;;  %3691 = vmatmul.msk.f32.gmra.mxu2 %vm6444_vm5, %v1168_v20  ;;  %3695 = vmatmul.msk.f32.gmra.mxu3 %vm6444_vm5, %v1168_v20  ;;  %v3682_v20 = vld [vmem:[%s6423_s11 + $0x2] sm:$0x3] }
 0x270   : > { %v4851_v14 = vpop.permute.xlu0 %1498  ;;  %v1317_v13 = vpop.permute.xlu2 %1316 }
 0x275   : > { %1809 = vperm.xlu1 %3876, %v1173_v21   ;;  %v1332_v21 = vsel %vm647_vm1, %v4743_v51, %v4791_v60 }
 0x276   : > { %1799 = vperm.xlu2 %3877, %v1171_v22   ;;  %v1345_v22 = vmul.f32 %v1339_v40, %v1329_v48  ;;  %v1342_v36 = vmul.f32 %v1338_v39, %v1332_v21  ;;  %v1282_v48 = vsel %vm599_vm2, %v4759_v53, %v4769_v55 }
 0x277   : > { %v4859_v4 = vpop.permute.xlu1 %1452 }
 0x278   : > { %v4861_v5 = vpop.permute.xlu0 %1176  ;;  %v4863_v6 = vpop.permute.xlu2 %1500 }
 0x27f   : > { %v1279_v23 = vpop.permute.xlu1 %1278 }
 0x280   : > { %v1325_v24 = vpop.permute.xlu0 %1324  ;;  %v4865_v25 = vpop.permute.xlu2 %1178 }
 0x281   : > { %v1330_v42 = vsel %vm647_vm1, %v1317_v13, %v1325_v24  ;;  %v1334_v43 = vsel %vm647_vm1, %v1325_v24, %v1317_v13  ;;  %v1328_v13 = vsel %vm647_vm1, %v4791_v60, %v4743_v51  ;;  %v1292_v60 = vperm.slane %v3683_v2, 0 }
 0x282   : > { %v1346_v50 = vmul.f32 %v1338_v39, %v1334_v43  ;;  %v1347_v19 = vmul.f32 %v1339_v40, %v1330_v42  ;;  %v1343_v51 = vmul.f32 %v1339_v40, %v1328_v13 }
 0x283   : > { %v1296_v53 = vmul.f32 %v1292_v60, %v1286_v49 }
 0x287   : > { %v4867_v26 = vpop.permute.xlu1 %1462 }
 0x288   : > { %v4869_v27 = vpop.permute.xlu0 %1508  ;;  %v4871_v28 = vpop.permute.xlu2 %1510 }
 0x28f   : > { %v4873_v7 = vpop.permute.xlu1 %1224 }
 0x290   : > { %v4875_v29 = vpop.permute.xlu0 %1186  ;;  %v4877_v30 = vpop.permute.xlu2 %1188 }
 0x297   : > { %v4884_v32 = vpop.permute.xlu1 %1408 }
 0x298   : > { %v1271_v33 = vpop.permute.xlu0 %1270  ;;  %v4886_v34 = vpop.permute.xlu2 %1372 }
 0x299   : > { %v1288_v42 = vsel %vm599_vm2, %v1279_v23, %v1271_v33 }
 0x29f   : > { %v1327_v37 = vpop.permute.xlu1 %1326 }
 0x2a0   : > { %v4896_v38 = vpop.permute.xlu0 %1454  ;;  %v1319_v41 = vpop.permute.xlu2 %1318 }
 0x2a1   : > { %v1331_v44 = vsel %vm647_vm1, %v1319_v41, %v1327_v37  ;;  %v1335_v45 = vsel %vm647_vm1, %v1327_v37, %v1319_v41  ;;  %v1293_v37 = vperm.slane %v3683_v2, 1  ;;  %v1284_v41 = vsel %vm599_vm2, %v1271_v33, %v1279_v23  ;;  %v1169_v33 = vld [vmem:[%s6417_s5 + $0x18] sm:$0xff] }
 0x2a2   : > { %v1348_v46 = vmul.f32 %v1338_v39, %v1335_v45  ;;  %v1349_v47 = vmul.f32 %v1339_v40, %v1331_v44  ;;  %v1283_v39 = vsel %vm599_vm2, %v4849_v12, %v4783_v59  ;;  %v1287_v23 = vsel %vm599_vm2, %v4783_v59, %v4849_v12  ;;  %3692 = vmatmul.msk.f32.gmra.mxu2 %vm6444_vm5, %v1169_v33 }
 0x2a3   : > { %v1300_v40 = vmul.f32 %v1292_v60, %v1288_v42  ;;  %3696 = vmatmul.msk.f32.gmra.mxu3 %vm6444_vm5, %v1169_v33  ;;  %v1298_v59 = vmul.f32 %v1292_v60, %v1287_v23  ;;  %v1299_v12 = vmul.f32 %v1293_v37, %v1283_v39  ;;  %v1297_v55 = vmul.f32 %v1293_v37, %v1282_v48 }
 0x2a4   : > { %1676 = vmatpush.msra.mxu0 %v1348_v46  ;;  %1734 = vmatpush.msra.mxu2 %v1349_v47  ;;  %v1301_v47 = vmul.f32 %v1293_v37, %v1284_v41  ;;  %v1246_v2 = vperm.slane %v3682_v20, 0  ;;  %v1237_v41 = vsel %vm551_vm4, %v4807_v1, %v4815_v8  ;;  %v1241_v42 = vsel %vm551_vm4, %v4815_v8, %v4807_v1 }
 0x2a5   : > { %v1242_v1 = vsel %vm551_vm4, %v4829_v15, %v4873_v7 }
 0x2a6   : > { %1677 = vmatpush.msra.mxu0 %v1346_v50  ;;  %1735 = vmatpush.msra.mxu2 %v1347_v19  ;;  %v3688_v19 = vld [vmem:[%s6423_s11 + $0xe] sm:$0x3] }
 0x2a7   : > { %v4926_v24 = vpop.permute.xlu1 %1234  ;;  %v1522_v21 = vperm.slane %v3688_v19, 0 }
 0x2a8   : > { %v1281_v31 = vpop.permute.xlu0 %1280  ;;  %1678 = vmatpush.msra.mxu0 %v1344_v17  ;;  %v1273_v35 = vpop.permute.xlu2 %1272  ;;  %1736 = vmatpush.msra.mxu2 %v1345_v22  ;;  %v1247_v17 = vperm.slane %v3682_v20, 1  ;;  %v1236_v22 = vsel %vm551_vm4, %v4793_v61, %v4767_v54 }
 0x2a9   : > { %v1285_v43 = vsel %vm599_vm2, %v1273_v35, %v1281_v31  ;;  %v1289_v44 = vsel %vm599_vm2, %v1281_v31, %v1273_v35  ;;  %v1240_v31 = vsel %vm551_vm4, %v4767_v54, %v4793_v61  ;;  %v1512_v35 = vsel %vm839_vm0, %v4803_v63, %v4751_v52 }
 0x2aa   : > { %1679 = vmatpush.msra.mxu0 %v1342_v36  ;;  %1737 = vmatpush.msra.mxu2 %v1343_v51  ;;  %v1302_v45 = vmul.f32 %v1292_v60, %v1289_v44  ;;  %v1303_v46 = vmul.f32 %v1293_v37, %v1285_v43  ;;  %v4981_v36 = vsel %vm791_vm3, %v4771_v56, %v4781_v58  ;;  %v1523_v51 = vperm.slane %v3688_v19, 1 }
 0x2ab   : > { %v1516_v60 = vsel %vm839_vm0, %v4751_v52, %v4803_v63  ;;  %v4987_v37 = vmul.f32 %v1246_v2, %v1240_v31  ;;  %v1526_v54 = vmul.f32 %v1522_v21, %v1512_v35  ;;  %v4989_v61 = vmul.f32 %v1247_v17, %v1236_v22 }
 0x2ac   : > { %1680 = vmatpush.msra.mxu0 %v1302_v45  ;;  %1738 = vmatpush.msra.mxu2 %v1303_v46  ;;  %v1514_v52 = vsel %vm839_vm0, %v4863_v6, %v4869_v27  ;;  %v1518_v63 = vsel %vm839_vm0, %v4869_v27, %v4863_v6  ;;  %v1238_v44 = vsel %vm551_vm4, %v4873_v7, %v4829_v15 }
 0x2ad   : > { %v1513_v15 = vsel %vm839_vm0, %v4851_v14, %v4825_v9  ;;  %v1531_v48 = vmul.f32 %v1523_v51, %v1518_v63  ;;  %v1527_v49 = vmul.f32 %v1523_v51, %v1516_v60  ;;  %v1252_v19 = vmul.f32 %v1246_v2, %v1241_v42 }
 0x2ae   : > { %1681 = vmatpush.msra.mxu0 %v1300_v40  ;;  %1739 = vmatpush.msra.mxu2 %v1301_v47  ;;  %v3687_v47 = vld [vmem:[%s6423_s11 + $0xc] sm:$0x3]  ;;  %v1467_v22 = vsel %vm791_vm3, %v4859_v4, %v4795_v62 }
 0x2af   : > { %v4957_v50 = vpop.permute.xlu1 %1418  ;;  %v1477_v35 = vperm.slane %v3687_v47, 1 }
 0x2b0   : > { %v1465_v13 = vpop.permute.xlu0 %1464  ;;  %1682 = vmatpush.msra.mxu0 %v1298_v59  ;;  %1740 = vmatpush.msra.mxu2 %v1299_v12  ;;  %v1457_v7 = vpop.permute.xlu2 %1456  ;;  %v1254_v59 = vmul.f32 %v1246_v2, %v1242_v1  ;;  %v1255_v12 = vmul.f32 %v1247_v17, %v1238_v44 }
 0x2b1   : > { %v1469_v31 = vsel %vm791_vm3, %v1457_v7, %v1465_v13 }
 0x2b2   : > { %1683 = vmatpush.msra.mxu0 %v1296_v53  ;;  %1741 = vmatpush.msra.mxu2 %v1297_v55  ;;  %v1253_v53 = vmul.f32 %v1247_v17, %v1237_v41  ;;  %v1476_v55 = vperm.slane %v3687_v47, 0  ;;  %v1472_v41 = vsel %vm791_vm3, %v4867_v26, %v4896_v38  ;;  %v1421_v47 = vsel %vm6443_vm6, %v4817_v3, %v4827_v11 }
 0x2b7   : > { %v1503_v43 = vpop.permute.xlu1 %1502 }
 0x2b8   : > { %v1227_v8 = vpop.permute.xlu0 %1226  ;;  %v1515_v45 = vsel %vm839_vm0, %v1503_v43, %v4871_v28  ;;  %v1519_v6 = vsel %vm839_vm0, %v4871_v28, %v1503_v43  ;;  %v1517_v28 = vsel %vm839_vm0, %v4825_v9, %v4851_v14  ;;  %v1198_v9 = vld [vmem:[%s6423_s11] sm:$0x3]  ;;  %v1528_v14 = vmul.f32 %v1522_v21, %v1513_v15 }
 0x2b9   : > { %v1239_v27 = vsel %vm551_vm4, %v1227_v8, %v4926_v24  ;;  %v1243_v46 = vsel %vm551_vm4, %v4926_v24, %v1227_v8  ;;  %v1532_v39 = vmul.f32 %v1522_v21, %v1515_v45  ;;  %v1533_v23 = vmul.f32 %v1523_v51, %v1519_v6  ;;  %v1363_v8 = vpop.permute.xlu2 %1362 }
 0x2ba   : > { %v1256_v33 = vmul.f32 %v1246_v2, %v1243_v46  ;;  %v1257_v40 = vmul.f32 %v1247_v17, %v1239_v27  ;;  %v1530_v24 = vmul.f32 %v1522_v21, %v1514_v52  ;;  %v1529_v20 = vmul.f32 %v1523_v51, %v1517_v28 }
 0x2bb   : > { %1705 = vmatpush.msra.mxu1 %v1532_v39  ;;  %1763 = vmatpush.msra.mxu3 %v1533_v23  ;;  %v1473_v2 = vsel %vm791_vm3, %v1465_v13, %v1457_v7  ;;  %v1192_v21 = vsel %vm6442_vm7, %v4865_v25, %v4875_v29  ;;  %v1196_v17 = vsel %vm6442_vm7, %v4875_v29, %v4865_v25  ;;  %v5061_v60 = vperm.slane %v1198_v9, 0 }
 0x2bc   : > { %1684 = vmatpush.msra.mxu0 %v1256_v33  ;;  %1742 = vmatpush.msra.mxu2 %v1257_v40  ;;  %v1468_v51 = vsel %vm791_vm3, %v4896_v38, %v4867_v26  ;;  %v5073_v52 = vperm.slane %v1198_v9, 1  ;;  %v1486_v43 = vmul.f32 %v1476_v55, %v1469_v31  ;;  %v1487_v44 = vmul.f32 %v1477_v35, %v1473_v2 }
 0x2bd   : > { %1706 = vmatpush.msra.mxu1 %v1530_v24  ;;  %1764 = vmatpush.msra.mxu3 %v1531_v48  ;;  %v1471_v26 = vsel %vm791_vm3, %v4795_v62, %v4859_v4  ;;  %v1484_v1 = vmul.f32 %v1476_v55, %v1468_v51  ;;  %v1485_v62 = vmul.f32 %v1477_v35, %v1472_v41 }
 0x2be   : > { %1685 = vmatpush.msra.mxu0 %v1254_v59  ;;  %1743 = vmatpush.msra.mxu2 %v1255_v12  ;;  %v1470_v4 = vsel %vm791_vm3, %v4781_v58, %v4771_v56  ;;  %v1482_v45 = vmul.f32 %v1476_v55, %v1467_v22  ;;  %v1483_v6 = vmul.f32 %v1477_v35, %v1471_v26 }
 0x2bf   : > { %1707 = vmatpush.msra.mxu1 %v1528_v14  ;;  %1765 = vmatpush.msra.mxu3 %v1529_v20  ;;  %v1181_v13 = vpop.permute.xlu1 %1180  ;;  %v1480_v39 = vmul.f32 %v1476_v55, %v4981_v36  ;;  %v1481_v23 = vmul.f32 %v1477_v35, %v1470_v4  ;;  %v1422_v7 = vsel %vm6443_vm6, %v4884_v32, %v4839_v18  ;;  %v1162_v4 = vld [vmem:[#allocation6 + $0x20] sm:$0xff] }
 0x2c0   : > { %v1411_v42 = vpop.permute.xlu0 %1410  ;;  %v1193_v25 = vsel %vm6442_vm7, %v1181_v13, %v4877_v30  ;;  %v1197_v29 = vsel %vm6442_vm7, %v4877_v30, %v1181_v13  ;;  %1686 = vmatpush.msra.mxu0 %v1252_v19  ;;  %1744 = vmatpush.msra.mxu2 %v1253_v53  ;;  %v1195_v30 = vsel %vm6442_vm7, %v4837_v16, %v4861_v5  ;;  %v1158_v13 = vld [vmem:[#allocation6] sm:$0xff] }
 0x2c1   : > { %1708 = vmatpush.msra.mxu1 %v1526_v54  ;;  %1766 = vmatpush.msra.mxu3 %v1527_v49  ;;  %v1210_v63 = vmul.f32 %v5061_v60, %v1197_v29  ;;  %v1211_v38 = vmul.f32 %v5073_v52, %v1193_v25  ;;  %v1191_v54 = vsel %vm6442_vm7, %v4861_v5, %v4837_v16  ;;  %v3686_v16 = vld [vmem:[%s6423_s11 + $0xa] sm:$0x3]  ;;  %v1183_v19 = vpop.permute.xlu2 %1182 }
 0x2c2   : > { %1687 = vmatpush.msra.mxu0 %v4987_v37  ;;  %1745 = vmatpush.msra.mxu2 %v4989_v61  ;;  %v1208_v37 = vmul.f32 %v5061_v60, %v1196_v17  ;;  %v1209_v61 = vmul.f32 %v5073_v52, %v1192_v21  ;;  %v1206_v5 = vmul.f32 %v5061_v60, %v1195_v30  ;;  %v1430_v15 = vperm.slane %v3686_v16, 0 }
 0x2c3   : > { %1709 = vmatpush.msra.mxu1 %v1486_v43  ;;  %1767 = vmatpush.msra.mxu3 %v1487_v44  ;;  %v1423_v56 = vsel %vm6443_vm6, %v1411_v42, %v4957_v50  ;;  %v1427_v58 = vsel %vm6443_vm6, %v4957_v50, %v1411_v42  ;;  %v1207_v27 = vmul.f32 %v5073_v52, %v1191_v54  ;;  %v1431_v28 = vperm.slane %v3686_v16, 1  ;;  %v1165_v16 = vld [vmem:[#allocation6 + $0x38] sm:$0xff] }
 0x2c4   : > { %1688 = vmatpush.msra.mxu0 %v1210_v63  ;;  %1746 = vmatpush.msra.mxu2 %v1211_v38  ;;  %v1426_v50 = vsel %vm6443_vm6, %v4839_v18, %v4884_v32  ;;  %v1440_v40 = vmul.f32 %v1430_v15, %v1423_v56  ;;  %v1425_v24 = vsel %vm6443_vm6, %v4827_v11, %v4817_v3  ;;  %v3685_v18 = vld [vmem:[%s6423_s11 + $0x8] sm:$0x3]  ;;  %v1160_v38 = vld [vmem:[#allocation6 + $0x10] sm:$0xff] }
 0x2c5   : > { %1710 = vmatpush.msra.mxu1 %v1484_v1  ;;  %1768 = vmatpush.msra.mxu3 %v1485_v62  ;;  %v1441_v36 = vmul.f32 %v1431_v28, %v1427_v58  ;;  %v1438_v32 = vmul.f32 %v1430_v15, %v1422_v7  ;;  %v1439_v48 = vmul.f32 %v1431_v28, %v1426_v50  ;;  %v1384_v12 = vperm.slane %v3685_v18, 0  ;;  %v1159_v62 = vld [vmem:[#allocation6 + $0x8] sm:$0xff] }
 0x2c6   : > { %1689 = vmatpush.msra.mxu0 %v1208_v37  ;;  %1747 = vmatpush.msra.mxu2 %v1209_v61  ;;  %v1420_v49 = vsel %vm6443_vm6, %v4805_v0, %v4779_v57  ;;  %v1424_v59 = vsel %vm6443_vm6, %v4779_v57, %v4805_v0  ;;  %v1436_v3 = vmul.f32 %v1430_v15, %v1421_v47  ;;  %v1385_v14 = vperm.slane %v3685_v18, 1  ;;  %v1164_v37 = vld [vmem:[#allocation6 + $0x30] sm:$0xff]  ;;  %v1163_v61 = vld [vmem:[#allocation6 + $0x28] sm:$0xff] }
 0x2c7   : > { %v1365_v46 = vpop.permute.xlu1 %1364  ;;  %1711 = vmatpush.msra.mxu1 %v1482_v45  ;;  %1769 = vmatpush.msra.mxu3 %v1483_v6  ;;  %v1437_v11 = vmul.f32 %v1431_v28, %v1425_v24  ;;  %v1434_v55 = vmul.f32 %v1430_v15, %v1420_v49  ;;  %v1435_v57 = vmul.f32 %v1431_v28, %v1424_v59  ;;  %v1664_v6 = vpop.f32.mrf.mxu3 }
 0x2c8   : > { %v1371_v33 = vpop.permute.xlu0 %1370  ;;  %1690 = vmatpush.msra.mxu0 %v1206_v5  ;;  %1748 = vmatpush.msra.mxu2 %v1207_v27  ;;  %v1377_v9 = vsel %vm6441_vm8, %v1365_v46, %v4886_v34  ;;  %v1381_v20 = vsel %vm6441_vm8, %v4886_v34, %v1365_v46  ;;  %v1635_v5 = vpop.f32.mrf.mxu2 }
 0x2c9   : > { %1712 = vmatpush.msra.mxu1 %v1480_v39  ;;  %1770 = vmatpush.msra.mxu3 %v1481_v23  ;;  %v1376_v0 = vsel %vm6441_vm8, %v1363_v8, %v1371_v33  ;;  %v1380_v22 = vsel %vm6441_vm8, %v1371_v33, %v1363_v8  ;;  %v1394_v21 = vmul.f32 %v1384_v12, %v1377_v9  ;;  %v1359_v29 = vpop.permute.xlu2 %1358  ;;  %v1161_v8 = vld [vmem:[#allocation6 + $0x18] sm:$0xff] }
 0x2ca   : > { %v1395_v51 = vmul.f32 %v1385_v14, %v1381_v20  ;;  %v1392_v41 = vmul.f32 %v1384_v12, %v1376_v0  ;;  %v1393_v42 = vmul.f32 %v1385_v14, %v1380_v22 }
 0x2cb   : > { %1713 = vmatpush.msra.mxu1 %v1440_v40  ;;  %1771 = vmatpush.msra.mxu3 %v1441_v36 }
 0x2cd   : > { %1714 = vmatpush.msra.mxu1 %v1438_v32  ;;  %1772 = vmatpush.msra.mxu3 %v1439_v48 }
 0x2cf   : > { %v1175_v53 = vpop.permute.xlu1 %1174  ;;  %1715 = vmatpush.msra.mxu1 %v1436_v3  ;;  %1773 = vmatpush.msra.mxu3 %v1437_v11  ;;  %v1667_v58 = vpop.f32.mrf.mxu3 }
 0x2d0   : > { %v1361_v31 = vpop.permute.xlu0 %1360  ;;  %v1190_v2 = vsel %vm6442_vm7, %v1175_v53, %v1183_v19  ;;  %v1194_v35 = vsel %vm6442_vm7, %v1183_v19, %v1175_v53  ;;  %v1638_v45 = vpop.f32.mrf.mxu2 }
 0x2d1   : > { %1716 = vmatpush.msra.mxu1 %v1434_v55  ;;  %1774 = vmatpush.msra.mxu3 %v1435_v57  ;;  %v1204_v34 = vmul.f32 %v5061_v60, %v1194_v35  ;;  %v1205_v17 = vmul.f32 %v5073_v52, %v1190_v2 }
 0x2d3   : > { %1691 = vmatpush.msra.mxu0 %v1204_v34  ;;  %1717 = vmatpush.msra.mxu1 %v1394_v21 }
 0x2d4   : > { %1749 = vmatpush.msra.mxu2 %v1205_v17  ;;  %1775 = vmatpush.msra.mxu3 %v1395_v51 }
 0x2d5   : > { %1692 = vmatmul.f32.vlgmr.msra.gmra.mxu0 %v1158_v13  ;;  %1750 = vmatmul.f32.vlgmr.msra.gmra.mxu2 %v1158_v13 }
 0x2d6   : > { %1718 = vmatpush.msra.mxu1 %v1392_v41  ;;  %1776 = vmatpush.msra.mxu3 %v1393_v42 }
 0x2d7   : > { %v1369_v25 = vpop.permute.xlu1 %1368 }
 0x2d8   : > { %v1367_v63 = vpop.permute.xlu0 %1366  ;;  %v1375_v60 = vsel %vm6441_vm8, %v1361_v31, %v1369_v25  ;;  %v1379_v52 = vsel %vm6441_vm8, %v1369_v25, %v1361_v31 }
 0x2d9   : > { %v1374_v43 = vsel %vm6441_vm8, %v1359_v29, %v1367_v63  ;;  %v1378_v44 = vsel %vm6441_vm8, %v1367_v63, %v1359_v29  ;;  %v1390_v26 = vmul.f32 %v1384_v12, %v1375_v60  ;;  %v1391_v30 = vmul.f32 %v1385_v14, %v1379_v52 }
 0x2da   : > { %v1388_v54 = vmul.f32 %v1384_v12, %v1374_v43  ;;  %v1389_v1 = vmul.f32 %v1385_v14, %v1378_v44  ;;  %v1800_v14 = vpop.permute.xlu2 %1799 }
 0x2db   : > { %1719 = vmatpush.msra.mxu1 %v1390_v26  ;;  %1777 = vmatpush.msra.mxu3 %v1391_v30 }
 0x2dd   : > { %1695 = vmatmul.f32.gmra.mxu0 %v1160_v38  ;;  %1753 = vmatmul.f32.gmra.mxu2 %v1160_v38 }
 0x2de   : > { %1720 = vmatpush.msra.mxu1 %v1388_v54  ;;  %1778 = vmatpush.msra.mxu3 %v1389_v1  ;;  %v4066_v1 = vmov 256.0  }
 0x2df   : > { %1721 = vmatmul.f32.vlgmr.msra.gmra.mxu1 %v1159_v62  ;;  %1779 = vmatmul.f32.vlgmr.msra.gmra.mxu3 %v1159_v62  ;;  %v1795_v18 = vpop.permute.xlu1 %1794  ;;  %3879 = vrcp.f32 %v4066_v1 }
 0x2e0   : > { %v1805_v17 = vpop.permute.xlu0 %1804 }
 0x2e5   : > { %1698 = vmatmul.f32.gmra.mxu0 %v1162_v4  ;;  %1756 = vmatmul.f32.gmra.mxu2 %v1162_v4  ;;  %v3880_v62 = vpop.eup %3879 }
 0x2e6   : > { %v1833_v4 = vmul.f32 256.0, %v3880_v62  ;;  %vm1837_vm9 = vweird.f32 %v3880_v62 }
 0x2e7   : > { %1724 = vmatmul.f32.gmra.mxu1 %v1161_v8  ;;  %1782 = vmatmul.f32.gmra.mxu3 %v1161_v8  ;;  %v1810_v26 = vpop.permute.xlu1 %1809 }
 0x2e8   : > { %v1834_v8 = vsub.f32 1.0, %v1833_v4 }
 0x2ed   : > { %1701 = vmatmul.f32.gmra.mxu0 %v1164_v37  ;;  %1759 = vmatmul.f32.gmra.mxu2 %v1164_v37  ;;  %v1835_v37 = vmul.f32 %v3880_v62, %v1834_v8 }
 0x2ef   : > { %1727 = vmatmul.f32.gmra.mxu1 %v1163_v61  ;;  %1785 = vmatmul.f32.gmra.mxu3 %v1163_v61  ;;  %v1836_v61 = vadd.f32 %v3880_v62, %v1835_v37 }
 0x2f2   : > { %v1641_v56 = vpop.f32.mrf.mxu2  ;;  %v1670_v46 = vpop.f32.mrf.mxu3 }
 0x2f7   : > { %1730 = vmatmul.f32.gmra.mxu1 %v1165_v16  ;;  %1788 = vmatmul.f32.gmra.mxu3 %v1165_v16 }
 0x325   : > { %v1644_v27 = vpop.f32.mrf.mxu2 }
 0x326   : > { %v1673_v15 = vpop.f32.mrf.mxu3 }
 0x352   : > { %v1693_v39 = vpop.f32.mrf.mxu0 }
 0x353   : > { %v1694_v7 = vadd.f32 %v1693_v39, %v1635_v5  ;;  %v5184_v5 = vsel %vm1837_vm9, %v3880_v62, %v1836_v61  ;;  %v1843_v39 = vld [vmem:[%s6419_s7] sm:$0xff] }
 0x354   : > { %6466 = vst [vmem:[#allocation15_spill] sm:$0xff] %v5184_v5 }
 0x358   : > { %v1751_v23 = vpop.f32.mrf.mxu2 }
 0x359   : > { %v1752_v33 = vadd.f32 %v1751_v23, %v1664_v6  ;;  %v1845_v23 = vld [vmem:[%s6419_s7 + $0x10] sm:$0xff] }
 0x35a   : > { %v1696_v50 = vpop.f32.mrf.mxu0 }
 0x35b   : > { %v1697_v59 = vadd.f32 %v1696_v50, %v1638_v45 }
 0x35c   : > { %v1722_v28 = vpop.f32.mrf.mxu1 }
 0x35d   : > { %v1723_v40 = vadd.f32 %v1722_v28, %v1694_v7 }
 0x35f   : > { %v5160_v48 = vadd.f32 %v1795_v18, %v1723_v40 }
 0x360   : > { %v1754_v36 = vpop.f32.mrf.mxu2 }
 0x361   : > { %v1755_v11 = vadd.f32 %v1754_v36, %v1667_v58 }
 0x362   : > { %v1780_v47 = vpop.f32.mrf.mxu3  ;;  %v1699_v19 = vpop.f32.mrf.mxu0 }
 0x363   : > { %v1781_v24 = vadd.f32 %v1780_v47, %v1752_v33  ;;  %v1700_v22 = vadd.f32 %v1699_v19, %v1641_v56  ;;  %v1844_v56 = vld [vmem:[%s6419_s7 + $0x8] sm:$0xff]  ;;  %v1846_v33 = vld [vmem:[%s6419_s7 + $0x18] sm:$0xff] }
 0x364   : > { %v1725_v32 = vpop.f32.mrf.mxu1 }
 0x365   : > { %v5162_v49 = vadd.f32 %v1795_v18, %v1781_v24  ;;  %v1726_v12 = vadd.f32 %v1725_v32, %v1697_v59 }
 0x367   : > { %v1820_v3 = vadd.f32 %v5162_v49, %v5160_v48  ;;  %v5166_v57 = vadd.f32 %v1800_v14, %v1726_v12 }
 0x368   : > { %v1757_v53 = vpop.f32.mrf.mxu2 }
 0x369   : > { %1821 = vadd.xlane.f32.xlu2 %v1820_v3  ;;  %v1758_v2 = vadd.f32 %v1757_v53, %v1670_v46  ;;  %v1865_v53 = vld [vmem:[%s6420_s8] sm:$0x1] }
 0x36a   : > { %v1783_v9 = vpop.f32.mrf.mxu3  ;;  %v1702_v51 = vpop.f32.mrf.mxu0 }
 0x36b   : > { %v1784_v20 = vadd.f32 %v1783_v9, %v1755_v11  ;;  %v1703_v29 = vadd.f32 %v1702_v51, %v1644_v27 }
 0x36c   : > { %v1728_v55 = vpop.f32.mrf.mxu1 }
 0x36d   : > { %v5168_v0 = vadd.f32 %v1800_v14, %v1784_v20  ;;  %v1729_v35 = vadd.f32 %v1728_v55, %v1700_v22 }
 0x36f   : > { %v1823_v31 = vadd.f32 %v5168_v0, %v5166_v57  ;;  %v5172_v13 = vadd.f32 %v1805_v17, %v1729_v35  ;;  %v1870_v35 = vld [vmem:[%s6421_s9 + $0x10] sm:$0xff] }
 0x370   : > { %v1760_v42 = vpop.f32.mrf.mxu2 }
 0x371   : > { %1824 = vadd.xlane.f32.xlu0 %v1823_v31  ;;  %v1761_v60 = vadd.f32 %v1760_v42, %v1673_v15 }
 0x372   : > { %v1786_v34 = vpop.f32.mrf.mxu3 }
 0x373   : > { %v1787_v21 = vadd.f32 %v1786_v34, %v1758_v2  ;;  %v1871_v2 = vld [vmem:[%s6421_s9 + $0x18] sm:$0xff]  ;;  %v1869_v34 = vld [vmem:[%s6421_s9 + $0x8] sm:$0xff] }
 0x374   : > { %v1731_v25 = vpop.f32.mrf.mxu1 }
 0x375   : > { %v5174_v41 = vadd.f32 %v1805_v17, %v1787_v21  ;;  %v1732_v52 = vadd.f32 %v1731_v25, %v1703_v29 }
 0x377   : > { %v1826_v63 = vadd.f32 %v5174_v41, %v5172_v13  ;;  %v5178_v30 = vadd.f32 %v1810_v26, %v1732_v52 }
 0x379   : > { %1827 = vadd.xlane.f32.xlu1 %v1826_v63 }
 0x37a   : > { %v1789_v43 = vpop.f32.mrf.mxu3 }
 0x37b   : > { %v1790_v44 = vadd.f32 %v1789_v43, %v1761_v60  ;;  %v1868_v60 = vld [vmem:[%s6421_s9] sm:$0xff] }
 0x37d   : > { %v5180_v38 = vadd.f32 %v1810_v26, %v1790_v44  ;;  %v1892_v44 = vld [vmem:[%s6422_s10 + $0x18] sm:$0xff]  ;;  %v1891_v26 = vld [vmem:[%s6422_s10 + $0x10] sm:$0xff] }
 0x37f   : > { %v1829_v54 = vadd.f32 %v5180_v38, %v5178_v30 }
 0x381   : > { %1830 = vadd.xlane.f32.xlu2 %v1829_v54  ;;  %v1890_v54 = vld [vmem:[%s6422_s10 + $0x8] sm:$0xff] }
 0x3dc   : > { %v1822_v45 = vpop.xlane.xlu2 %1821 }
 0x3dd   : > { %v1839_v27 = vmul.f32 %v5184_v5, %v1822_v45 }
 0x3df   : > { %v1847_v28 = vmul.f32 %v1843_v39, %v1839_v27 }
 0x3e1   : > { %v1852_v36 = vsel %vm6440_vm10, %v1847_v28, 0.0 }
 0x3e4   : > { %v1825_v16 = vpop.xlane.xlu0 %1824 }
 0x3e5   : > { %v1840_v6 = vmul.f32 %v5184_v5, %v1825_v16 }
 0x3e7   : > { %v1848_v15 = vmul.f32 %v1844_v56, %v1840_v6  ;;  %v1889_v56 = vld [vmem:[%s6422_s10] sm:$0xff] }
 0x3e9   : > { %v1853_v50 = vsel %vm6440_vm10, %v1848_v15, 0.0 }
 0x3ea   : > { %v1854_v18 = vadd.f32 %v1853_v50, %v1852_v36 }
 0x3ec   : > { %v1828_v58 = vpop.xlane.xlu1 %1827 }
 0x3ed   : > { %v1841_v46 = vmul.f32 %v5184_v5, %v1828_v58 }
 0x3ef   : > { %v1849_v7 = vmul.f32 %v1845_v23, %v1841_v46 }
 0x3f1   : > { %v1855_v47 = vsel %vm6440_vm10, %v1849_v7, 0.0 }
 0x3f2   : > { %v1856_v59 = vadd.f32 %v1855_v47, %v1854_v18 }
 0x3f4   : > { %v1831_v40 = vpop.xlane.xlu2 %1830 }
 0x3f5   : > { %v1842_v24 = vmul.f32 %v5184_v5, %v1831_v40  ;;  %v3737_v5 = vld [vmem:[%s6423_s11 + $0xc] sm:$0x3] }
 0x3f7   : > { %v1850_v32 = vmul.f32 %v1846_v33, %v1842_v24 }
 0x3f9   : > { %v1857_v3 = vsel %vm6440_vm10, %v1850_v32, 0.0 }
 0x3fa   : > { %v1858_v11 = vadd.f32 %v1857_v3, %v1856_v59 }
 0x3fc   : > { %v1859_v12 = vrot.slane %v1858_v11, 4 }
 0x3fe   : > { %v1860_v19 = vadd.f32 %v1859_v12, %v1858_v11 }
 0x400   : > { %v1861_v9 = vrot.slane %v1860_v19, 2 }
 0x402   : > { %v1862_v14 = vadd.f32 %v1861_v9, %v1860_v19 }
 0x404   : > { %v1863_v20 = vrot.slane %v1862_v14, 1 }
 0x406   : > { %v1864_v55 = vadd.f32 %v1863_v20, %v1862_v14 }
 0x408   : > { %v1866_v22 = vadd.f32 %v1865_v53, %v1864_v55 }
 0x40a   : > { %v1867_v31 = vmax.f32 %v1866_v22, 0.0 }
 0x40c   : > { %v1872_v21 = vperm.slane %v1867_v31, 0 }
 0x40e   : > { %v1876_v17 = vmul.f32 %v1872_v21, %v1871_v2  ;;  %v1875_v51 = vmul.f32 %v1872_v21, %v1870_v35  ;;  %v1874_v42 = vmul.f32 %v1872_v21, %v1869_v34  ;;  %v1873_v52 = vmul.f32 %v1872_v21, %v1868_v60 }
 0x410   : > { %v1886_v25 = vsel %vm6440_vm10, %v1876_v17, 0.0  ;;  %v1883_v29 = vsel %vm6440_vm10, %v1875_v51, 0.0  ;;  %v1880_v63 = vsel %vm6440_vm10, %v1874_v42, 0.0  ;;  %v1877_v43 = vsel %vm6440_vm10, %v1873_v52, 0.0 }
 0x411   : > { %1887 = vadd.xlane.f32.xlu2 %v1886_v25  ;;  %1884 = vadd.xlane.f32.xlu0 %v1883_v29 }
 0x412   : > { %1881 = vadd.xlane.f32.xlu1 %v1880_v63 }
 0x419   : > { %1878 = vadd.xlane.f32.xlu2 %v1877_v43 }
 0x484   : > { %v1888_v1 = vpop.xlane.xlu2 %1887  ;;  %v1885_v62 = vpop.xlane.xlu0 %1884 }
 0x485   : > { %v1896_v4 = vadd.f32 %v1892_v44, %v1888_v1  ;;  %v1895_v8 = vadd.f32 %v1891_v26, %v1885_v62  ;;  %v1882_v37 = vpop.xlane.xlu1 %1881 }
 0x486   : > { %v1894_v61 = vadd.f32 %v1890_v54, %v1882_v37 }
 0x487   : > { %v3700_v16 = vmul.f32 -1.442695, %v1896_v4  ;;  %v3699_v45 = vmul.f32 -1.442695, %v1895_v8 }
 0x488   : > { %v3698_v6 = vmul.f32 -1.442695, %v1894_v61 }
 0x489   : > { %3881 = vpow2.f32 %v3700_v16 }
 0x48a   : > { %3883 = vpow2.f32 %v3699_v45 }
 0x48b   : > { %3885 = vpow2.f32 %v3698_v6 }
 0x48c   : > { %v1879_v58 = vpop.xlane.xlu2 %1878 }
 0x48d   : > { %v1893_v27 = vadd.f32 %v1889_v56, %v1879_v58 }
 0x48f   : > { %v3882_v46 = vpop.eup %3881  ;;  %v3697_v39 = vmul.f32 -1.442695, %v1893_v27 }
 0x490   : > { %v3884_v23 = vpop.eup %3883  ;;  %v1912_v15 = vadd.f32 1.0, %v3882_v46 }
 0x491   : > { %v3886_v28 = vpop.eup %3885  ;;  %v1911_v7 = vadd.f32 1.0, %v3884_v23  ;;  %3887 = vpow2.f32 %v3697_v39 }
 0x492   : > { %3889 = vrcp.f32 %v1912_v15  ;;  %v1910_v50 = vadd.f32 1.0, %v3886_v28  ;;  %vm1963_vm11 = vweird.f32 %v1912_v15  ;;  %v1967_v11 = vand.u32 2147483647, %v1912_v15 }
 0x493   : > { %3891 = vrcp.f32 %v1911_v7  ;;  %v1969_v12 = vand.u32 2147483648, %v1912_v15  ;;  %vm1948_vm12 = vweird.f32 %v1911_v7  ;;  %v1954_v14 = vand.u32 2147483648, %v1911_v7 }
 0x494   : > { %3893 = vrcp.f32 %v1910_v50  ;;  %v1952_v55 = vand.u32 2147483647, %v1911_v7  ;;  %v1939_v22 = vand.u32 2147483648, %v1910_v50  ;;  %v1937_v35 = vand.u32 2147483647, %v1910_v50 }
 0x495   : > { %vm1968_vm10 = vcmp.eq.f32.partialorder %v1967_v11, 8.507059e+37  ;;  %v1970_v21 = vor.u32 1.1754944e-38, %v1969_v12  ;;  %vm1933_vm8 = vweird.f32 %v1910_v50  ;;  %v1955_v42 = vor.u32 1.1754944e-38, %v1954_v14 }
 0x496   : > { %vm1953_vm6 = vcmp.eq.f32.partialorder %v1952_v55, 8.507059e+37  ;;  %v1940_v52 = vor.u32 1.1754944e-38, %v1939_v22 }
 0x497   : > { %v3888_v33 = vpop.eup %3887 }
 0x498   : > { %v3890_v40 = vpop.eup %3889  ;;  %v1909_v36 = vadd.f32 1.0, %v3888_v33 }
 0x499   : > { %v3892_v47 = vpop.eup %3891  ;;  %v1959_v24 = vmul.f32 %v3890_v40, %v1912_v15  ;;  %vm1964_vm13 = vweird.f32 %v3890_v40  ;;  %v3913_v15 = vld [vmem:[%s4211_s17 + $0x30] sm:$0xff] }
 0x49a   : > { %v3894_v18 = vpop.eup %3893  ;;  %3895 = vrcp.f32 %v1909_v36  ;;  %v1944_v32 = vmul.f32 %v3892_v47, %v1911_v7  ;;  %vm1949_vm14 = vweird.f32 %v3892_v47  ;;  %vm1965_vm9 = vmor %vm1963_vm11, %vm1964_vm13  ;;  %vm1938_vm11 = vcmp.eq.f32.partialorder %v1937_v35, 8.507059e+37  ;;  %v3914_v7 = vld [vmem:[%s4211_s17 + $0x38] sm:$0xff] }
 0x49b   : > { %v1960_v59 = vsub.f32 1.0, %v1959_v24  ;;  %v1929_v3 = vmul.f32 %v3894_v18, %v1910_v50  ;;  %vm1934_vm15 = vweird.f32 %v3894_v18  ;;  %vm1950_vm7 = vmor %vm1948_vm12, %vm1949_vm14  ;;  %v1924_v1 = vand.u32 2147483648, %v1909_v36 }
 0x49c   : > { %v1945_v19 = vsub.f32 1.0, %v1944_v32  ;;  %vm1935_vm5 = vmor %vm1933_vm8, %vm1934_vm15  ;;  %v1922_v4 = vand.u32 2147483647, %v1909_v36  ;;  %v3919_v32 = vld [vmem:[%s4211_s17] sm:$0xff]  ;;  %vm6482_vm13 = vcmp.lt.s32.totalorder %v4317_v10, 113 }
 0x49d   : > { %v1961_v9 = vmul.f32 %v3890_v40, %v1960_v59  ;;  %v1930_v20 = vsub.f32 1.0, %v1929_v3  ;;  %v1925_v37 = vor.u32 1.1754944e-38, %v1924_v1  ;;  %v3920_v3 = vld [vmem:[%s4211_s17 + $0x8] sm:$0xff]  ;;  %vm6483_vm14 = vmmov %vm6482_vm13 }
 0x49e   : > { %v1946_v53 = vmul.f32 %v3892_v47, %v1945_v19  ;;  %vm1923_vm8 = vcmp.eq.f32.partialorder %v1922_v4, 8.507059e+37  ;;  %v3711_v19 = vld [vmem:[%s6423_s11 + $0x6] sm:$0x3] }
 0x49f   : > { %v1962_v31 = vadd.f32 %v3890_v40, %v1961_v9  ;;  %v1931_v2 = vmul.f32 %v3894_v18, %v1930_v20  ;;  %v2208_v9 = vperm.slane %v3711_v19, 0  ;;  %v2209_v14 = vperm.slane %v3711_v19, 1 }
 0x4a0   : > { %v3896_v34 = vpop.eup %3895  ;;  %v1947_v17 = vadd.f32 %v3892_v47, %v1946_v53 }
 0x4a1   : > { %v1966_v51 = vsel %vm1965_vm9, %v3890_v40, %v1962_v31  ;;  %v1932_v25 = vadd.f32 %v3894_v18, %v1931_v2  ;;  %v1914_v29 = vmul.f32 %v3896_v34, %v1909_v36  ;;  %vm1919_vm12 = vweird.f32 %v3896_v34 }
 0x4a2   : > { %v1971_v63 = vsel %vm1968_vm10, %v1970_v21, %v1966_v51  ;;  %v1951_v60 = vsel %vm1950_vm7, %v3892_v47, %v1947_v17  ;;  %vm1918_vm10 = vweird.f32 %v1909_v36 }
 0x4a3   : > { %1990 = vperm.xlu0 %3878, %v1971_v63   ;;  %v1956_v43 = vsel %vm1953_vm6, %v1955_v42, %v1951_v60  ;;  %v1936_v44 = vsel %vm1935_vm5, %v3894_v18, %v1932_v25  ;;  %v1915_v26 = vsub.f32 1.0, %v1914_v29  ;;  %vm1920_vm7 = vmor %vm1918_vm10, %vm1919_vm12  ;;  %vm6480_vm5 = vcmask 261120  }
 0x4a4   : > { %1985 = vperm.xlu1 %3876, %v1956_v43   ;;  %v1941_v54 = vsel %vm1938_vm11, %v1940_v52, %v1936_v44  ;;  %vm6481_vm6 = vmmov %vm6480_vm5 }
 0x4a5   : > { %1980 = vperm.xlu2 %3877, %v1941_v54   ;;  %v1916_v62 = vmul.f32 %v3896_v34, %v1915_v26  ;;  %vm6484_vm15 = vmmov %vm6480_vm5 }
 0x4a6   : > { %vm6485_vm9 = vmmov %vm6480_vm5 }
 0x4a7   : > { %v1917_v8 = vadd.f32 %v3896_v34, %v1916_v62  ;;  %vm6486_vm11 = vmmov %vm6482_vm13 }
 0x4a8   : > { %vm6487_vm12 = vmmov %vm6486_vm11 }
 0x4a9   : > { %v1921_v61 = vsel %vm1920_vm7, %v3896_v34, %v1917_v8  ;;  %v3715_v34 = vld [vmem:[%s6423_s11 + $0xe] sm:$0x3]  ;;  %vm6488_vm10 = vmmov %vm6480_vm5 }
 0x4aa   : > { %v1926_v16 = vsel %vm1923_vm8, %v1925_v37, %v1921_v61  ;;  %v5386_v21 = vperm.slane %v3715_v34, 0  ;;  %v5388_v17 = vperm.slane %v3715_v34, 1  ;;  %vm6489_vm7 = vmmov %vm6480_vm5 }
 0x4ab   : > { %1975 = vperm.xlu0 %3878, %v1926_v16   ;;  %vm6490_vm8 = vmmov %vm6480_vm5 }
 0x4ff   : > { %v1981_v45 = vpop.permute.xlu2 %1980 }
 0x500   : > { %v1995_v23 = vmul.f32 %v1981_v45, %v5166_v57  ;;  %v1996_v33 = vmul.f32 %v1981_v45, %v5168_v0  ;;  %v3917_v57 = vld [vmem:[%s4211_s17 + $0x10] sm:$0xff] }
 0x502   : > { %v5265_v0 = vadd.f32 %v3917_v57, %v1995_v23 }
 0x504   : > { %6471 = vst [vmem:[#allocation20_spill] sm:$0xff] %v5265_v0 }
 0x515   : > { %v1991_v6 = vpop.permute.xlu0 %1990 }
 0x516   : > { %v1999_v56 = vmul.f32 %v1991_v6, %v5178_v30  ;;  %v2000_v58 = vmul.f32 %v1991_v6, %v5180_v38  ;;  %v1986_v27 = vpop.permute.xlu1 %1985  ;;  %v3915_v30 = vld [vmem:[%s4211_s17 + $0x20] sm:$0xff]  ;;  %v3918_v38 = vld [vmem:[%s4211_s17 + $0x18] sm:$0xff] }
 0x517   : > { %v1997_v46 = vmul.f32 %v1986_v27, %v5172_v13  ;;  %v1998_v39 = vmul.f32 %v1986_v27, %v5174_v41  ;;  %v3916_v13 = vld [vmem:[%s4211_s17 + $0x28] sm:$0xff]  ;;  %v5271_v36 = vadd.f32 %v3918_v38, %v1996_v33  ;;  %s6475_s17 = smov 15  }
 0x518   : > { %v5246_v28 = vadd.f32 %v3913_v15, %v1999_v56  ;;  %v5249_v50 = vadd.f32 %v3914_v7, %v2000_v58 }
 0x519   : > { %v5253_v40 = vadd.f32 %v3915_v30, %v1997_v46  ;;  %v5258_v41 = vadd.f32 %v3916_v13, %v1998_v39  ;;  %6472 = vst [vmem:[#allocation21_spill] sm:$0xff] %v5271_v36 }
 0x51a   : > { %6467 = vst [vmem:[#allocation16_spill] sm:$0xff] %v5246_v28  ;;  %2500 = vmatpush.msrb.mxu0 %v5246_v28  ;;  %2529 = vmatpush.msrb.mxu1 %v5249_v50 }
 0x51b   : > { %6468 = vst [vmem:[#allocation17_spill] sm:$0xff] %v5249_v50  ;;  %2188 = vrot.lane.b32.xlu1 %v5246_v28, %s6447_s18  ;;  %2186 = vrot.lane.b32.xlu2 %v5253_v40, %s6447_s18 }
 0x51c   : > { %6469 = vst [vmem:[#allocation18_spill] sm:$0xff] %v5253_v40  ;;  %2196 = vrot.lane.b32.xlu0 %v5249_v50, %s6447_s18  ;;  %2501 = vmatpush.msrb.mxu0 %v5253_v40 }
 0x51d   : > { %6470 = vst [vmem:[#allocation19_spill] sm:$0xff] %v5258_v41  ;;  %v1976_v47 = vpop.permute.xlu0 %1975  ;;  %2530 = vmatpush.msrb.mxu1 %v5258_v41 }
 0x51e   : > { %v1993_v24 = vmul.f32 %v1976_v47, %v5160_v48  ;;  %v1994_v18 = vmul.f32 %v1976_v47, %v5162_v49  ;;  %2502 = vmatpush.msrb.mxu0 %v5265_v0 }
 0x51f   : > { %2531 = vmatpush.msrb.mxu1 %v5271_v36 }
 0x520   : > { %v5279_v59 = vadd.f32 %v3919_v32, %v1993_v24  ;;  %v5282_v11 = vadd.f32 %v3920_v3, %v1994_v18  ;;  %v3710_v32 = vld [vmem:[%s6423_s11 + $0x4] sm:$0x3] }
 0x521   : > { %v5449_v3 = vperm.slane %v3710_v32, 0 }
 0x522   : > { %6473 = vst [vmem:[#allocation22_spill] sm:$0xff] %v5279_v59  ;;  %2503 = vmatpush.msrb.mxu0 %v5279_v59  ;;  %2532 = vmatpush.msrb.mxu1 %v5282_v11 }
 0x523   : > { %6474 = vst [vmem:[#allocation23_spill] sm:$0xff] %v5282_v11  ;;  %2194 = vrot.lane.b32.xlu1 %v5258_v41, %s6447_s18  ;;  %2380 = vrot.lane.b32.xlu2 %v5249_v50, %s6445_s19 }
 0x524   : > { %2372 = vrot.lane.b32.xlu0 %v5246_v28, %s6445_s19 }
 0x52b   : > { %2370 = vrot.lane.b32.xlu2 %v5253_v40, %s6445_s19  ;;  %2184 = vrot.lane.b32.xlu1 %v5265_v0, %s6447_s18 }
 0x52c   : > { %2192 = vrot.lane.b32.xlu0 %v5271_v36, %s6447_s18 }
 0x533   : > { %2190 = vrot.lane.b32.xlu2 %v5282_v11, %s6447_s18  ;;  %2378 = vrot.lane.b32.xlu1 %v5258_v41, %s6445_s19 }
 0x534   : > { %2182 = vrot.lane.b32.xlu0 %v5279_v59, %s6447_s18  ;;  %s4001_s18 = scalar_lea.hbm %s6424_s12, 128 }
 0x53b   : > { %2142 = vrot.lane.b32.xlu2 %v5246_v28, %s6475_s17  ;;  %2368 = vrot.lane.b32.xlu1 %v5265_v0, %s6445_s19 }
 0x53c   : > { %2376 = vrot.lane.b32.xlu0 %v5271_v36, %s6445_s19 }
 0x543   : > { %2374 = vrot.lane.b32.xlu2 %v5282_v11, %s6445_s19  ;;  %2150 = vrot.lane.b32.xlu1 %v5249_v50, %s6475_s17 }
 0x544   : > { %2366 = vrot.lane.b32.xlu0 %v5279_v59, %s6445_s19 }
 0x54b   : > { %2326 = vrot.lane.b32.xlu2 %v5246_v28, %s6476_s20  ;;  %2140 = vrot.lane.b32.xlu1 %v5253_v40, %s6475_s17 }
 0x54c   : > { %2148 = vrot.lane.b32.xlu0 %v5258_v41, %s6475_s17 }
 0x553   : > { %2146 = vrot.lane.b32.xlu2 %v5271_v36, %s6475_s17  ;;  %2334 = vrot.lane.b32.xlu1 %v5249_v50, %s6476_s20 }
 0x554   : > { %2138 = vrot.lane.b32.xlu0 %v5265_v0, %s6475_s17 }
 0x55b   : > { %2136 = vrot.lane.b32.xlu2 %v5279_v59, %s6475_s17  ;;  %2324 = vrot.lane.b32.xlu1 %v5253_v40, %s6476_s20 }
 0x55c   : > { %2332 = vrot.lane.b32.xlu0 %v5258_v41, %s6476_s20 }
 0x563   : > { %2330 = vrot.lane.b32.xlu2 %v5271_v36, %s6476_s20  ;;  %2144 = vrot.lane.b32.xlu1 %v5282_v11, %s6475_s17 }
 0x564   : > { %2322 = vrot.lane.b32.xlu0 %v5265_v0, %s6476_s20 }
 0x56b   : > { %2320 = vrot.lane.b32.xlu2 %v5279_v59, %s6476_s20  ;;  %2096 = vrot.lane.b32.xlu1 %v5246_v28, %s6477_s26 }
 0x56c   : > { %2104 = vrot.lane.b32.xlu0 %v5249_v50, %s6477_s26 }
 0x573   : > { %2102 = vrot.lane.b32.xlu2 %v5258_v41, %s6477_s26  ;;  %2328 = vrot.lane.b32.xlu1 %v5282_v11, %s6476_s20 }
 0x574   : > { %2094 = vrot.lane.b32.xlu0 %v5253_v40, %s6477_s26 }
 0x575   : > { %v2187_v48 = vpop.permute.xlu2 %2186 }
 0x57b   : > { %2092 = vrot.lane.b32.xlu2 %v5265_v0, %s6477_s26  ;;  %2280 = vrot.lane.b32.xlu1 %v5246_v28, %s6478_s30 }
 0x57c   : > { %2288 = vrot.lane.b32.xlu0 %v5249_v50, %s6478_s30 }
 0x57d   : > { %v2381_v49 = vpop.permute.xlu2 %2380 }
 0x583   : > { %2286 = vrot.lane.b32.xlu2 %v5258_v41, %s6478_s30  ;;  %2100 = vrot.lane.b32.xlu1 %v5271_v36, %s6477_s26 }
 0x584   : > { %2278 = vrot.lane.b32.xlu0 %v5253_v40, %s6478_s30 }
 0x585   : > { %v2371_v12 = vpop.permute.xlu2 %2370 }
 0x58b   : > { %2276 = vrot.lane.b32.xlu2 %v5265_v0, %s6478_s30  ;;  %2090 = vrot.lane.b32.xlu1 %v5279_v59, %s6477_s26 }
 0x58c   : > { %2098 = vrot.lane.b32.xlu0 %v5282_v11, %s6477_s26 }
 0x58d   : > { %v2189_v20 = vpop.permute.xlu1 %2188  ;;  %v2191_v53 = vpop.permute.xlu2 %2190 }
 0x58e   : > { %v2197_v55 = vpop.permute.xlu0 %2196 }
 0x58f   : > { %v2201_v22 = vsel %vm647_vm1, %v2189_v20, %v2197_v55  ;;  %v2205_v31 = vsel %vm647_vm1, %v2197_v55, %v2189_v20 }
 0x590   : > { %v2218_v2 = vmul.f32 %v2208_v9, %v2205_v31  ;;  %v2219_v35 = vmul.f32 %v2209_v14, %v2201_v22 }
 0x592   : > { %2546 = vmatpush.msrb.mxu2 %v2218_v2  ;;  %2604 = vmatpush.msra.mxu0 %v2219_v35 }
 0x593   : > { %2058 = vrot.lane.b32.xlu2 %v5249_v50, %s6479_s16  ;;  %2284 = vrot.lane.b32.xlu1 %v5271_v36, %s6478_s30 }
 0x594   : > { %2050 = vrot.lane.b32.xlu0 %v5246_v28, %s6479_s16 }
 0x595   : > { %v2195_v51 = vpop.permute.xlu1 %2194  ;;  %v5390_v42 = vpop.permute.xlu2 %2142 }
 0x596   : > { %v2200_v25 = vsel %vm647_vm1, %v2187_v48, %v2195_v51  ;;  %v2204_v29 = vsel %vm647_vm1, %v2195_v51, %v2187_v48  ;;  %v2373_v63 = vpop.permute.xlu0 %2372  ;;  %v5451_v48 = vperm.slane %v3710_v32, 1 }
 0x597   : > { %v2216_v60 = vmul.f32 %v2208_v9, %v2204_v29  ;;  %v2217_v52 = vmul.f32 %v2209_v14, %v2200_v25  ;;  %v2385_v43 = vsel %vm839_vm0, %v2373_v63, %v2381_v49  ;;  %v2389_v44 = vsel %vm839_vm0, %v2381_v49, %v2373_v63  ;;  %v3707_v25 = vld [vmem:[%s6415_s3 + $0x30] sm:$0xff]  ;;  %v3714_v29 = vld [vmem:[%s6423_s11 + $0xc] sm:$0x3]  ;;  %v3708_v63 = vld [vmem:[%s6415_s3 + $0x38] sm:$0xff] }
 0x598   : > { %v2402_v26 = vmul.f32 %v5386_v21, %v2385_v43  ;;  %v2403_v54 = vmul.f32 %v5388_v17, %v2389_v44  ;;  %v5494_v43 = vperm.slane %v3714_v29, 1 }
 0x599   : > { %2547 = vmatpush.msrb.mxu2 %v2216_v60  ;;  %2605 = vmatpush.msra.mxu0 %v2217_v52  ;;  %v5492_v52 = vperm.slane %v3714_v29, 0 }
 0x59a   : > { %2575 = vmatpush.msrb.mxu3 %v2402_v26  ;;  %2633 = vmatpush.msra.mxu1 %v2403_v54 }
 0x59b   : > { %2048 = vrot.lane.b32.xlu2 %v5253_v40, %s6479_s16  ;;  %2274 = vrot.lane.b32.xlu1 %v5279_v59, %s6478_s30 }
 0x59c   : > { %2282 = vrot.lane.b32.xlu0 %v5282_v11, %s6478_s30 }
 0x59d   : > { %v2185_v1 = vpop.permute.xlu1 %2184  ;;  %v2375_v62 = vpop.permute.xlu2 %2374 }
 0x59e   : > { %v2193_v4 = vpop.permute.xlu0 %2192 }
 0x59f   : > { %v2199_v8 = vsel %vm647_vm1, %v2185_v1, %v2193_v4  ;;  %v2203_v37 = vsel %vm647_vm1, %v2193_v4, %v2185_v1 }
 0x5a0   : > { %v2214_v61 = vmul.f32 %v2208_v9, %v2203_v37  ;;  %v2215_v16 = vmul.f32 %v2209_v14, %v2199_v8 }
 0x5a2   : > { %2548 = vmatpush.msrb.mxu2 %v2214_v61  ;;  %2606 = vmatpush.msra.mxu0 %v2215_v16 }
 0x5a3   : > { %2242 = vrot.lane.b32.xlu2 %v5249_v50, %s6465_s23  ;;  %2056 = vrot.lane.b32.xlu1 %v5258_v41, %s6479_s16 }
 0x5a4   : > { %2234 = vrot.lane.b32.xlu0 %v5246_v28, %s6465_s23 }
 0x5a5   : > { %v2379_v45 = vpop.permute.xlu1 %2378  ;;  %v5418_v6 = vpop.permute.xlu2 %2326 }
 0x5a6   : > { %v2183_v56 = vpop.permute.xlu0 %2182  ;;  %v2384_v58 = vsel %vm839_vm0, %v2371_v12, %v2379_v45  ;;  %v2388_v27 = vsel %vm839_vm0, %v2379_v45, %v2371_v12  ;;  %v3706_v45 = vld [vmem:[%s6415_s3 + $0x28] sm:$0xff] }
 0x5a7   : > { %v2198_v46 = vsel %vm647_vm1, %v2183_v56, %v2191_v53  ;;  %v2202_v39 = vsel %vm647_vm1, %v2191_v53, %v2183_v56  ;;  %v2400_v23 = vmul.f32 %v5386_v21, %v2384_v58  ;;  %v2401_v15 = vmul.f32 %v5388_v17, %v2388_v27 }
 0x5a8   : > { %v2212_v7 = vmul.f32 %v2208_v9, %v2202_v39  ;;  %v2213_v33 = vmul.f32 %v2209_v14, %v2198_v46 }
 0x5a9   : > { %2576 = vmatpush.msrb.mxu3 %v2400_v23  ;;  %2634 = vmatpush.msra.mxu1 %v2401_v15 }
 0x5aa   : > { %2549 = vmatpush.msrb.mxu2 %v2212_v7  ;;  %2607 = vmatpush.msra.mxu0 %v2213_v33 }
 0x5ab   : > { %2232 = vrot.lane.b32.xlu2 %v5253_v40, %s6465_s23  ;;  %2046 = vrot.lane.b32.xlu1 %v5265_v0, %s6479_s16  ;;  %v3732_v40 = vld [vmem:[%s6423_s11 + $0x2] sm:$0x3] }
 0x5ac   : > { %2054 = vrot.lane.b32.xlu0 %v5271_v36, %s6479_s16 }
 0x5ad   : > { %v2369_v30 = vpop.permute.xlu1 %2368  ;;  %v2147_v57 = vpop.permute.xlu2 %2146 }
 0x5ae   : > { %v2377_v13 = vpop.permute.xlu0 %2376 }
 0x5af   : > { %v2383_v38 = vsel %vm839_vm0, %v2369_v30, %v2377_v13  ;;  %v2387_v47 = vsel %vm839_vm0, %v2377_v13, %v2369_v30 }
 0x5b0   : > { %v2398_v24 = vmul.f32 %v5386_v21, %v2383_v38  ;;  %v2399_v18 = vmul.f32 %v5388_v17, %v2387_v47 }
 0x5b2   : > { %2577 = vmatpush.msrb.mxu3 %v2398_v24  ;;  %2635 = vmatpush.msra.mxu1 %v2399_v18 }
 0x5b3   : > { %2052 = vrot.lane.b32.xlu2 %v5282_v11, %s6479_s16  ;;  %2240 = vrot.lane.b32.xlu1 %v5258_v41, %s6465_s23 }
 0x5b4   : > { %2044 = vrot.lane.b32.xlu0 %v5279_v59, %s6479_s16 }
 0x5b5   : > { %v2151_v49 = vpop.permute.xlu1 %2150  ;;  %v2137_v2 = vpop.permute.xlu2 %2136 }
 0x5b6   : > { %v2367_v12 = vpop.permute.xlu0 %2366  ;;  %v2155_v19 = vsel %vm599_vm2, %v5390_v42, %v2151_v49  ;;  %v2159_v9 = vsel %vm599_vm2, %v2151_v49, %v5390_v42 }
 0x5b7   : > { %v2382_v14 = vsel %vm839_vm0, %v2367_v12, %v2375_v62  ;;  %v2386_v20 = vsel %vm839_vm0, %v2375_v62, %v2367_v12  ;;  %v2172_v53 = vmul.f32 %v5449_v3, %v2159_v9  ;;  %v2173_v55 = vmul.f32 %v5451_v48, %v2155_v19  ;;  %v3709_v12 = vld [vmem:[%s6423_s11 + $0x2] sm:$0x3] }
 0x5b8   : > { %v2396_v22 = vmul.f32 %v5386_v21, %v2382_v14  ;;  %v2397_v31 = vmul.f32 %v5388_v17, %v2386_v20  ;;  %v5537_v19 = vperm.slane %v3709_v12, 0  ;;  %v5539_v9 = vperm.slane %v3709_v12, 1 }
 0x5b9   : > { %2550 = vmatpush.msrb.mxu2 %v2172_v53  ;;  %2608 = vmatpush.msra.mxu0 %v2173_v55 }
 0x5ba   : > { %2578 = vmatpush.msrb.mxu3 %v2396_v22  ;;  %2636 = vmatpush.msra.mxu1 %v2397_v31 }
 0x5bb   : > { %2228 = vrot.lane.b32.xlu2 %v5279_v59, %s6465_s23  ;;  %2230 = vrot.lane.b32.xlu1 %v5265_v0, %s6465_s23 }
 0x5bc   : > { %2238 = vrot.lane.b32.xlu0 %v5271_v36, %s6465_s23 }
 0x5bd   : > { %v2141_v35 = vpop.permute.xlu1 %2140  ;;  %v2331_v60 = vpop.permute.xlu2 %2330 }
 0x5be   : > { %v2149_v34 = vpop.permute.xlu0 %2148 }
 0x5bf   : > { %v2154_v21 = vsel %vm599_vm2, %v2141_v35, %v2149_v34  ;;  %v2158_v17 = vsel %vm599_vm2, %v2149_v34, %v2141_v35 }
 0x5c0   : > { %v2170_v51 = vmul.f32 %v5449_v3, %v2158_v17  ;;  %v2171_v42 = vmul.f32 %v5451_v48, %v2154_v21 }
 0x5c2   : > { %2551 = vmatpush.msrb.mxu2 %v2170_v51  ;;  %2609 = vmatpush.msra.mxu0 %v2171_v42 }
 0x5c3   : > { %2674 = vperm.xlu2 %3877, %v3707_v25   ;;  %2236 = vrot.lane.b32.xlu1 %v5282_v11, %s6465_s23 }
 0x5c4   : > { %2679 = vperm.xlu0 %3878, %v3708_v63   ;;  %v3713_v63 = vld [vmem:[%s6423_s11 + $0xa] sm:$0x3] }
 0x5c5   : > { %v2335_v44 = vpop.permute.xlu1 %2334  ;;  %v2321_v56 = vpop.permute.xlu2 %2320 }
 0x5c6   : > { %v2139_v26 = vpop.permute.xlu0 %2138  ;;  %v2339_v54 = vsel %vm791_vm3, %v5418_v6, %v2335_v44  ;;  %v2343_v1 = vsel %vm791_vm3, %v2335_v44, %v5418_v6  ;;  %v3705_v6 = vld [vmem:[%s6415_s3 + $0x20] sm:$0xff] }
 0x5c7   : > { %v2153_v62 = vsel %vm599_vm2, %v2139_v26, %v2147_v57  ;;  %v2157_v4 = vsel %vm599_vm2, %v2147_v57, %v2139_v26  ;;  %v2356_v8 = vmul.f32 %v5492_v52, %v2339_v54  ;;  %v2357_v37 = vmul.f32 %v5494_v43, %v2343_v1  ;;  %v3701_v44 = vld [vmem:[%s6414_s2 + $0x20] sm:$0xff] }
 0x5c8   : > { %v2168_v61 = vmul.f32 %v5449_v3, %v2157_v4  ;;  %v2169_v16 = vmul.f32 %v5451_v48, %v2153_v62  ;;  %3716 = vmatmul.msk.f32.vlgmr.msrb.gmra.mxu0 %vm6480_vm5, %v3701_v44  ;;  %3720 = vmatmul.msk.f32.vlgmr.msrb.gmra.mxu1 %vm6481_vm6, %v3701_v44  ;;  %vm6491_vm6 = vmmov %vm6486_vm11 }
 0x5c9   : > { %2579 = vmatpush.msrb.mxu3 %v2356_v8  ;;  %2637 = vmatpush.msra.mxu1 %v2357_v37  ;;  %v3702_v37 = vld [vmem:[%s6414_s2 + $0x28] sm:$0xff] }
 0x5ca   : > { %2552 = vmatpush.msrb.mxu2 %v2168_v61  ;;  %2610 = vmatpush.msra.mxu0 %v2169_v16 }
 0x5cb   : > { %2669 = vperm.xlu1 %3876, %v3706_v45  }
 0x5cc   : > { %2664 = vperm.xlu0 %3878, %v3705_v6  }
 0x5cd   : > { %v2325_v58 = vpop.permute.xlu1 %2324  ;;  %v2103_v33 = vpop.permute.xlu2 %2102 }
 0x5ce   : > { %v2333_v27 = vpop.permute.xlu0 %2332 }
 0x5cf   : > { %v2338_v46 = vsel %vm791_vm3, %v2325_v58, %v2333_v27  ;;  %v2342_v39 = vsel %vm791_vm3, %v2333_v27, %v2325_v58 }
 0x5d0   : > { %v2354_v23 = vmul.f32 %v5492_v52, %v2338_v46  ;;  %v2355_v15 = vmul.f32 %v5494_v43, %v2342_v39  ;;  %3717 = vmatmul.msk.f32.gmra.mxu0 %vm6484_vm15, %v3702_v37  ;;  %3721 = vmatmul.msk.f32.gmra.mxu1 %vm6485_vm9, %v3702_v37  ;;  %vm6495_vm9 = vmmov %vm6491_vm6 }
 0x5d2   : > { %2580 = vmatpush.msrb.mxu3 %v2354_v23  ;;  %2638 = vmatpush.msra.mxu1 %v2355_v15 }
 0x5d5   : > { %v2145_v7 = vpop.permute.xlu1 %2144  ;;  %v2093_v53 = vpop.permute.xlu2 %2092 }
 0x5d6   : > { %v2323_v30 = vpop.permute.xlu0 %2322  ;;  %v2152_v13 = vsel %vm599_vm2, %v2137_v2, %v2145_v7  ;;  %v2156_v57 = vsel %vm599_vm2, %v2145_v7, %v2137_v2  ;;  %v3703_v7 = vld [vmem:[%s6414_s2 + $0x30] sm:$0xff] }
 0x5d7   : > { %v2337_v38 = vsel %vm791_vm3, %v2323_v30, %v2331_v60  ;;  %v2341_v47 = vsel %vm791_vm3, %v2331_v60, %v2323_v30  ;;  %v2166_v24 = vmul.f32 %v5449_v3, %v2156_v57  ;;  %v2167_v18 = vmul.f32 %v5451_v48, %v2152_v13 }
 0x5d8   : > { %v2352_v32 = vmul.f32 %v5492_v52, %v2337_v38  ;;  %v2353_v49 = vmul.f32 %v5494_v43, %v2341_v47  ;;  %3718 = vmatmul.msk.f32.gmra.mxu0 %vm6488_vm10, %v3703_v7  ;;  %3722 = vmatmul.msk.f32.gmra.mxu1 %vm6489_vm7, %v3703_v7  ;;  %vm6499_vm7 = vcmp.lt.s32.totalorder %v4317_v10, 127 }
 0x5d9   : > { %2553 = vmatpush.msrb.mxu2 %v2166_v24  ;;  %2611 = vmatpush.msra.mxu0 %v2167_v18  ;;  %v2068_v18 = vld [vmem:[%s6423_s11] sm:$0x3] }
 0x5da   : > { %2581 = vmatpush.msrb.mxu3 %v2352_v32  ;;  %2639 = vmatpush.msra.mxu1 %v2353_v49  ;;  %v3704_v32 = vld [vmem:[%s6414_s2 + $0x38] sm:$0xff]  ;;  %v2070_v49 = vperm.slane %v2068_v18, 0  ;;  %v2071_v12 = vperm.slane %v2068_v18, 1 }
 0x5dd   : > { %v2097_v14 = vpop.permute.xlu1 %2096  ;;  %v2287_v60 = vpop.permute.xlu2 %2286 }
 0x5de   : > { %v2105_v3 = vpop.permute.xlu0 %2104 }
 0x5df   : > { %v2109_v48 = vsel %vm551_vm4, %v2097_v14, %v2105_v3  ;;  %v2113_v20 = vsel %vm551_vm4, %v2105_v3, %v2097_v14 }
 0x5e0   : > { %v2126_v55 = vmul.f32 %v5537_v19, %v2113_v20  ;;  %v2127_v22 = vmul.f32 %v5539_v9, %v2109_v48  ;;  %3719 = vmatmul.msk.f32.gmra.mxu0 %vm6490_vm8, %v3704_v32  ;;  %3723 = vmatmul.msk.f32.gmra.mxu1 %vm6480_vm5, %v3704_v32  ;;  %vm6500_vm8 = vmmov %vm6499_vm7 }
 0x5e2   : > { %2554 = vmatpush.msrb.mxu2 %v2126_v55  ;;  %2612 = vmatpush.msra.mxu0 %v2127_v22 }
 0x5e5   : > { %v2329_v31 = vpop.permute.xlu1 %2328  ;;  %v2277_v61 = vpop.permute.xlu2 %2276 }
 0x5e6   : > { %v2095_v2 = vpop.permute.xlu0 %2094  ;;  %v2336_v35 = vsel %vm791_vm3, %v2321_v56, %v2329_v31  ;;  %v2340_v34 = vsel %vm791_vm3, %v2329_v31, %v2321_v56 }
 0x5e7   : > { %v2108_v21 = vsel %vm551_vm4, %v2095_v2, %v2103_v33  ;;  %v2112_v17 = vsel %vm551_vm4, %v2103_v33, %v2095_v2  ;;  %v2350_v51 = vmul.f32 %v5492_v52, %v2336_v35  ;;  %v2351_v42 = vmul.f32 %v5494_v43, %v2340_v34 }
 0x5e8   : > { %v2124_v25 = vmul.f32 %v5537_v19, %v2112_v17  ;;  %v2125_v29 = vmul.f32 %v5539_v9, %v2108_v21  ;;  %v5567_v52 = vperm.slane %v3713_v63, 0  ;;  %v5569_v43 = vperm.slane %v3713_v63, 1 }
 0x5e9   : > { %2582 = vmatpush.msrb.mxu3 %v2350_v51  ;;  %2640 = vmatpush.msra.mxu1 %v2351_v42 }
 0x5ea   : > { %2555 = vmatpush.msrb.mxu2 %v2124_v25  ;;  %2613 = vmatpush.msra.mxu0 %v2125_v29  ;;  %v3712_v25 = vld [vmem:[%s6423_s11 + $0x8] sm:$0x3] }
 0x5eb   : > { %v2254_v63 = vperm.slane %v3712_v25, 0 }
 0x5ed   : > { %v2281_v26 = vpop.permute.xlu1 %2280  ;;  %v2059_v30 = vpop.permute.xlu2 %2058 }
 0x5ee   : > { %v2289_v54 = vpop.permute.xlu0 %2288 }
 0x5ef   : > { %v2293_v1 = vsel %vm6482_vm13, %v2281_v26, %v2289_v54  ;;  %v2297_v62 = vsel %vm6483_vm14, %v2289_v54, %v2281_v26  ;;  %vm6492_vm13 = vmmov %vm6491_vm6  ;;  %vm6493_vm14 = vcmp.lt.s32.totalorder %v4317_v10, 17 }
 0x5f0   : > { %v2310_v4 = vmul.f32 %v5567_v52, %v2293_v1  ;;  %v2311_v8 = vmul.f32 %v5569_v43, %v2297_v62  ;;  %vm6494_vm15 = vmmov %vm6493_vm14 }
 0x5f2   : > { %2583 = vmatpush.msrb.mxu3 %v2310_v4  ;;  %2641 = vmatpush.msra.mxu1 %v2311_v8 }
 0x5f5   : > { %v2101_v16 = vpop.permute.xlu1 %2100  ;;  %v2049_v22 = vpop.permute.xlu2 %2048 }
 0x5f6   : > { %v2279_v45 = vpop.permute.xlu0 %2278  ;;  %v2107_v6 = vsel %vm551_vm4, %v2093_v53, %v2101_v16  ;;  %v2111_v56 = vsel %vm551_vm4, %v2101_v16, %v2093_v53 }
 0x5f7   : > { %v2292_v58 = vsel %vm6486_vm11, %v2279_v45, %v2287_v60  ;;  %v2296_v27 = vsel %vm6487_vm12, %v2287_v60, %v2279_v45  ;;  %v2122_v46 = vmul.f32 %v5537_v19, %v2111_v56  ;;  %v2123_v39 = vmul.f32 %v5539_v9, %v2107_v6  ;;  %vm6496_vm11 = vmmov %vm6491_vm6 }
 0x5f8   : > { %v2308_v23 = vmul.f32 %v5567_v52, %v2292_v58  ;;  %v2309_v15 = vmul.f32 %v5569_v43, %v2296_v27  ;;  %v2255_v60 = vperm.slane %v3712_v25, 1  ;;  %vm6497_vm12 = vmmov %vm6493_vm14 }
 0x5f9   : > { %2556 = vmatpush.msrb.mxu2 %v2122_v46  ;;  %2614 = vmatpush.msra.mxu0 %v2123_v39  ;;  %vm6498_vm10 = vmmov %vm6497_vm12 }
 0x5fa   : > { %2584 = vmatpush.msrb.mxu3 %v2308_v23  ;;  %2642 = vmatpush.msra.mxu1 %v2309_v15  ;;  %vm6501_vm5 = vmmov %vm6498_vm10 }
 0x5fd   : > { %v2091_v33 = vpop.permute.xlu1 %2090  ;;  %v2243_v29 = vpop.permute.xlu2 %2242 }
 0x5fe   : > { %v2099_v13 = vpop.permute.xlu0 %2098 }
 0x5ff   : > { %v2106_v57 = vsel %vm551_vm4, %v2091_v33, %v2099_v13  ;;  %v2110_v38 = vsel %vm551_vm4, %v2099_v13, %v2091_v33 }
 0x600   : > { %v2120_v47 = vmul.f32 %v5537_v19, %v2110_v38  ;;  %v2121_v24 = vmul.f32 %v5539_v9, %v2106_v57 }
 0x602   : > { %2557 = vmatpush.msrb.mxu2 %v2120_v47  ;;  %2615 = vmatpush.msra.mxu0 %v2121_v24  ;;  %v2026_v24 = vld [vmem:[#allocation3 + $0x40] sm:$0xff] }
 0x605   : > { %v2285_v14 = vpop.permute.xlu1 %2284 }
 0x606   : > { %v2051_v19 = vpop.permute.xlu0 %2050  ;;  %v2291_v9 = vsel %vm6491_vm6, %v2277_v61, %v2285_v14  ;;  %v2295_v3 = vsel %vm6492_vm13, %v2285_v14, %v2277_v61  ;;  %v2233_v61 = vpop.permute.xlu2 %2232  ;;  %vm6502_vm6 = vmmov %vm6501_vm5 }
 0x607   : > { %v2063_v48 = vsel %vm6493_vm14, %v2051_v19, %v2059_v30  ;;  %v2067_v20 = vsel %vm6494_vm15, %v2059_v30, %v2051_v19  ;;  %v2306_v53 = vmul.f32 %v5567_v52, %v2291_v9  ;;  %v2307_v55 = vmul.f32 %v5569_v43, %v2295_v3  ;;  %vm6503_vm13 = vmmov %vm6499_vm7 }
 0x608   : > { %v2080_v31 = vmul.f32 %v2070_v49, %v2067_v20  ;;  %v2081_v2 = vmul.f32 %v2071_v12, %v2063_v48  ;;  %vm6504_vm14 = vmmov %vm6499_vm7  ;;  %v2028_v48 = vld [vmem:[#allocation3 + $0x50] sm:$0xff] }
 0x609   : > { %2585 = vmatpush.msrb.mxu3 %v2306_v53  ;;  %2643 = vmatpush.msra.mxu1 %v2307_v55  ;;  %vm6505_vm15 = vmmov %vm6501_vm5 }
 0x60a   : > { %2558 = vmatpush.msrb.mxu2 %v2080_v31  ;;  %2616 = vmatpush.msra.mxu0 %v2081_v2  ;;  %v2027_v31 = vld [vmem:[#allocation3 + $0x48] sm:$0xff]  ;;  %v2030_v2 = vld [vmem:[#allocation3 + $0x60] sm:$0xff] }
 0x60d   : > { %v2275_v35 = vpop.permute.xlu1 %2274 }
 0x60e   : > { %v2283_v34 = vpop.permute.xlu0 %2282  ;;  %v2053_v39 = vpop.permute.xlu2 %2052 }
 0x60f   : > { %v2290_v21 = vsel %vm6495_vm9, %v2275_v35, %v2283_v34  ;;  %v2294_v17 = vsel %vm6496_vm11, %v2283_v34, %v2275_v35  ;;  %vm6506_vm9 = vmmov %vm6501_vm5  ;;  %v2029_v35 = vld [vmem:[#allocation3 + $0x58] sm:$0xff]  ;;  %v2032_v34 = vld [vmem:[#allocation3 + $0x70] sm:$0xff] }
 0x610   : > { %v2304_v51 = vmul.f32 %v5567_v52, %v2290_v21  ;;  %v2305_v42 = vmul.f32 %v5569_v43, %v2294_v17  ;;  %vm6507_vm11 = vmmov %vm6499_vm7  ;;  %v2031_v21 = vld [vmem:[#allocation3 + $0x68] sm:$0xff]  ;;  %v2033_v17 = vld [vmem:[#allocation3 + $0x78] sm:$0xff] }
 0x612   : > { %2586 = vmatpush.msrb.mxu3 %v2304_v51  ;;  %2644 = vmatpush.msra.mxu1 %v2305_v42 }
 0x615   : > { %v2057_v44 = vpop.permute.xlu1 %2056 }
 0x616   : > { %v2235_v26 = vpop.permute.xlu0 %2234  ;;  %v2062_v54 = vsel %vm6497_vm12, %v2049_v22, %v2057_v44  ;;  %v2066_v1 = vsel %vm6498_vm10, %v2057_v44, %v2049_v22  ;;  %vm6508_vm12 = vmmov %vm6499_vm7 }
 0x617   : > { %v2247_v52 = vsel %vm6499_vm7, %v2235_v26, %v2243_v29  ;;  %v2251_v43 = vsel %vm6500_vm8, %v2243_v29, %v2235_v26  ;;  %v2078_v62 = vmul.f32 %v2070_v49, %v2066_v1  ;;  %v2079_v4 = vmul.f32 %v2071_v12, %v2062_v54  ;;  %vm6509_vm10 = vmmov %vm6499_vm7 }
 0x618   : > { %v2264_v8 = vmul.f32 %v2254_v63, %v2247_v52  ;;  %v2265_v37 = vmul.f32 %v2255_v60, %v2251_v43  ;;  %vm6512_vm8 = vcmp.lt.s32.totalorder %v4317_v10, 113 }
 0x619   : > { %2559 = vmatpush.msrb.mxu2 %v2078_v62  ;;  %2617 = vmatpush.msra.mxu0 %v2079_v4 }
 0x61a   : > { %2587 = vmatpush.msrb.mxu3 %v2264_v8  ;;  %2645 = vmatpush.msra.mxu1 %v2265_v37 }
 0x61d   : > { %v2047_v16 = vpop.permute.xlu1 %2046 }
 0x61e   : > { %v2055_v45 = vpop.permute.xlu0 %2054 }
 0x61f   : > { %v2061_v6 = vsel %vm6501_vm5, %v2047_v16, %v2055_v45  ;;  %v2065_v56 = vsel %vm6502_vm6, %v2055_v45, %v2047_v16  ;;  %vm6513_vm5 = vmmov %vm6512_vm8 }
 0x620   : > { %v2076_v58 = vmul.f32 %v2070_v49, %v2065_v56  ;;  %v2077_v27 = vmul.f32 %v2071_v12, %v2061_v6 }
 0x622   : > { %2560 = vmatpush.msrb.mxu2 %v2076_v58  ;;  %2618 = vmatpush.msra.mxu0 %v2077_v27 }
 0x625   : > { %v2241_v46 = vpop.permute.xlu1 %2240 }
 0x626   : > { %v2045_v23 = vpop.permute.xlu0 %2044  ;;  %v2246_v15 = vsel %vm6503_vm13, %v2233_v61, %v2241_v46  ;;  %v2250_v7 = vsel %vm6504_vm14, %v2241_v46, %v2233_v61  ;;  %vm6514_vm13 = vmmov %vm6502_vm6 }
 0x627   : > { %v2060_v33 = vsel %vm6505_vm15, %v2045_v23, %v2053_v39  ;;  %v2064_v30 = vsel %vm6506_vm9, %v2053_v39, %v2045_v23  ;;  %v2262_v13 = vmul.f32 %v2254_v63, %v2246_v15  ;;  %v2263_v57 = vmul.f32 %v2255_v60, %v2250_v7  ;;  %vm6515_vm14 = vmmov %vm6513_vm5 }
 0x628   : > { %v2074_v38 = vmul.f32 %v2070_v49, %v2064_v30  ;;  %v2075_v47 = vmul.f32 %v2071_v12, %v2060_v33  ;;  %v2229_v49 = vpop.permute.xlu2 %2228  ;;  %vm6516_vm15 = vmmov %vm6513_vm5  ;;  %vm6517_vm9 = vcmask 261120  }
 0x629   : > { %2588 = vmatpush.msrb.mxu3 %v2262_v13  ;;  %2646 = vmatpush.msra.mxu1 %v2263_v57 }
 0x62a   : > { %2561 = vmatpush.msrb.mxu2 %v2074_v38  ;;  %2619 = vmatpush.msra.mxu0 %v2075_v47 }
 0x62b   : > { %2562 = vmatmul.f32.vlgmr.msrb.gmra.mxu2 %v2026_v24  ;;  %2620 = vmatmul.f32.vlgmr.msra.gmra.mxu0 %v2026_v24 }
 0x62d   : > { %v2231_v18 = vpop.permute.xlu1 %2230 }
 0x62e   : > { %v2239_v32 = vpop.permute.xlu0 %2238 }
 0x62f   : > { %v2245_v14 = vsel %vm6507_vm11, %v2231_v18, %v2239_v32  ;;  %v2249_v19 = vsel %vm6508_vm12, %v2239_v32, %v2231_v18  ;;  %vm6518_vm11 = vmmov %vm6517_vm9 }
 0x630   : > { %v2260_v9 = vmul.f32 %v2254_v63, %v2245_v14  ;;  %v2261_v3 = vmul.f32 %v2255_v60, %v2249_v19  ;;  %v2675_v19 = vpop.permute.xlu2 %2674  ;;  %vm6519_vm12 = vmmov %vm6517_vm9 }
 0x632   : > { %2589 = vmatpush.msrb.mxu3 %v2260_v9  ;;  %2647 = vmatpush.msra.mxu1 %v2261_v3 }
 0x633   : > { %2565 = vmatmul.f32.gmra.mxu2 %v2028_v48  ;;  %2623 = vmatmul.f32.gmra.mxu0 %v2028_v48 }
 0x635   : > { %v2237_v12 = vpop.permute.xlu1 %2236 }
 0x636   : > { %v2244_v20 = vsel %vm6509_vm10, %v2229_v49, %v2237_v12  ;;  %v2248_v53 = vsel %vm6499_vm7, %v2237_v12, %v2229_v49  ;;  %v2680_v1 = vpop.permute.xlu0 %2679  ;;  %vm6520_vm10 = vmmov %vm6517_vm9 }
 0x637   : > { %v2258_v55 = vmul.f32 %v2254_v63, %v2244_v20  ;;  %v2259_v22 = vmul.f32 %v2255_v60, %v2248_v53 }
 0x639   : > { %2590 = vmatpush.msrb.mxu3 %v2258_v55  ;;  %2648 = vmatpush.msra.mxu1 %v2259_v22 }
 0x63a   : > { %2591 = vmatmul.f32.vlgmr.msrb.gmra.mxu3 %v2027_v31  ;;  %2649 = vmatmul.f32.vlgmr.msra.gmra.mxu1 %v2027_v31 }
 0x63b   : > { %2568 = vmatmul.f32.gmra.mxu2 %v2030_v2  ;;  %2626 = vmatmul.f32.gmra.mxu0 %v2030_v2 }
 0x63d   : > { %v2670_v12 = vpop.permute.xlu1 %2669 }
 0x63e   : > { %v2665_v37 = vpop.permute.xlu0 %2664 }
 0x642   : > { %2594 = vmatmul.f32.gmra.mxu3 %v2029_v35  ;;  %2652 = vmatmul.f32.gmra.mxu1 %v2029_v35 }
 0x643   : > { %2571 = vmatmul.f32.gmra.mxu2 %v2032_v34  ;;  %2629 = vmatmul.f32.gmra.mxu0 %v2032_v34 }
 0x645   : > { %v2505_v51 = vpop.f32.mrf.mxu0  ;;  %v2534_v25 = vpop.f32.mrf.mxu1 }
 0x64a   : > { %2597 = vmatmul.f32.gmra.mxu3 %v2031_v21  ;;  %2655 = vmatmul.f32.gmra.mxu1 %v2031_v21 }
 0x64d   : > { %v2508_v42 = vpop.f32.mrf.mxu0  ;;  %v2537_v63 = vpop.f32.mrf.mxu1 }
 0x652   : > { %2600 = vmatmul.f32.gmra.mxu3 %v2033_v17  ;;  %2658 = vmatmul.f32.gmra.mxu1 %v2033_v17 }
 0x655   : > { %v2511_v29 = vpop.f32.mrf.mxu0  ;;  %v2540_v44 = vpop.f32.mrf.mxu1 }
 0x65d   : > { %v2514_v60 = vpop.f32.mrf.mxu0  ;;  %v2543_v54 = vpop.f32.mrf.mxu1 }
 0x6a8   : > { %v2621_v26 = vpop.f32.mrf.mxu0 }
 0x6a9   : > { %v2622_v43 = vadd.f32 %v2621_v26, %v2534_v25 }
 0x6ae   : > { %v2563_v52 = vpop.f32.mrf.mxu2 }
 0x6af   : > { %v2564_v27 = vadd.f32 %v2563_v52, %v2505_v51 }
 0x6b0   : > { %v2624_v62 = vpop.f32.mrf.mxu0 }
 0x6b1   : > { %v2625_v38 = vadd.f32 %v2624_v62, %v2537_v63 }
 0x6b6   : > { %v2566_v45 = vpop.f32.mrf.mxu2 }
 0x6b7   : > { %v2650_v4 = vpop.f32.mrf.mxu1  ;;  %v2567_v20 = vadd.f32 %v2566_v45, %v2508_v42 }
 0x6b8   : > { %v2651_v8 = vadd.f32 %v2650_v4, %v2622_v43  ;;  %v2627_v58 = vpop.f32.mrf.mxu0 }
 0x6b9   : > { %v2628_v30 = vadd.f32 %v2627_v58, %v2540_v44 }
 0x6ba   : > { %v2683_v61 = vadd.f32 %v2665_v37, %v2651_v8 }
 0x6bc   : > { %v5660_v16 = vmax.f32 %v2683_v61, 0.0 }
 0x6bd   : > { %v2592_v6 = vpop.f32.mrf.mxu3 }
 0x6be   : > { %2771 = vrot.lane.b32.xlu1 %v5660_v16, %s6477_s26  ;;  %2817 = vrot.lane.b32.xlu2 %v5660_v16, %s6475_s17  ;;  %v2593_v46 = vadd.f32 %v2592_v6, %v2564_v27  ;;  %v2569_v23 = vpop.f32.mrf.mxu2 }
 0x6bf   : > { %2863 = vrot.lane.b32.xlu0 %v5660_v16, %s6510_s27  ;;  %v2653_v56 = vpop.f32.mrf.mxu1  ;;  %v2570_v3 = vadd.f32 %v2569_v23, %v2511_v29 }
 0x6c0   : > { %v2682_v7 = vadd.f32 %v2665_v37, %v2593_v46  ;;  %v2630_v33 = vpop.f32.mrf.mxu0  ;;  %v2654_v32 = vadd.f32 %v2653_v56, %v2625_v38 }
 0x6c1   : > { %v2631_v47 = vadd.f32 %v2630_v33, %v2543_v54 }
 0x6c2   : > { %v5674_v13 = vmax.f32 %v2682_v7, 0.0  ;;  %v2685_v53 = vadd.f32 %v2670_v12, %v2654_v32 }
 0x6c4   : > { %v5693_v17 = vmax.f32 %v2685_v53, 0.0 }
 0x6c5   : > { %v2595_v39 = vpop.f32.mrf.mxu3 }
 0x6c6   : > { %2955 = vrot.lane.b32.xlu1 %v5660_v16, %s6478_s30  ;;  %3001 = vrot.lane.b32.xlu2 %v5660_v16, %s6476_s20  ;;  %v2572_v9 = vpop.f32.mrf.mxu2  ;;  %v2596_v35 = vadd.f32 %v2595_v39, %v2567_v20 }
 0x6c7   : > { %3047 = vrot.lane.b32.xlu0 %v5660_v16, %s6511_s15  ;;  %v2656_v15 = vpop.f32.mrf.mxu1  ;;  %v2573_v55 = vadd.f32 %v2572_v9, %v2514_v60 }
 0x6c8   : > { %v2657_v24 = vadd.f32 %v2656_v15, %v2628_v30  ;;  %v2684_v25 = vadd.f32 %v2670_v12, %v2596_v35 }
 0x6ca   : > { %v2687_v48 = vadd.f32 %v2675_v19, %v2657_v24  ;;  %v5703_v60 = vmax.f32 %v2684_v25, 0.0 }
 0x6cc   : > { %v5684_v34 = vmax.f32 %v2687_v48, 0.0 }
 0x6cd   : > { %v2598_v57 = vpop.f32.mrf.mxu3 }
 0x6ce   : > { %2763 = vrot.lane.b32.xlu2 %v5674_v13, %s6477_s26  ;;  %2855 = vrot.lane.b32.xlu1 %v5674_v13, %s6510_s27  ;;  %v2599_v22 = vadd.f32 %v2598_v57, %v2570_v3 }
 0x6cf   : > { %2809 = vrot.lane.b32.xlu0 %v5674_v13, %s6475_s17  ;;  %v2659_v18 = vpop.f32.mrf.mxu1 }
 0x6d0   : > { %v2660_v14 = vadd.f32 %v2659_v18, %v2631_v47  ;;  %v2686_v51 = vadd.f32 %v2675_v19, %v2599_v22 }
 0x6d2   : > { %v2689_v49 = vadd.f32 %v2680_v1, %v2660_v14  ;;  %v5699_v63 = vmax.f32 %v2686_v51, 0.0 }
 0x6d4   : > { %v5682_v31 = vmax.f32 %v2689_v49, 0.0 }
 0x6d5   : > { %v2601_v2 = vpop.f32.mrf.mxu3 }
 0x6d6   : > { %v2602_v21 = vadd.f32 %v2601_v2, %v2573_v55  ;;  %3202 = vmatpush.msra.mxu3 %v5682_v31  ;;  %2947 = vrot.lane.b32.xlu2 %v5674_v13, %s6478_s30 }
 0x6d7   : > { %2993 = vrot.lane.b32.xlu0 %v5674_v13, %s6476_s20  ;;  %3039 = vrot.lane.b32.xlu1 %v5674_v13, %s6511_s15 }
 0x6d8   : > { %v2688_v42 = vadd.f32 %v2680_v1, %v2602_v21  ;;  %3203 = vmatpush.msra.mxu3 %v5684_v34  ;;  %v3729_v21 = vld [vmem:[%s6418_s6 + $0x28] sm:$0xff] }
 0x6da   : > { %v5696_v29 = vmax.f32 %v2688_v42, 0.0  ;;  %3204 = vmatpush.msra.mxu3 %v5693_v17 }
 0x6dc   : > { %3173 = vmatpush.msra.mxu2 %v5696_v29  ;;  %3205 = vmatpush.msra.mxu3 %v5660_v16 }
 0x6de   : > { %2773 = vrot.lane.b32.xlu2 %v5693_v17, %s6477_s26  ;;  %3174 = vmatpush.msra.mxu2 %v5699_v63 }
 0x6df   : > { %2819 = vrot.lane.b32.xlu0 %v5693_v17, %s6475_s17  ;;  %2865 = vrot.lane.b32.xlu1 %v5693_v17, %s6510_s27 }
 0x6e0   : > { %3175 = vmatpush.msra.mxu2 %v5703_v60 }
 0x6e2   : > { %3176 = vmatpush.msra.mxu2 %v5674_v13 }
 0x6e6   : > { %2957 = vrot.lane.b32.xlu2 %v5693_v17, %s6478_s30 }
 0x6e7   : > { %3003 = vrot.lane.b32.xlu0 %v5693_v17, %s6476_s20  ;;  %3049 = vrot.lane.b32.xlu1 %v5693_v17, %s6511_s15 }
 0x6ee   : > { %2857 = vrot.lane.b32.xlu2 %v5703_v60, %s6510_s27 }
 0x6ef   : > { %2765 = vrot.lane.b32.xlu0 %v5703_v60, %s6477_s26  ;;  %2727 = vrot.lane.b32.xlu1 %v5693_v17, %s6479_s16 }
 0x6f6   : > { %3041 = vrot.lane.b32.xlu2 %v5703_v60, %s6511_s15 }
 0x6f7   : > { %2949 = vrot.lane.b32.xlu0 %v5703_v60, %s6478_s30  ;;  %2811 = vrot.lane.b32.xlu1 %v5703_v60, %s6475_s17 }
 0x6fe   : > { %2719 = vrot.lane.b32.xlu2 %v5703_v60, %s6479_s16 }
 0x6ff   : > { %2995 = vrot.lane.b32.xlu1 %v5703_v60, %s6476_s20  ;;  %2775 = vrot.lane.b32.xlu0 %v5684_v34, %s6477_s26 }
 0x706   : > { %2867 = vrot.lane.b32.xlu2 %v5684_v34, %s6510_s27 }
 0x707   : > { %2959 = vrot.lane.b32.xlu0 %v5684_v34, %s6478_s30  ;;  %2821 = vrot.lane.b32.xlu1 %v5684_v34, %s6475_s17 }
 0x70e   : > { %3051 = vrot.lane.b32.xlu2 %v5684_v34, %s6511_s15 }
 0x70f   : > { %3005 = vrot.lane.b32.xlu1 %v5684_v34, %s6476_s20  ;;  %2859 = vrot.lane.b32.xlu0 %v5699_v63, %s6510_s27 }
 0x716   : > { %2729 = vrot.lane.b32.xlu2 %v5684_v34, %s6479_s16 }
 0x717   : > { %2767 = vrot.lane.b32.xlu1 %v5699_v63, %s6477_s26  ;;  %3043 = vrot.lane.b32.xlu0 %v5699_v63, %s6511_s15 }
 0x718   : > { %v2818_v44 = vpop.permute.xlu2 %2817 }
 0x71e   : > { %2813 = vrot.lane.b32.xlu2 %v5699_v63, %s6475_s17 }
 0x71f   : > { %2951 = vrot.lane.b32.xlu1 %v5699_v63, %s6478_s30  ;;  %2721 = vrot.lane.b32.xlu0 %v5699_v63, %s6479_s16 }
 0x720   : > { %v3002_v26 = vpop.permute.xlu2 %3001 }
 0x726   : > { %2997 = vrot.lane.b32.xlu2 %v5699_v63, %s6476_s20 }
 0x727   : > { %2869 = vrot.lane.b32.xlu1 %v5682_v31, %s6510_s27  ;;  %3053 = vrot.lane.b32.xlu0 %v5682_v31, %s6511_s15 }
 0x728   : > { %v2764_v54 = vpop.permute.xlu2 %2763 }
 0x72e   : > { %2823 = vrot.lane.b32.xlu2 %v5682_v31, %s6475_s17 }
 0x72f   : > { %2777 = vrot.lane.b32.xlu1 %v5682_v31, %s6477_s26  ;;  %2731 = vrot.lane.b32.xlu0 %v5682_v31, %s6479_s16 }
 0x730   : > { %v2772_v1 = vpop.permute.xlu1 %2771  ;;  %v2948_v52 = vpop.permute.xlu2 %2947 }
 0x731   : > { %v5776_v43 = vsel %vm551_vm4, %v2764_v54, %v2772_v1  ;;  %v5780_v62 = vsel %vm551_vm4, %v2772_v1, %v2764_v54  ;;  %v2864_v4 = vpop.permute.xlu0 %2863 }
 0x736   : > { %3007 = vrot.lane.b32.xlu2 %v5682_v31, %s6476_s20 }
 0x737   : > { %2961 = vrot.lane.b32.xlu1 %v5682_v31, %s6478_s30  ;;  %2915 = vrot.lane.b32.xlu0 %v5682_v31, %s6465_s23 }
 0x738   : > { %v2956_v8 = vpop.permute.xlu1 %2955  ;;  %v2774_v37 = vpop.permute.xlu2 %2773 }
 0x739   : > { %v5790_v61 = vsel %vm6512_vm8, %v2948_v52, %v2956_v8  ;;  %v5794_v45 = vsel %vm6513_vm5, %v2956_v8, %v2948_v52  ;;  %v3048_v6 = vpop.permute.xlu0 %3047 }
 0x73e   : > { %2861 = vrot.lane.b32.xlu2 %v5696_v29, %s6510_s27  ;;  %s3568_s27 = scalar_lea.hbm %s6424_s12, %s3770_s28 }
 0x73f   : > { %3045 = vrot.lane.b32.xlu1 %v5696_v29, %s6511_s15  ;;  %2815 = vrot.lane.b32.xlu0 %v5696_v29, %s6475_s17  ;;  %s3571_s17 = sshll.u32 %s3568_s27, 4  ;;  %s3572_s17 = int_to_ptr.hbm [resolvable:$true] %s3571_s17 }
 0x740   : > { %v2856_v56 = vpop.permute.xlu1 %2855  ;;  %v2958_v58 = vpop.permute.xlu2 %2957 }
 0x741   : > { %v2810_v27 = vpop.permute.xlu0 %2809  ;;  %v5804_v46 = vsel %vm647_vm1, %v2856_v56, %v2864_v4  ;;  %v5808_v39 = vsel %vm647_vm1, %v2864_v4, %v2856_v56 }
 0x742   : > { %v5812_v23 = vsel %vm599_vm2, %v2810_v27, %v2818_v44  ;;  %v5816_v15 = vsel %vm599_vm2, %v2818_v44, %v2810_v27  ;;  %v3731_v44 = vld [vmem:[%s6418_s6 + $0x38] sm:$0xff] }
 0x746   : > { %2913 = vrot.lane.b32.xlu2 %v5684_v34, %s6465_s23 }
 0x747   : > { %2717 = vrot.lane.b32.xlu1 %v5674_v13, %s6479_s16  ;;  %2999 = vrot.lane.b32.xlu0 %v5696_v29, %s6476_s20  ;;  %s3995_s20 = sshra.s32 %s3572_s17, 4  ;;  %s3996_s20 = int_to_ptr.hbm [resolvable:$true] %s3995_s20 }
 0x748   : > { %v2858_v7 = vpop.permute.xlu2 %2857  ;;  %p4002_p3 = scmp.lt.s32.totalorder %s3996_s20, %s6424_s12 }
 0x749   : > { %v2994_v33 = vpop.permute.xlu0 %2993  ;;  %v3040_v30 = vpop.permute.xlu1 %3039 }
 0x74a   : > { %v5826_v57 = vsel %vm791_vm3, %v2994_v33, %v3002_v26  ;;  %v5830_v38 = vsel %vm791_vm3, %v3002_v26, %v2994_v33  ;;  %v5834_v47 = vsel %vm839_vm0, %v3040_v30, %v3048_v6  ;;  %v5838_v24 = vsel %vm839_vm0, %v3048_v6, %v3040_v30 }
 0x74e   : > { %2769 = vrot.lane.b32.xlu2 %v5696_v29, %s6477_s26 }
 0x74f   : > { %2723 = vrot.lane.b32.xlu1 %v5696_v29, %s6479_s16  ;;  %2905 = vrot.lane.b32.xlu0 %v5699_v63, %s6465_s23 }
 0x750   : > { %v3042_v18 = vpop.permute.xlu2 %3041 }
 0x751   : > { %v2820_v32 = vpop.permute.xlu0 %2819  ;;  %v2866_v14 = vpop.permute.xlu1 %2865 }
 0x752   : > { %v5848_v19 = vsel %vm647_vm1, %v2858_v7, %v2866_v14  ;;  %v5852_v9 = vsel %vm647_vm1, %v2866_v14, %v2858_v7 }
 0x756   : > { %2953 = vrot.lane.b32.xlu2 %v5696_v29, %s6478_s30  ;;  %s3997_s30 = scalar_lea.hbm %s3996_s20, 64 }
 0x757   : > { %2907 = vrot.lane.b32.xlu1 %v5696_v29, %s6465_s23  ;;  %2725 = vrot.lane.b32.xlu0 %v5660_v16, %s6479_s16  ;;  %s438_s16 = sand.u32 1, %s4043_s22   ;;  %p3998_p0 = scmp.ne.s32.totalorder %s3996_s20, %s3997_s30 }
 0x758   : > { %v2720_v3 = vpop.permute.xlu2 %2719  ;;  %s3557_s25 = scalar_lea.sflag [#allocation5], %s438_s16  ;;  %p4003_p4 = scmp.lt.s32.totalorder %s4001_s18, %s3997_s30 }
 0x759   : > { %v3004_v48 = vpop.permute.xlu0 %3003  ;;  %v3050_v49 = vpop.permute.xlu1 %3049  ;;  %p3999_p1 = pnand %p3998_p0, %p4171_p5 }
 0x75a   : > { %v5862_v12 = vsel %vm839_vm0, %v3042_v18, %v3050_v49  ;;  %v5866_v20 = vsel %vm839_vm0, %v3050_v49, %v3042_v18  ;;  %p4004_p7 = por %p4003_p4, %p4002_p3 }
 0x75b   : > { %p4000_p2 = pneg %p3999_p1 }
 0x75d   : > { %p4005_p8 = pnand %p4004_p7, %p4000_p2 }
 0x75e   : > { %2903 = vrot.lane.b32.xlu2 %v5703_v60, %s6465_s23  ;;  %v3730_v60 = vld [vmem:[%s6418_s6 + $0x30] sm:$0xff] }
 0x75f   : > { %2911 = vrot.lane.b32.xlu1 %v5693_v17, %s6465_s23  ;;  %2901 = vrot.lane.b32.xlu0 %v5674_v13, %s6465_s23  ;;  %v3728_v13 = vld [vmem:[%s6418_s6 + $0x20] sm:$0xff] }
 0x760   : > { %v2868_v53 = vpop.permute.xlu2 %2867 }
 0x761   : > { %v2766_v55 = vpop.permute.xlu0 %2765  ;;  %v2728_v22 = vpop.permute.xlu1 %2727 }
 0x762   : > { %v5876_v31 = vsel %vm551_vm4, %v2766_v55, %v2774_v37  ;;  %v5880_v2 = vsel %vm551_vm4, %v2774_v37, %v2766_v55  ;;  %v5884_v35 = vsel %vm6502_vm6, %v2720_v3, %v2728_v22  ;;  %v5888_v34 = vsel %vm6514_vm13, %v2728_v22, %v2720_v3  ;;  %v3724_v3 = vld [vmem:[%s6417_s5 + $0x20] sm:$0xff] }
 0x763   : > { %3739 = vmatmul.msk.f32.vlgmr.msra.gmra.mxu2 %vm6517_vm9, %v3724_v3  ;;  %3743 = vmatmul.msk.f32.vlgmr.msra.gmra.mxu3 %vm6518_vm11, %v3724_v3 }
 0x766   : > { %2909 = vrot.lane.b32.xlu2 %v5660_v16, %s6465_s23  ;;  %s3664_s23 = sshll.u32 %s438_s16, 6 }
 0x767   : > { %3337 = vperm.xlu1 %3876, %v3728_v13   ;;  %3342 = vperm.xlu0 %3878, %v3729_v21   ;;  %s440_s29 = scalar_lea.vmem [#allocation8], %s3664_s23 }
 0x768   : > { %v5898_v17 = vpop.permute.xlu2 %3051  ;;  %s3569_s15 = sshll.u32 %s440_s29, 4  ;;  %s3570_s15 = int_to_ptr.vmem [resolvable:$true] %s3569_s15 }
 0x769   : > { %v2950_v51 = vpop.permute.xlu0 %2949  ;;  %v2812_v42 = vpop.permute.xlu1 %2811 }
 0x76a   : > { %v5902_v25 = vsel %vm6515_vm14, %v2950_v51, %v2958_v58  ;;  %v5906_v29 = vsel %vm6516_vm15, %v2958_v58, %v2950_v51  ;;  %v5910_v63 = vsel %vm599_vm2, %v2812_v42, %v2820_v32  ;;  %v5914_v16 = vsel %vm599_vm2, %v2820_v32, %v2812_v42 }
 0x76e   : > { %3347 = vperm.xlu2 %3877, %v3730_v60  }
 0x76f   : > { %3352 = vperm.xlu1 %3876, %v3731_v44  }
 0x770   : > { %v5922_v26 = vpop.permute.xlu2 %2729 }
 0x771   : > { %v2996_v54 = vpop.permute.xlu1 %2995  ;;  %v5924_v1 = vpop.permute.xlu0 %2775 }
 0x772   : > { %v5928_v52 = vsel %vm791_vm3, %v2996_v54, %v3004_v48  ;;  %v5932_v4 = vsel %vm791_vm3, %v3004_v48, %v2996_v54  ;;  %v3734_v48 = vld [vmem:[%s6423_s11 + $0x6] sm:$0x3]  ;;  %v3725_v54 = vld [vmem:[%s6417_s5 + $0x28] sm:$0xff] }
 0x773   : > { %v2881_v55 = vperm.slane %v3734_v48, 0  ;;  %v2882_v22 = vperm.slane %v3734_v48, 1  ;;  %3740 = vmatmul.msk.f32.gmra.mxu2 %vm6519_vm12, %v3725_v54  ;;  %3744 = vmatmul.msk.f32.gmra.mxu3 %vm6520_vm10, %v3725_v54 }
 0x778   : > { %v5934_v8 = vpop.permute.xlu2 %2813 }
 0x779   : > { %v5936_v37 = vpop.permute.xlu0 %2959  ;;  %v2822_v6 = vpop.permute.xlu1 %2821 }
 0x780   : > { %v5938_v56 = vpop.permute.xlu2 %2997 }
 0x781   : > { %v5940_v58 = vpop.permute.xlu1 %3005  ;;  %v2860_v27 = vpop.permute.xlu0 %2859 }
 0x782   : > { %v2873_v51 = vsel %vm647_vm1, %v2860_v27, %v2868_v53  ;;  %v2877_v42 = vsel %vm647_vm1, %v2868_v53, %v2860_v27  ;;  %v2887_v53 = vmul.f32 %v2881_v55, %v5852_v9  ;;  %v5980_v27 = vmul.f32 %v2882_v22, %v5848_v19  ;;  %v3727_v9 = vld [vmem:[%s6417_s5 + $0x38] sm:$0xff] }
 0x783   : > { %v2889_v50 = vmul.f32 %v2881_v55, %v2877_v42  ;;  %v5975_v28 = vmul.f32 %v2882_v22, %v2873_v51 }
 0x788   : > { %v5942_v7 = vpop.permute.xlu2 %2823 }
 0x789   : > { %v5944_v33 = vpop.permute.xlu1 %2767  ;;  %v3044_v30 = vpop.permute.xlu0 %3043 }
 0x790   : > { %v5946_v18 = vpop.permute.xlu2 %3007 }
 0x791   : > { %v5948_v32 = vpop.permute.xlu1 %2951  ;;  %v5950_v14 = vpop.permute.xlu0 %2721 }
 0x798   : > { %v2862_v49 = vpop.permute.xlu2 %2861 }
 0x799   : > { %v2870_v13 = vpop.permute.xlu1 %2869  ;;  %v3054_v21 = vpop.permute.xlu0 %3053 }
 0x79a   : > { %v2874_v60 = vsel %vm647_vm1, %v2862_v49, %v2870_v13  ;;  %v2878_v44 = vsel %vm647_vm1, %v2870_v13, %v2862_v49  ;;  %v2885_v49 = vmul.f32 %v2881_v55, %v5808_v39  ;;  %v5985_v13 = vmul.f32 %v2882_v22, %v5804_v46  ;;  %vm6521_vm1 = vmmov %vm6517_vm9 }
 0x79b   : > { %v2891_v3 = vmul.f32 %v2881_v55, %v2878_v44  ;;  %v5971_v48 = vmul.f32 %v2882_v22, %v2874_v60  ;;  %vm6522_vm7 = vmmov %vm6521_vm1  ;;  %v3733_v55 = vld [vmem:[%s6423_s11 + $0x4] sm:$0x3]  ;;  %v3738_v22 = vld [vmem:[%s6423_s11 + $0xe] sm:$0x3]  ;;  %vm6533_vm9 = vcmp.lt.s32.totalorder %v4317_v10, 127 }
 0x79c   : > { %vm6523_vm8 = vmmov %vm6521_vm1  ;;  %v2835_v42 = vperm.slane %v3733_v55, 0  ;;  %v2836_v44 = vperm.slane %v3733_v55, 1  ;;  %v3065_v54 = vperm.slane %v3738_v22, 0  ;;  %v2704_v10 = vld [vmem:[#allocation6 + $0x68] sm:$0xff] }
 0x79d   : > { %3219 = vmatpush.msrb.mxu0 %v2891_v3  ;;  %3771 = vmatpush.msrb.mxu2 %v5971_v48  ;;  %vm6524_vm5 = vmmov %vm6521_vm1  ;;  %v3066_v3 = vperm.slane %v3738_v22, 1 }
 0x79e   : > { %vm6534_vm11 = vmmov %vm6533_vm9 }
 0x79f   : > { %3220 = vmatpush.msrb.mxu0 %v2889_v50  ;;  %3772 = vmatpush.msrb.mxu2 %v5975_v28  ;;  %v3726_v50 = vld [vmem:[%s6417_s5 + $0x30] sm:$0xff] }
 0x7a0   : > { %3741 = vmatmul.msk.f32.gmra.mxu2 %vm6521_vm1, %v3726_v50  ;;  %3745 = vmatmul.msk.f32.gmra.mxu3 %vm6522_vm7, %v3726_v50  ;;  %v5998_v46 = vpop.permute.xlu2 %2913  ;;  %v3057_v50 = vsel %vm839_vm0, %v3044_v30, %v5898_v17  ;;  %vm6537_vm1 = vmmov %vm6533_vm9 }
 0x7a1   : > { %v5987_v60 = vpop.permute.xlu1 %2777  ;;  %v5989_v51 = vpop.permute.xlu0 %2731  ;;  %3221 = vmatpush.msrb.mxu0 %v2887_v53  ;;  %3773 = vmatpush.msrb.mxu2 %v5980_v27  ;;  %v2827_v53 = vsel %vm599_vm2, %v5934_v8, %v2822_v6  ;;  %vm6538_vm7 = vmmov %vm6537_vm1 }
 0x7a3   : > { %3222 = vmatpush.msrb.mxu0 %v2885_v49  ;;  %3774 = vmatpush.msrb.mxu2 %v5985_v13  ;;  %v2831_v49 = vsel %vm599_vm2, %v2822_v6, %v5934_v8 }
 0x7a8   : > { %3742 = vmatmul.msk.f32.gmra.mxu2 %vm6523_vm8, %v3727_v9  ;;  %3746 = vmatmul.msk.f32.gmra.mxu3 %vm6524_vm5, %v3727_v9  ;;  %v3061_v9 = vsel %vm839_vm0, %v5898_v17, %v3044_v30  ;;  %v2770_v59 = vpop.permute.xlu2 %2769  ;;  %vm6539_vm8 = vmmov %vm6537_vm1 }
 0x7a9   : > { %v6000_v39 = vpop.permute.xlu1 %2961  ;;  %v6002_v19 = vpop.permute.xlu0 %2915  ;;  %vm6540_vm5 = vmmov %vm6537_vm1 }
 0x7b1   : > { %v3046_v11 = vpop.permute.xlu1 %3045  ;;  %v2816_v55 = vpop.permute.xlu0 %2815 }
 0x7b2   : > { %v3058_v22 = vsel %vm839_vm0, %v3046_v11, %v3054_v21  ;;  %v3062_v36 = vsel %vm839_vm0, %v3054_v21, %v3046_v11  ;;  %v2828_v8 = vsel %vm599_vm2, %v2816_v55, %v5942_v7  ;;  %v2832_v6 = vsel %vm599_vm2, %v5942_v7, %v2816_v55  ;;  %vm6525_vm0 = vmmov %vm6515_vm14 }
 0x7b3   : > { %v3075_v0 = vmul.f32 %v3065_v54, %v3058_v22  ;;  %v6037_v41 = vmul.f32 %v3066_v3, %v3062_v36  ;;  %v2845_v17 = vmul.f32 %v2835_v42, %v2832_v6  ;;  %v6039_v30 = vmul.f32 %v2836_v44, %v2828_v8  ;;  %vm6526_vm2 = vmmov %vm6525_vm0 }
 0x7b4   : > { %v2839_v11 = vmul.f32 %v2835_v42, %v5816_v15  ;;  %v6046_v21 = vmul.f32 %v2836_v44, %v5812_v23  ;;  %v3069_v7 = vmul.f32 %v3065_v54, %v5834_v47  ;;  %v2843_v36 = vmul.f32 %v2835_v42, %v2831_v49  ;;  %vm6531_vm14 = vmmov %vm6525_vm0 }
 0x7b5   : > { %v3073_v55 = vmul.f32 %v3065_v54, %v3057_v50  ;;  %3223 = vmatpush.msrb.mxu0 %v2845_v17  ;;  %3248 = vmatpush.msrb.mxu1 %v3075_v0  ;;  %v6053_v22 = vmul.f32 %v3066_v3, %v5838_v24  ;;  %v6055_v8 = vmul.f32 %v2836_v44, %v2827_v53  ;;  %v2789_v23 = vperm.slane %v3732_v40, 0  ;;  %v2954_v50 = vpop.permute.xlu2 %2953 }
 0x7b6   : > { %v6057_v6 = vmul.f32 %v3066_v3, %v3061_v9  ;;  %3775 = vmatpush.msrb.mxu2 %v6039_v30  ;;  %3787 = vmatpush.msrb.mxu3 %v6037_v41  ;;  %v3071_v15 = vmul.f32 %v3065_v54, %v5862_v12  ;;  %v6063_v47 = vmul.f32 %v3066_v3, %v5866_v20  ;;  %v3019_v0 = vperm.slane %v3737_v5, 0 }
 0x7b7   : > { %v2841_v49 = vmul.f32 %v2835_v42, %v5914_v16  ;;  %3224 = vmatpush.msrb.mxu0 %v2843_v36  ;;  %3249 = vmatpush.msrb.mxu1 %v3073_v55  ;;  %v6067_v24 = vmul.f32 %v2836_v44, %v5910_v63  ;;  %v3011_v53 = vsel %vm791_vm3, %v5938_v56, %v5940_v58  ;;  %v3020_v20 = vperm.slane %v3737_v5, 1 }
 0x7b8   : > { %v2786_v12 = vsel %vm551_vm4, %v5987_v60, %v2770_v59  ;;  %3776 = vmatpush.msrb.mxu2 %v6055_v8  ;;  %3788 = vmatpush.msrb.mxu3 %v6057_v6  ;;  %v3015_v63 = vsel %vm791_vm3, %v5940_v58, %v5938_v56  ;;  %v2781_v16 = vsel %vm551_vm4, %v5944_v33, %v5924_v1  ;;  %v2790_v5 = vperm.slane %v3732_v40, 1 }
 0x7b9   : > { %v2782_v42 = vsel %vm551_vm4, %v2770_v59, %v5987_v60  ;;  %v6089_v44 = vpop.permute.xlu1 %2717  ;;  %v3000_v54 = vpop.permute.xlu0 %2999  ;;  %3225 = vmatpush.msrb.mxu0 %v2841_v49  ;;  %3250 = vmatpush.msrb.mxu1 %v3071_v15  ;;  %v2785_v56 = vsel %vm551_vm4, %v5924_v1, %v5944_v33  ;;  %v2799_v59 = vmul.f32 %v2789_v23, %v2786_v12  ;;  %v3736_v1 = vld [vmem:[%s6423_s11 + $0xa] sm:$0x3] }
 0x7ba   : > { %v3012_v58 = vsel %vm791_vm3, %v3000_v54, %v5946_v18  ;;  %v3016_v3 = vsel %vm791_vm3, %v5946_v18, %v3000_v54  ;;  %3777 = vmatpush.msrb.mxu2 %v6067_v24  ;;  %3789 = vmatpush.msrb.mxu3 %v6063_v47  ;;  %v6108_v33 = vmul.f32 %v2790_v5, %v2782_v42  ;;  %v2741_v18 = vld [vmem:[%s6423_s11] sm:$0x3]  ;;  %v6121_v36 = vperm.slane %v3736_v1, 0  ;;  %vm6527_vm3 = vmmov %vm6502_vm6 }
 0x7bb   : > { %v3029_v60 = vmul.f32 %v3019_v0, %v3012_v58  ;;  %v6103_v40 = vmul.f32 %v3020_v20, %v3016_v3  ;;  %3226 = vmatpush.msrb.mxu0 %v2839_v11  ;;  %3251 = vmatpush.msrb.mxu1 %v3069_v7  ;;  %v3027_v9 = vmul.f32 %v3019_v0, %v3011_v53  ;;  %v6123_v55 = vperm.slane %v3736_v1, 1  ;;  %vm6528_vm4 = vmmov %vm6527_vm3 }
 0x7bc   : > { %3778 = vmatpush.msrb.mxu2 %v6046_v21  ;;  %3790 = vmatpush.msrb.mxu3 %v6053_v22  ;;  %v2797_v17 = vmul.f32 %v2789_v23, %v2785_v56  ;;  %v6115_v11 = vmul.f32 %v3020_v20, %v3015_v63  ;;  %v6117_v7 = vmul.f32 %v2790_v5, %v2781_v16  ;;  %v2743_v16 = vperm.slane %v2741_v18, 0  ;;  %vm6529_vm6 = vmmov %vm6525_vm0 }
 0x7bd   : > { %3227 = vmatpush.msrb.mxu0 %v2799_v59  ;;  %3252 = vmatpush.msrb.mxu1 %v3029_v60  ;;  %v2795_v15 = vmul.f32 %v2789_v23, %v5880_v2  ;;  %v3025_v49 = vmul.f32 %v3019_v0, %v5928_v52  ;;  %v2793_v53 = vmul.f32 %v2789_v23, %v5780_v62  ;;  %v2744_v2 = vperm.slane %v2741_v18, 1  ;;  %vm6530_vm13 = vmmov %vm6527_vm3 }
 0x7be   : > { %3779 = vmatpush.msrb.mxu2 %v6108_v33  ;;  %3791 = vmatpush.msrb.mxu3 %v6103_v40  ;;  %v6129_v12 = vmul.f32 %v2790_v5, %v5776_v43  ;;  %v6132_v63 = vmul.f32 %v2790_v5, %v5876_v31  ;;  %v3023_v42 = vmul.f32 %v3019_v0, %v5826_v57  ;;  %vm6532_vm15 = vmmov %vm6527_vm3 }
 0x7bf   : > { %3228 = vmatpush.msrb.mxu0 %v2797_v17  ;;  %3253 = vmatpush.msrb.mxu1 %v3027_v9  ;;  %v6138_v52 = vmul.f32 %v3020_v20, %v5932_v4  ;;  %v2966_v62 = vsel %vm6525_vm0, %v2954_v50, %v6000_v39  ;;  %v6144_v31 = vmul.f32 %v3020_v20, %v5830_v38  ;;  %vm6535_vm12 = vmmov %vm6527_vm3 }
 0x7c0   : > { %3780 = vmatpush.msrb.mxu2 %v6117_v7  ;;  %3792 = vmatpush.msrb.mxu3 %v6115_v11  ;;  %v2970_v54 = vsel %vm6526_vm2, %v6000_v39, %v2954_v50  ;;  %v2965_v38 = vsel %vm6529_vm6, %v5948_v32, %v5936_v37  ;;  %v2739_v39 = vsel %vm6530_vm13, %v5922_v26, %v5950_v14  ;;  %vm6536_vm10 = vmmov %vm6527_vm3 }
 0x7c1   : > { %v2724_v43 = vpop.permute.xlu1 %2723  ;;  %v2906_v23 = vpop.permute.xlu0 %2905  ;;  %3229 = vmatpush.msrb.mxu0 %v2795_v15  ;;  %3254 = vmatpush.msrb.mxu1 %v3025_v49  ;;  %v2735_v5 = vsel %vm6532_vm15, %v5950_v14, %v5922_v26  ;;  %v2983_v56 = vmul.f32 %v6121_v36, %v2966_v62  ;;  %v6177_v58 = vmul.f32 %v6123_v55, %v2970_v54  ;;  %vm6541_vm0 = vmmov %vm6537_vm1 }
 0x7c2   : > { %v2736_v57 = vsel %vm6527_vm3, %v2724_v43, %v5989_v51  ;;  %v2740_v4 = vsel %vm6528_vm4, %v5989_v51, %v2724_v43  ;;  %3781 = vmatpush.msrb.mxu2 %v6132_v63  ;;  %3793 = vmatpush.msrb.mxu3 %v6138_v52  ;;  %v2969_v51 = vsel %vm6531_vm14, %v5936_v37, %v5948_v32  ;;  %v2904_v37 = vpop.permute.xlu2 %2903  ;;  %v3735_v32 = vld [vmem:[%s6423_s11 + $0x8] sm:$0x3]  ;;  %vm6542_vm2 = vmmov %vm6541_vm0  ;;  %vm6544_vm3 = vcmask 15360  }
 0x7c3   : > { %v2753_v0 = vmul.f32 %v2743_v16, %v2740_v4  ;;  %v6164_v20 = vmul.f32 %v2744_v2, %v2736_v57  ;;  %3230 = vmatpush.msrb.mxu0 %v2793_v53  ;;  %3255 = vmatpush.msrb.mxu1 %v3023_v42  ;;  %v2981_v3 = vmul.f32 %v6121_v36, %v2965_v38  ;;  %v2927_v9 = vperm.slane %v3735_v32, 0  ;;  %vm6545_vm4 = vmmov %vm6544_vm3 }
 0x7c4   : > { %3782 = vmatpush.msrb.mxu2 %v6129_v12  ;;  %3794 = vmatpush.msrb.mxu3 %v6144_v31  ;;  %v2751_v59 = vmul.f32 %v2743_v16, %v2739_v39  ;;  %v6186_v26 = vmul.f32 %v6123_v55, %v2969_v51  ;;  %v6188_v14 = vmul.f32 %v2744_v2, %v2735_v5  ;;  %v2928_v17 = vperm.slane %v3735_v32, 1  ;;  %v2700_v5 = vld [vmem:[#allocation6 + $0x48] sm:$0xff]  ;;  %vm6546_vm6 = vmmov %vm6544_vm3 }
 0x7c5   : > { %3231 = vmatpush.msrb.mxu0 %v2753_v0  ;;  %3256 = vmatpush.msrb.mxu1 %v2983_v56  ;;  %v2749_v60 = vmul.f32 %v2743_v16, %v5888_v34  ;;  %v6194_v1 = vmul.f32 %v2744_v2, %v5884_v35  ;;  %v2979_v50 = vmul.f32 %v6121_v36, %v5902_v25  ;;  %v2702_v56 = vld [vmem:[#allocation6 + $0x58] sm:$0xff]  ;;  %vm6547_vm13 = vmmov %vm6544_vm3 }
 0x7c6   : > { %3783 = vmatpush.msrb.mxu2 %v6164_v20  ;;  %3795 = vmatpush.msrb.mxu3 %v6177_v58  ;;  %v6200_v18 = vmul.f32 %v6123_v55, %v5906_v29  ;;  %v2977_v53 = vmul.f32 %v6121_v36, %v5790_v61  ;;  %v2919_v54 = vsel %vm6537_vm1, %v2906_v23, %v5998_v46  ;;  %v6231_v61 = vld [vmem:[#allocation6 + $0x40] sm:$0xff]  ;;  %vm6548_vm14 = vmmov %vm6544_vm3 }
 0x7c7   : > { %3232 = vmatpush.msrb.mxu0 %v2751_v59  ;;  %3257 = vmatpush.msrb.mxu1 %v2981_v3  ;;  %v2935_v36 = vmul.f32 %v2927_v9, %v2919_v54  ;;  %v2703_v3 = vld [vmem:[#allocation6 + $0x60] sm:$0xff]  ;;  %vm6549_vm15 = vmmov %vm6544_vm3 }
 0x7c8   : > { %3784 = vmatpush.msrb.mxu2 %v6188_v14  ;;  %3796 = vmatpush.msrb.mxu3 %v6186_v26 }
 0x7c9   : > { %v2908_v15 = vpop.permute.xlu1 %2907  ;;  %v2726_v34 = vpop.permute.xlu0 %2725  ;;  %3233 = vmatpush.msrb.mxu0 %v2749_v60  ;;  %3258 = vmatpush.msrb.mxu1 %v2979_v50 }
 0x7ca   : > { %v2920_v35 = vsel %vm6533_vm9, %v2908_v15, %v6002_v19  ;;  %v2924_v25 = vsel %vm6534_vm11, %v6002_v19, %v2908_v15  ;;  %v2733_v29 = vsel %vm6535_vm12, %v6089_v44, %v2726_v34  ;;  %v2737_v49 = vsel %vm6536_vm10, %v2726_v34, %v6089_v44  ;;  %3785 = vmatpush.msrb.mxu2 %v6194_v1  ;;  %vm6550_vm9 = vmmov %vm6544_vm3 }
 0x7cb   : > { %v2937_v42 = vmul.f32 %v2927_v9, %v2920_v35  ;;  %v2747_v62 = vmul.f32 %v2743_v16, %v2737_v49  ;;  %v6218_v43 = vmul.f32 %v2744_v2, %v2733_v29  ;;  %v6222_v19 = vmul.f32 %v6123_v55, %v5794_v45  ;;  %3797 = vmatpush.msrb.mxu3 %v6200_v18  ;;  %v2701_v45 = vld [vmem:[#allocation6 + $0x50] sm:$0xff]  ;;  %v2910_v16 = vpop.permute.xlu2 %2909  ;;  %vm6551_vm11 = vmmov %vm6544_vm3 }
 0x7cc   : > { %v6227_v57 = vmul.f32 %v2928_v17, %v2924_v25  ;;  %v2923_v44 = vsel %vm6538_vm7, %v5998_v46, %v2906_v23  ;;  %3259 = vmatpush.msrb.mxu1 %v2977_v53 }
 0x7cd   : > { %3234 = vmatpush.msrb.mxu0 %v2747_v62  ;;  %3798 = vmatpush.msrb.mxu3 %v6222_v19  ;;  %v6239_v55 = vmul.f32 %v2928_v17, %v2923_v44 }
 0x7ce   : > { %3786 = vmatpush.msrb.mxu2 %v6218_v43  ;;  %3260 = vmatpush.msrb.mxu1 %v2937_v42 }
 0x7cf   : > { %3235 = vmatmul.f32.vlgmr.msrb.gmra.mxu0 %v6231_v61  ;;  %3799 = vmatpush.msrb.mxu3 %v6227_v57 }
 0x7d0   : > { %3277 = vmatpush.msra.mxu0 %v5971_v48  ;;  %3261 = vmatpush.msrb.mxu1 %v2935_v36 }
 0x7d1   : > { %v2912_v46 = vpop.permute.xlu1 %2911  ;;  %v2902_v2 = vpop.permute.xlu0 %2901  ;;  %3296 = vmatmul.f32.vlgmr.msrb.gmra.mxu2 %v2701_v45  ;;  %3800 = vmatpush.msrb.mxu3 %v6239_v55 }
 0x7d2   : > { %3278 = vmatpush.msra.mxu0 %v5975_v28  ;;  %v2918_v23 = vsel %vm6539_vm8, %v2904_v37, %v2912_v46  ;;  %v2922_v4 = vsel %vm6540_vm5, %v2912_v46, %v2904_v37  ;;  %v2917_v38 = vsel %vm6541_vm0, %v2902_v2, %v2910_v16  ;;  %v2921_v48 = vsel %vm6542_vm2, %v2910_v16, %v2902_v2 }
 0x7d3   : > { %v2933_v39 = vmul.f32 %v2927_v9, %v2918_v23  ;;  %v2934_v0 = vmul.f32 %v2928_v17, %v2922_v4  ;;  %v2931_v51 = vmul.f32 %v2927_v9, %v2917_v38  ;;  %v2932_v28 = vmul.f32 %v2928_v17, %v2921_v48  ;;  %v3348_v34 = vpop.permute.xlu2 %3347 }
 0x7d4   : > { %3279 = vmatpush.msra.mxu0 %v5980_v27  ;;  %v2705_v27 = vld [vmem:[#allocation6 + $0x70] sm:$0xff] }
 0x7d5   : > { %3262 = vmatpush.msrb.mxu1 %v2933_v39  ;;  %3801 = vmatpush.msrb.mxu3 %v2934_v0 }
 0x7d6   : > { %3280 = vmatpush.msra.mxu0 %v5985_v13 }
 0x7d7   : > { %3238 = vmatmul.f32.gmra.mxu0 %v2701_v45  ;;  %3263 = vmatpush.msrb.mxu1 %v2931_v51 }
 0x7d8   : > { %3281 = vmatpush.msra.mxu0 %v6039_v30  ;;  %3802 = vmatpush.msrb.mxu3 %v2932_v28 }
 0x7d9   : > { %3264 = vmatmul.f32.vlgmr.msrb.gmra.mxu1 %v2700_v5  ;;  %3325 = vmatmul.f32.vlgmr.msrb.gmra.mxu3 %v2702_v56  ;;  %v3343_v37 = vpop.permute.xlu0 %3342 }
 0x7da   : > { %3282 = vmatpush.msra.mxu0 %v6055_v8  ;;  %3306 = vmatpush.msra.mxu1 %v6037_v41  ;;  %v2706_v41 = vld [vmem:[#allocation6 + $0x78] sm:$0xff] }
 0x7db   : > { %3299 = vmatmul.f32.gmra.mxu2 %v2703_v3 }
 0x7dc   : > { %3283 = vmatpush.msra.mxu0 %v6067_v24  ;;  %3307 = vmatpush.msra.mxu1 %v6057_v6 }
 0x7de   : > { %3284 = vmatpush.msra.mxu0 %v6046_v21  ;;  %3308 = vmatpush.msra.mxu1 %v6063_v47 }
 0x7df   : > { %3241 = vmatmul.f32.gmra.mxu0 %v2703_v3 }
 0x7e0   : > { %3285 = vmatpush.msra.mxu0 %v6108_v33  ;;  %3309 = vmatpush.msra.mxu1 %v6053_v22 }
 0x7e1   : > { %3267 = vmatmul.f32.gmra.mxu1 %v2702_v56  ;;  %3328 = vmatmul.f32.gmra.mxu3 %v2704_v10  ;;  %v3748_v56 = vld [vmem:[%s6419_s7 + $0x28] sm:$0xff] }
 0x7e2   : > { %3286 = vmatpush.msra.mxu0 %v6117_v7  ;;  %3310 = vmatpush.msra.mxu1 %v6103_v40 }
 0x7e3   : > { %3302 = vmatmul.f32.gmra.mxu2 %v2705_v27 }
 0x7e4   : > { %3287 = vmatpush.msra.mxu0 %v6132_v63  ;;  %3311 = vmatpush.msra.mxu1 %v6115_v11 }
 0x7e6   : > { %3288 = vmatpush.msra.mxu0 %v6129_v12  ;;  %3312 = vmatpush.msra.mxu1 %v6138_v52  ;;  %v3178_v13 = vpop.f32.mrf.mxu2  ;;  %v3207_v30 = vpop.f32.mrf.mxu3 }
 0x7e7   : > { %3244 = vmatmul.f32.gmra.mxu0 %v2705_v27 }
 0x7e8   : > { %3289 = vmatpush.msra.mxu0 %v6164_v20  ;;  %3313 = vmatpush.msra.mxu1 %v6144_v31 }
 0x7e9   : > { %3270 = vmatmul.f32.gmra.mxu1 %v2704_v10  ;;  %3331 = vmatmul.f32.gmra.mxu3 %v2706_v41  ;;  %v3747_v10 = vld [vmem:[%s6419_s7 + $0x20] sm:$0xff] }
 0x7ea   : > { %3290 = vmatpush.msra.mxu0 %v6188_v14  ;;  %3314 = vmatpush.msra.mxu1 %v6177_v58 }
 0x7ec   : > { %3291 = vmatpush.msra.mxu0 %v6194_v1  ;;  %3315 = vmatpush.msra.mxu1 %v6186_v26 }
 0x7ee   : > { %3292 = vmatpush.msra.mxu0 %v6218_v43  ;;  %3316 = vmatpush.msra.mxu1 %v6200_v18  ;;  %v3338_v43 = vpop.permute.xlu1 %3337 }
 0x7ef   : > { %3293 = vmatmul.f32.vlgmr.msra.gmra.mxu0 %v6231_v61 }
 0x7f0   : > { %3317 = vmatpush.msra.mxu1 %v6222_v19 }
 0x7f1   : > { %3273 = vmatmul.f32.gmra.mxu1 %v2706_v41 }
 0x7f2   : > { %3318 = vmatpush.msra.mxu1 %v6227_v57 }
 0x7f4   : > { %3319 = vmatpush.msra.mxu1 %v6239_v55 }
 0x7f6   : > { %3320 = vmatpush.msra.mxu1 %v2934_v0  ;;  %v3181_v21 = vpop.f32.mrf.mxu2  ;;  %v3210_v22 = vpop.f32.mrf.mxu3 }
 0x7f7   : > { %v3353_v38 = vpop.permute.xlu1 %3352 }
 0x7f8   : > { %3321 = vmatpush.msra.mxu1 %v2932_v28  ;;  %v6543_v28 = vld [vmem:[#allocation15_spill] sm:$0xff] }
 0x7f9   : > { %3322 = vmatmul.f32.vlgmr.msra.gmra.mxu1 %v2700_v5 }
 0x823   : > { %v3184_v8 = vpop.f32.mrf.mxu2  ;;  %v3213_v6 = vpop.f32.mrf.mxu3 }
 0x82b   : > { %v3187_v24 = vpop.f32.mrf.mxu2  ;;  %v3216_v40 = vpop.f32.mrf.mxu3 }
 0x84c   : > { %v3236_v47 = vpop.f32.mrf.mxu0 }
 0x84d   : > { %v3237_v62 = vadd.f32 %v3236_v47, %v3178_v13 }
 0x854   : > { %v3239_v33 = vpop.f32.mrf.mxu0  ;;  %v3297_v7 = vpop.f32.mrf.mxu2 }
 0x855   : > { %v3298_v12 = vadd.f32 %v3297_v7, %v3210_v22  ;;  %v3240_v52 = vadd.f32 %v3239_v33, %v3181_v21  ;;  %v3749_v22 = vld [vmem:[%s6419_s7 + $0x30] sm:$0xff] }
 0x856   : > { %v3265_v11 = vpop.f32.mrf.mxu1 }
 0x857   : > { %v3266_v19 = vadd.f32 %v3265_v11, %v3237_v62 }
 0x859   : > { %v6294_v45 = vadd.f32 %v3338_v43, %v3266_v19  ;;  %v3755_v19 = vld [vmem:[%s6421_s9 + $0x38] sm:$0xff] }
 0x85c   : > { %v3326_v63 = vpop.f32.mrf.mxu3  ;;  %v3242_v20 = vpop.f32.mrf.mxu0 }
 0x85d   : > { %v3327_v31 = vadd.f32 %v3326_v63, %v3298_v12  ;;  %v3243_v18 = vadd.f32 %v3242_v20, %v3184_v8 }
 0x85e   : > { %v3268_v58 = vpop.f32.mrf.mxu1  ;;  %v3300_v32 = vpop.f32.mrf.mxu2 }
 0x85f   : > { %v3269_v59 = vadd.f32 %v3268_v58, %v3240_v52  ;;  %v6282_v26 = vadd.f32 %v3343_v37, %v3327_v31  ;;  %v3301_v60 = vadd.f32 %v3300_v32, %v3213_v6 }
 0x861   : > { %v6284_v14 = vadd.f32 %v3343_v37, %v3269_v59 }
 0x863   : > { %v3366_v1 = vadd.f32 %v6282_v26, %v6284_v14 }
 0x864   : > { %v3329_v50 = vpop.f32.mrf.mxu3  ;;  %v3245_v35 = vpop.f32.mrf.mxu0 }
 0x865   : > { %v3330_v9 = vadd.f32 %v3329_v50, %v3301_v60  ;;  %3367 = vadd.xlane.f32.xlu2 %v3366_v1  ;;  %v3246_v36 = vadd.f32 %v3245_v35, %v3187_v24  ;;  %v3751_v60 = vld [vmem:[%s6420_s8 + $0x1] sm:$0x1] }
 0x866   : > { %v3271_v17 = vpop.f32.mrf.mxu1  ;;  %v3303_v44 = vpop.f32.mrf.mxu2 }
 0x867   : > { %v3272_v15 = vadd.f32 %v3271_v17, %v3243_v18  ;;  %v6288_v25 = vadd.f32 %v3348_v34, %v3330_v9  ;;  %v3304_v46 = vadd.f32 %v3303_v44, %v3216_v40  ;;  %v3750_v40 = vld [vmem:[%s6419_s7 + $0x38] sm:$0xff]  ;;  %v3754_v9 = vld [vmem:[%s6421_s9 + $0x30] sm:$0xff]  ;;  %v3753_v17 = vld [vmem:[%s6421_s9 + $0x28] sm:$0xff] }
 0x868   : > { %v3757_v44 = vld [vmem:[%s6422_s10 + $0x28] sm:$0xff] }
 0x869   : > { %v6290_v29 = vadd.f32 %v3348_v34, %v3272_v15  ;;  %v3752_v15 = vld [vmem:[%s6421_s9 + $0x20] sm:$0xff] }
 0x86b   : > { %v3369_v49 = vadd.f32 %v6288_v25, %v6290_v29 }
 0x86c   : > { %v3294_v42 = vpop.f32.mrf.mxu0  ;;  %v3332_v16 = vpop.f32.mrf.mxu3 }
 0x86d   : > { %3370 = vadd.xlane.f32.xlu1 %v3369_v49  ;;  %v3295_v54 = vadd.f32 %v3294_v42, %v3207_v30  ;;  %v3333_v4 = vadd.f32 %v3332_v16, %v3304_v46 }
 0x86e   : > { %v3274_v53 = vpop.f32.mrf.mxu1 }
 0x86f   : > { %v3275_v2 = vadd.f32 %v3274_v53, %v3246_v36  ;;  %v6302_v0 = vadd.f32 %v3353_v38, %v3333_v4  ;;  %v3756_v36 = vld [vmem:[%s6422_s10 + $0x20] sm:$0xff] }
 0x871   : > { %v6300_v39 = vadd.f32 %v3353_v38, %v3275_v2 }
 0x873   : > { %v3372_v48 = vadd.f32 %v6302_v0, %v6300_v39 }
 0x876   : > { %v3323_v57 = vpop.f32.mrf.mxu1 }
 0x877   : > { %v3324_v61 = vadd.f32 %v3323_v57, %v3295_v54 }
 0x879   : > { %v6296_v55 = vadd.f32 %v3338_v43, %v3324_v61  ;;  %v3758_v61 = vld [vmem:[%s6422_s10 + $0x30] sm:$0xff] }
 0x87b   : > { %v3363_v23 = vadd.f32 %v6296_v55, %v6294_v45 }
 0x87d   : > { %3364 = vadd.xlane.f32.xlu0 %v3363_v23 }
 0x885   : > { %3373 = vadd.xlane.f32.xlu0 %v3372_v48 }
 0x8d8   : > { %v3368_v51 = vpop.xlane.xlu2 %3367 }
 0x8d9   : > { %v3376_v5 = vmul.f32 %v3368_v51, %v6543_v28 }
 0x8db   : > { %v3385_v13 = vmul.f32 %v3748_v56, %v3376_v5  ;;  %v3759_v5 = vld [vmem:[%s6422_s10 + $0x38] sm:$0xff] }
 0x8dd   : > { %v3389_v6 = vsel %vm6545_vm4, %v3385_v13, 0.0 }
 0x8e0   : > { %v3371_v3 = vpop.xlane.xlu1 %3370 }
 0x8e1   : > { %v3377_v30 = vmul.f32 %v3371_v3, %v6543_v28 }
 0x8e3   : > { %v3386_v47 = vmul.f32 %v3749_v22, %v3377_v30 }
 0x8e5   : > { %v3391_v7 = vsel %vm6546_vm6, %v3386_v47, 0.0 }
 0x8f0   : > { %v3365_v27 = vpop.xlane.xlu0 %3364 }
 0x8f1   : > { %v3375_v41 = vmul.f32 %v3365_v27, %v6543_v28 }
 0x8f3   : > { %v3384_v21 = vmul.f32 %v3747_v10, %v3375_v41 }
 0x8f5   : > { %v3388_v8 = vsel %vm6544_vm3, %v3384_v21, 0.0 }
 0x8f6   : > { %v3390_v24 = vadd.f32 %v3389_v6, %v3388_v8 }
 0x8f8   : > { %v3374_v33 = vpop.xlane.xlu0 %3373  ;;  %v3392_v63 = vadd.f32 %v3391_v7, %v3390_v24 }
 0x8f9   : > { %v3378_v11 = vmul.f32 %v3374_v33, %v6543_v28 }
 0x8fb   : > { %v3387_v12 = vmul.f32 %v3750_v40, %v3378_v11 }
 0x8fd   : > { %v3393_v52 = vsel %vm6547_vm13, %v3387_v12, 0.0 }
 0x8fe   : > { %v3394_v31 = vadd.f32 %v3393_v52, %v3392_v63 }
 0x900   : > { %v3395_v20 = vrot.slane %v3394_v31, 4 }
 0x902   : > { %v3396_v58 = vadd.f32 %v3395_v20, %v3394_v31 }
 0x904   : > { %v3397_v59 = vrot.slane %v3396_v58, 2 }
 0x906   : > { %v3398_v37 = vadd.f32 %v3397_v59, %v3396_v58 }
 0x908   : > { %v3399_v32 = vrot.slane %v3398_v37, 1 }
 0x90a   : > { %v3400_v1 = vadd.f32 %v3399_v32, %v3398_v37 }
 0x90c   : > { %v3403_v50 = vadd.f32 %v3751_v60, %v3400_v1 }
 0x90e   : > { %v3404_v18 = vmax.f32 %v3403_v50, 0.0 }
 0x910   : > { %v3410_v34 = vperm.slane %v3404_v18, 0 }
 0x912   : > { %v3413_v35 = vmul.f32 %v3754_v9, %v3410_v34  ;;  %v3412_v49 = vmul.f32 %v3753_v17, %v3410_v34  ;;  %v3411_v53 = vmul.f32 %v3752_v15, %v3410_v34  ;;  %v3414_v54 = vmul.f32 %v3755_v19, %v3410_v34 }
 0x914   : > { %v3421_v42 = vsel %vm6548_vm14, %v3413_v35, 0.0  ;;  %v3418_v62 = vsel %vm6549_vm15, %v3412_v49, 0.0  ;;  %v3415_v43 = vsel %vm6550_vm9, %v3411_v53, 0.0  ;;  %v3424_v57 = vsel %vm6551_vm11, %v3414_v54, 0.0 }
 0x915   : > { %3422 = vadd.xlane.f32.xlu0 %v3421_v42  ;;  %3419 = vadd.xlane.f32.xlu1 %v3418_v62 }
 0x916   : > { %3416 = vadd.xlane.f32.xlu2 %v3415_v43 }
 0x91e   : > { %3425 = vadd.xlane.f32.xlu2 %v3424_v57 }
 0x988   : > { %v3423_v16 = vpop.xlane.xlu0 %3422  ;;  %v3420_v46 = vpop.xlane.xlu1 %3419 }
 0x989   : > { %v3434_v2 = vadd.f32 %v3758_v61, %v3423_v16  ;;  %v3433_v23 = vadd.f32 %v3757_v44, %v3420_v46  ;;  %v3417_v4 = vpop.xlane.xlu2 %3416 }
 0x98a   : > { %v3432_v38 = vadd.f32 %v3756_v36, %v3417_v4 }
 0x98b   : > { %v3762_v48 = vmul.f32 -1.442695, %v3434_v2  ;;  %v3761_v51 = vmul.f32 -1.442695, %v3433_v23 }
 0x98c   : > { %v3760_v28 = vmul.f32 -1.442695, %v3432_v38 }
 0x98d   : > { %3897 = vpow2.f32 %v3762_v48 }
 0x98e   : > { %3899 = vpow2.f32 %v3761_v51 }
 0x98f   : > { %3901 = vpow2.f32 %v3760_v28  ;;  %v6552_v28 = vld [vmem:[#allocation18_spill] sm:$0xff] }
 0x991   : > { %v3426_v56 = vpop.xlane.xlu2 %3425 }
 0x992   : > { %v3435_v3 = vadd.f32 %v3759_v5, %v3426_v56  ;;  %v6553_v56 = vld [vmem:[#allocation19_spill] sm:$0xff] }
 0x993   : > { %v3898_v10 = vpop.eup %3897 }
 0x994   : > { %v3900_v27 = vpop.eup %3899  ;;  %v3450_v41 = vadd.f32 1.0, %v3898_v10  ;;  %v3763_v21 = vmul.f32 -1.442695, %v3435_v3 }
 0x995   : > { %v3902_v13 = vpop.eup %3901  ;;  %v3449_v30 = vadd.f32 1.0, %v3900_v27 }
 0x996   : > { %3903 = vrcp.f32 %v3450_v41  ;;  %v3448_v22 = vadd.f32 1.0, %v3902_v13  ;;  %vm3487_vm12 = vweird.f32 %v3450_v41  ;;  %v3491_v7 = vand.u32 2147483647, %v3450_v41 }
 0x997   : > { %3905 = vrcp.f32 %v3449_v30  ;;  %v3476_v31 = vand.u32 2147483647, %v3449_v30  ;;  %v3493_v20 = vand.u32 2147483648, %v3450_v41  ;;  %v3478_v58 = vand.u32 2147483648, %v3449_v30 }
 0x998   : > { %3907 = vrcp.f32 %v3448_v22  ;;  %v3463_v60 = vand.u32 2147483648, %v3448_v22  ;;  %v3461_v18 = vand.u32 2147483647, %v3448_v22  ;;  %vm3472_vm8 = vweird.f32 %v3449_v30 }
 0x999   : > { %3909 = vpow2.f32 %v3763_v21  ;;  %vm3492_vm0 = vcmp.eq.f32.partialorder %v3491_v7, 8.507059e+37  ;;  %v3494_v17 = vor.u32 1.1754944e-38, %v3493_v20  ;;  %v3479_v15 = vor.u32 1.1754944e-38, %v3478_v58  ;;  %v6554_v21 = vld [vmem:[#allocation20_spill] sm:$0xff] }
 0x99a   : > { %vm3457_vm3 = vweird.f32 %v3448_v22  ;;  %vm3477_vm4 = vcmp.eq.f32.partialorder %v3476_v31, 8.507059e+37  ;;  %v3464_v42 = vor.u32 1.1754944e-38, %v3463_v60  ;;  %vm3462_vm13 = vcmp.eq.f32.partialorder %v3461_v18, 8.507059e+37 }
 0x99c   : > { %v3904_v8 = vpop.eup %3903 }
 0x99d   : > { %v3906_v6 = vpop.eup %3905  ;;  %v3483_v47 = vmul.f32 %v3904_v8, %v3450_v41  ;;  %vm3488_vm10 = vweird.f32 %v3904_v8 }
 0x99e   : > { %v3908_v24 = vpop.eup %3907  ;;  %v3468_v40 = vmul.f32 %v3906_v6, %v3449_v30  ;;  %vm3473_vm1 = vweird.f32 %v3906_v6  ;;  %vm3489_vm5 = vmor %vm3487_vm12, %vm3488_vm10 }
 0x99f   : > { %v3910_v33 = vpop.eup %3909  ;;  %v3484_v11 = vsub.f32 1.0, %v3483_v47  ;;  %v3453_v12 = vmul.f32 %v3908_v24, %v3448_v22  ;;  %vm3458_vm7 = vweird.f32 %v3908_v24  ;;  %vm3474_vm2 = vmor %vm3472_vm8, %vm3473_vm1  ;;  %v6555_v22 = vld [vmem:[#allocation21_spill] sm:$0xff] }
 0x9a0   : > { %v3451_v63 = vadd.f32 1.0, %v3910_v33  ;;  %v3469_v52 = vsub.f32 1.0, %v3468_v40  ;;  %vm3459_vm6 = vmor %vm3457_vm3, %vm3458_vm7 }
 0x9a1   : > { %v3485_v59 = vmul.f32 %v3904_v8, %v3484_v11  ;;  %v3454_v37 = vsub.f32 1.0, %v3453_v12  ;;  %v6559_v11 = vld [vmem:[#allocation17_spill] sm:$0xff] }
 0x9a2   : > { %3911 = vrcp.f32 %v3451_v63  ;;  %v3470_v32 = vmul.f32 %v3906_v6, %v3469_v52  ;;  %v3508_v44 = vand.u32 2147483648, %v3451_v63  ;;  %v3506_v16 = vand.u32 2147483647, %v3451_v63 }
 0x9a3   : > { %v3486_v1 = vadd.f32 %v3904_v8, %v3485_v59  ;;  %v3455_v50 = vmul.f32 %v3908_v24, %v3454_v37  ;;  %vm3502_vm15 = vweird.f32 %v3451_v63 }
 0x9a4   : > { %v3471_v9 = vadd.f32 %v3906_v6, %v3470_v32  ;;  %v3509_v2 = vor.u32 1.1754944e-38, %v3508_v44  ;;  %vm3507_vm11 = vcmp.eq.f32.partialorder %v3506_v16, 8.507059e+37 }
 0x9a5   : > { %v3490_v34 = vsel %vm3489_vm5, %v3904_v8, %v3486_v1  ;;  %v3456_v35 = vadd.f32 %v3908_v24, %v3455_v50 }
 0x9a6   : > { %v3475_v49 = vsel %vm3474_vm2, %v3906_v6, %v3471_v9  ;;  %v3495_v53 = vsel %vm3492_vm0, %v3494_v17, %v3490_v34  ;;  %v6556_v6 = vld [vmem:[#allocation22_spill] sm:$0xff] }
 0x9a7   : > { %v3480_v62 = vsel %vm3477_vm4, %v3479_v15, %v3475_v49  ;;  %3524 = vperm.xlu2 %3877, %v3495_v53   ;;  %v3460_v43 = vsel %vm3459_vm6, %v3908_v24, %v3456_v35  ;;  %v6557_v24 = vld [vmem:[#allocation23_spill] sm:$0xff] }
 0x9a8   : > { %v3912_v19 = vpop.eup %3911  ;;  %3519 = vperm.xlu0 %3878, %v3480_v62   ;;  %v3465_v54 = vsel %vm3462_vm13, %v3464_v42, %v3460_v43 }
 0x9a9   : > { %3514 = vperm.xlu1 %3876, %v3465_v54   ;;  %v3498_v57 = vmul.f32 %v3912_v19, %v3451_v63  ;;  %vm3503_vm14 = vweird.f32 %v3912_v19 }
 0x9aa   : > { %vm3504_vm9 = vmor %vm3502_vm15, %vm3503_vm14 }
 0x9ab   : > { %v3499_v61 = vsub.f32 1.0, %v3498_v57 }
 0x9ad   : > { %v3500_v36 = vmul.f32 %v3912_v19, %v3499_v61 }
 0x9af   : > { %v3501_v46 = vadd.f32 %v3912_v19, %v3500_v36 }
 0x9b1   : > { %v3505_v23 = vsel %vm3504_vm9, %v3912_v19, %v3501_v46 }
 0x9b2   : > { %v3510_v4 = vsel %vm3507_vm11, %v3509_v2, %v3505_v23 }
 0x9b3   : > { %3529 = vperm.xlu0 %3878, %v3510_v4  }
 0xa01   : > { %v3525_v38 = vpop.permute.xlu2 %3524 }
 0xa02   : > { %v3536_v48 = vmul.f32 %v3525_v38, %v6290_v29  ;;  %v3537_v51 = vmul.f32 %v3525_v38, %v6288_v25 }
 0xa04   : > { %v3544_v5 = vadd.f32 %v3536_v48, %v6552_v28  ;;  %v3545_v3 = vadd.f32 %v3537_v51, %v6553_v56 }
 0xa06   : > { %3552 = vst [vmem:[%s440_s29 + $0x20] sm:$0xff] %v3544_v5 }
 0xa07   : > { %3553 = vst [vmem:[%s440_s29 + $0x28] sm:$0xff] %v3545_v3 }
 0xa1a   : > { %v3520_v10 = vpop.permute.xlu0 %3519 }
 0xa1b   : > { %v3534_v27 = vmul.f32 %v3520_v10, %v6284_v14  ;;  %v3535_v41 = vmul.f32 %v3520_v10, %v6282_v26  ;;  %v3515_v13 = vpop.permute.xlu1 %3514 }
 0xa1c   : > { %v3532_v30 = vmul.f32 %v3515_v13, %v6294_v45  ;;  %v3533_v29 = vmul.f32 %v3515_v13, %v6296_v55  ;;  %v6558_v55 = vld [vmem:[#allocation16_spill] sm:$0xff] }
 0xa1d   : > { %v3542_v25 = vadd.f32 %v3534_v27, %v6554_v21  ;;  %v3543_v8 = vadd.f32 %v3535_v41, %v6555_v22 }
 0xa1e   : > { %v3540_v47 = vadd.f32 %v3532_v30, %v6556_v6  ;;  %v3541_v40 = vadd.f32 %v3533_v29, %v6557_v24 }
 0xa1f   : > { %3550 = vst [vmem:[%s440_s29 + $0x10] sm:$0xff] %v3542_v25 }
 0xa20   : > { %3551 = vst [vmem:[%s440_s29 + $0x18] sm:$0xff] %v3543_v8 }
 0xa21   : > { %3548 = vst [vmem:[%s440_s29] sm:$0xff] %v3540_v47 }
 0xa22   : > { %3549 = vst [vmem:[%s440_s29 + $0x8] sm:$0xff] %v3541_v40 }
 0xa25   : > { %v3530_v26 = vpop.permute.xlu0 %3529 }
 0xa26   : > { %v3538_v14 = vmul.f32 %v3530_v26, %v6300_v39  ;;  %v3539_v45 = vmul.f32 %v3530_v26, %v6302_v0 }
 0xa28   : > { %v3546_v33 = vadd.f32 %v3538_v14, %v6558_v55  ;;  %v3547_v7 = vadd.f32 %v3539_v45, %v6559_v11 }
 0xa2a   : > { %3554 = vst [vmem:[%s440_s29 + $0x30] sm:$0xff] %v3546_v33 }
 0xa2b   : > { %3555 = vst [vmem:[%s440_s29 + $0x38] sm:$0xff] %v3547_v7 }
 0xa2c   : > { %4008 = shalt.err (!%p4005_p8)
}
 0xa2d   : > { %s4067_s16 = smov 256  }
 0xa2e   : > { %3811 = dma.vmem_to_hbm [thread:$0]  (%p4171_p5), %s3570_s15, 1024, %s3572_s17, %s3557_s25, %s4067_s16, %s4067_s16, %s6477_s26  }
 0xa2f PF: > { %p3828_p9 = scmp.ge.s32.totalorder %s4051_s24, 2  ;;  %s3586_s29 = sand.u32 1, %s4039_s21  }
 0xa30   : > { %s3587_s23 = scalar_lea.sflag [#allocation5], %s3586_s29 }
 0xa31   : > { %p3821_p10 = pnand %p3828_p9, %p4175_p6 }
 0xa33   : > { %p3822_p11 = pneg %p3821_p10 }
 0xa35   : > { %4034 = dma.done.wait (%p3822_p11), %s3587_s23, 1024  }
 0xa36   : > { %4036 = vsyncadd (%p3822_p11), %s3587_s23, 4294966272  ;;  %s6560_s24 = sld [smem:[#allocation13_spill]]  ;;  %s6563_s21 = smov %s4043_s22 }
 0xa37   : > { %s6561_s20 = sld [smem:[#allocation12_spill]] }
 0xa38   : > { %s6562_s23 = sld [smem:[#allocation14_spill]] }
 0xa3c   : > { %p24_p12 = scmp.ge.s32.totalorder %s6560_s24, 4  }
 0xa3d   : > { %s6564_s22 = smov %s6561_s20 }
 0xa3e   :  { %26 = sbr.rel (!%p24_p12) target bundleno = 5 (0x5), region = 129 }
 0xa43   :  { %3593 = vsyncpa [#allocation4], 1 }
 0xa44   :  { %3595 = vsyncpa [#allocation4 + $0x1], 1 }
 0xa45   :  { %3596 = vsyncpa [#allocation7], 1 }
 0xa46   :  { %3597 = vsyncpa [#allocation5], 1 }
 0xa47   :  { %3599 = vsyncpa [#allocation5 + $0x1], 1 }

</bundles_post_ra>
